<compile_context>
chip_gen: v7x
topology: tpu7x:2x2x1
jax: 0.10.0
libtpu: 0.0.40
codegen_flags: <defaults>
</compile_context>

<pallas_src>
import jax
import jax.numpy as jnp
from jax.experimental import pallas as pl
from jax.experimental.pallas import tpu as pltpu


def mlp_kernel(x_ref, w1_ref, b1_ref, w2_ref, b2_ref, w3_ref, b3_ref, o_ref):
    # x tile arrives f32 (tiny); cast to bf16 for the MXU. Weights are stored
    # bf16. All matmuls accumulate in f32; biases are added in f32.
    x = x_ref[...].astype(jnp.bfloat16)
    h1 = jnp.dot(x, w1_ref[...], preferred_element_type=jnp.float32)
    h1 = jnp.maximum(h1 + b1_ref[...], 0.0).astype(jnp.bfloat16)
    h2 = jnp.dot(h1, w2_ref[...], preferred_element_type=jnp.float32)
    h2 = jnp.maximum(h2 + b2_ref[...], 0.0).astype(jnp.bfloat16)
    out = jnp.dot(h2, w3_ref[...], preferred_element_type=jnp.float32)
    o_ref[...] = (out + b3_ref[...]).astype(o_ref.dtype)


def actor_forward(x, params, *, block_b=128):
    """x: [B, state_size] f32 -> [B, action_size] f32.

    params holds bf16 weights stored transposed vs PyTorch ([in, out]) and
    f32 biases ([1, out]) — cast once at init, never per call.
    """
    w1, b1 = params["w1"], params["b1"]
    w2, b2 = params["w2"], params["b2"]
    w3, b3 = params["w3"], params["b3"]

    B, state_size = x.shape
    fc1_units = w1.shape[1]
    fc2_units = w2.shape[1]
    action_size = w3.shape[1]

    # Batch tile: must evenly divide B and satisfy the sublane constraint
    # (multiple of 8 for f32 tiles). Fall back to whole-batch if it doesn't.
    bt = min(block_b, B)
    if B % bt != 0 or bt % 8 != 0:
        bt = B
    grid = (B // bt,)

    flops = 2 * B * (state_size * fc1_units
                     + fc1_units * fc2_units
                     + fc2_units * action_size)
    bytes_accessed = (
        2 * (state_size * fc1_units + fc1_units * fc2_units
             + fc2_units * action_size)                       # bf16 weights
        + 4 * (fc1_units + fc2_units + action_size)           # f32 biases
        + 4 * B * state_size + 4 * B * action_size            # x / out (f32)
    )

    def const_spec(shape):
        # Constant index_map -> block fetched once, stays resident in VMEM
        # across the whole batch grid.
        return pl.BlockSpec(shape, lambda i: (0, 0))

    return pl.pallas_call(
        mlp_kernel,
        out_shape=jax.ShapeDtypeStruct((B, action_size), jnp.float32),
        grid=grid,
        in_specs=[
            pl.BlockSpec((bt, state_size), lambda i: (i, 0)),   # x tiles stream
            const_spec((state_size, fc1_units)),
            const_spec((1, fc1_units)),
            const_spec((fc1_units, fc2_units)),
            const_spec((1, fc2_units)),
            const_spec((fc2_units, action_size)),
            const_spec((1, action_size)),
        ],
        out_specs=pl.BlockSpec((bt, action_size), lambda i: (i, 0)),
        compiler_params=pltpu.CompilerParams(
            dimension_semantics=("parallel",)),
        cost_estimate=pl.CostEstimate(
            flops=flops, transcendentals=0, bytes_accessed=bytes_accessed),
    )(x, w1, b1, w2, b2, w3, b3)


def init_params(key, state_size, action_size, fc1_units=1024, fc2_units=1024):
    """PyTorch nn.Linear-style uniform(-1/sqrt(fan_in), 1/sqrt(fan_in)) init.

    Weights returned as [in, out] bf16 (cast ONCE here), biases as [1, out] f32.
    """
    def init_linear(k, fan_in, fan_out):
        kw, kb = jax.random.split(k)
        bound = 1.0 / jnp.sqrt(fan_in)
        w = jax.random.uniform(kw, (fan_in, fan_out), jnp.float32, -bound, bound)
        b = jax.random.uniform(kb, (1, fan_out), jnp.float32, -bound, bound)
        return w, b

    k1, k2, k3 = jax.random.split(key, 3)
    w1, b1 = init_linear(k1, state_size, fc1_units)
    w2, b2 = init_linear(k2, fc1_units, fc2_units)
    w3, b3 = init_linear(k3, fc2_units, action_size)
    return {
        "w1": w1.astype(jnp.bfloat16), "b1": b1,
        "w2": w2.astype(jnp.bfloat16), "b2": b2,
        "w3": w3.astype(jnp.bfloat16), "b3": b3,
    }


def reference_forward(x, params):
    """Pure-JAX reference mirroring the kernel's bf16 storage / f32 accumulation."""
    xb = x.astype(jnp.bfloat16)
    h1 = jnp.dot(xb, params["w1"], preferred_element_type=jnp.float32)
    h1 = jnp.maximum(h1 + params["b1"], 0.0).astype(jnp.bfloat16)
    h2 = jnp.dot(h1, params["w2"], preferred_element_type=jnp.float32)
    h2 = jnp.maximum(h2 + params["b2"], 0.0).astype(jnp.bfloat16)
    out = jnp.dot(h2, params["w3"], preferred_element_type=jnp.float32)
    return out + params["b3"]


if __name__ == "__main__":
    state_size = 32
    action_size = 4
    batch = 256  # two 128-row tiles: weights DMA'd once, stay resident

    key = jax.random.PRNGKey(0)
    k_x, k_p = jax.random.split(key)

    x = jax.random.normal(k_x, (batch, state_size), jnp.float32)
    params = init_params(k_p, state_size, action_size)

    fwd = jax.jit(actor_forward)
    out = jax.block_until_ready(fwd(x, params))

    ref = reference_forward(x, params)
    assert out.shape == (batch, action_size)
    assert out.dtype == jnp.float32
    assert jnp.allclose(out, ref, atol=2e-2, rtol=2e-2)

    print("KERNEL_OK")
</pallas_src>

<mosaic_0001>
module attributes {stable_mosaic.version = 11 : i64} {
  func.func @mlp_kernel(%arg0: i32, %arg1: memref<128x32xf32, #tpu.memory_space<vmem>>, %arg2: memref<32x1024xbf16, #tpu.memory_space<vmem>>, %arg3: memref<1x1024xf32, #tpu.memory_space<vmem>>, %arg4: memref<1024x1024xbf16, #tpu.memory_space<vmem>>, %arg5: memref<1x1024xf32, #tpu.memory_space<vmem>>, %arg6: memref<1024x4xbf16, #tpu.memory_space<vmem>>, %arg7: memref<1x4xf32, #tpu.memory_space<vmem>>, %arg8: memref<128x4xf32, #tpu.memory_space<vmem>>) attributes {dimension_semantics = [#tpu.dimension_semantics<parallel>], iteration_bounds = array<i64: 2>, scalar_prefetch = 0 : i64, scratch_operands = 0 : i64, tpu.core_type = #tpu.core_type<tc>, window_params = [{transform_indices = @transform_0, window_bounds = array<i64: 128, 32>}, {pipeline_mode = #tpu.pipeline_mode<synchronous>, transform_indices = @transform_1, window_bounds = array<i64: 32, 1024>}, {pipeline_mode = #tpu.pipeline_mode<synchronous>, transform_indices = @transform_2, window_bounds = array<i64: 1, 1024>}, {pipeline_mode = #tpu.pipeline_mode<synchronous>, transform_indices = @transform_3, window_bounds = array<i64: 1024, 1024>}, {pipeline_mode = #tpu.pipeline_mode<synchronous>, transform_indices = @transform_4, window_bounds = array<i64: 1, 1024>}, {pipeline_mode = #tpu.pipeline_mode<synchronous>, transform_indices = @transform_5, window_bounds = array<i64: 1024, 4>}, {pipeline_mode = #tpu.pipeline_mode<synchronous>, transform_indices = @transform_6, window_bounds = array<i64: 1, 4>}, {transform_indices = @transform_7, window_bounds = array<i64: 128, 4>}]} {
    %c0 = arith.constant 0 : index
    %c0_0 = arith.constant 0 : index
    %0 = vector.load %arg1[%c0, %c0_0] : memref<128x32xf32, #tpu.memory_space<vmem>>, vector<128x32xf32>
    %1 = arith.truncf %0 : vector<128x32xf32> to vector<128x32xbf16>
    %c0_1 = arith.constant 0 : index
    %c0_2 = arith.constant 0 : index
    %2 = vector.load %arg2[%c0_1, %c0_2] : memref<32x1024xbf16, #tpu.memory_space<vmem>>, vector<32x1024xbf16>
    %cst = arith.constant dense<0.000000e+00> : vector<128x1024xf32>
    %3 = tpu.matmul %1, %2, %cst {dimension_numbers = #tpu.dot_dimension_numbers<[1], [0], [0], [1], [0, 0, 1, 1], [], []>} : vector<128x32xbf16>, vector<32x1024xbf16>, vector<128x1024xf32> -> vector<128x1024xf32>
    %c0_3 = arith.constant 0 : index
    %c0_4 = arith.constant 0 : index
    %4 = vector.load %arg3[%c0_3, %c0_4] : memref<1x1024xf32, #tpu.memory_space<vmem>>, vector<1x1024xf32>
    %5 = vector.broadcast %4 : vector<1x1024xf32> to vector<128x1024xf32>
    %6 = arith.addf %3, %5 : vector<128x1024xf32>
    %cst_5 = arith.constant 0.000000e+00 : f32
    %7 = vector.broadcast %cst_5 : f32 to vector<128x1024xf32>
    %8 = arith.maximumf %6, %7 : vector<128x1024xf32>
    %9 = arith.truncf %8 : vector<128x1024xf32> to vector<128x1024xbf16>
    %c0_6 = arith.constant 0 : index
    %c0_7 = arith.constant 0 : index
    %10 = vector.load %arg4[%c0_6, %c0_7] : memref<1024x1024xbf16, #tpu.memory_space<vmem>>, vector<1024x1024xbf16>
    %cst_8 = arith.constant dense<0.000000e+00> : vector<128x1024xf32>
    %11 = tpu.matmul %9, %10, %cst_8 {dimension_numbers = #tpu.dot_dimension_numbers<[1], [0], [0], [1], [0, 0, 1, 1], [], []>} : vector<128x1024xbf16>, vector<1024x1024xbf16>, vector<128x1024xf32> -> vector<128x1024xf32>
    %c0_9 = arith.constant 0 : index
    %c0_10 = arith.constant 0 : index
    %12 = vector.load %arg5[%c0_9, %c0_10] : memref<1x1024xf32, #tpu.memory_space<vmem>>, vector<1x1024xf32>
    %13 = vector.broadcast %12 : vector<1x1024xf32> to vector<128x1024xf32>
    %14 = arith.addf %11, %13 : vector<128x1024xf32>
    %cst_11 = arith.constant 0.000000e+00 : f32
    %15 = vector.broadcast %cst_11 : f32 to vector<128x1024xf32>
    %16 = arith.maximumf %14, %15 : vector<128x1024xf32>
    %17 = arith.truncf %16 : vector<128x1024xf32> to vector<128x1024xbf16>
    %c0_12 = arith.constant 0 : index
    %c0_13 = arith.constant 0 : index
    %18 = vector.load %arg6[%c0_12, %c0_13] : memref<1024x4xbf16, #tpu.memory_space<vmem>>, vector<1024x4xbf16>
    %cst_14 = arith.constant dense<0.000000e+00> : vector<128x4xf32>
    %19 = tpu.matmul %17, %18, %cst_14 {dimension_numbers = #tpu.dot_dimension_numbers<[1], [0], [0], [1], [0, 0, 1, 1], [], []>} : vector<128x1024xbf16>, vector<1024x4xbf16>, vector<128x4xf32> -> vector<128x4xf32>
    %c0_15 = arith.constant 0 : index
    %c0_16 = arith.constant 0 : index
    %20 = vector.load %arg7[%c0_15, %c0_16] : memref<1x4xf32, #tpu.memory_space<vmem>>, vector<1x4xf32>
    %21 = vector.broadcast %20 : vector<1x4xf32> to vector<128x4xf32>
    %22 = arith.addf %19, %21 : vector<128x4xf32>
    %c0_17 = arith.constant 0 : index
    %c0_18 = arith.constant 0 : index
    %23 = vector.load %arg8[%c0_17, %c0_18] : memref<128x4xf32, #tpu.memory_space<vmem>>, vector<128x4xf32>
    tpu.vector_store %arg8[%c0_17, %c0_18], %22 {strides = array<i32>} : memref<128x4xf32, #tpu.memory_space<vmem>>, vector<128x4xf32>,
    return
  }
  func.func @transform_0(%arg0: i32) -> (i32, i32) {
    %c0_i32 = arith.constant 0 : i32
    %c0_i32_0 = arith.constant 0 : i32
    return %arg0, %c0_i32 : i32, i32
  }
  func.func @transform_1(%arg0: i32) -> (i32, i32) {
    %c0_i32 = arith.constant 0 : i32
    %c0_i32_0 = arith.constant 0 : i32
    %c0_i32_1 = arith.constant 0 : i32
    return %c0_i32, %c0_i32_0 : i32, i32
  }
  func.func @transform_2(%arg0: i32) -> (i32, i32) {
    %c0_i32 = arith.constant 0 : i32
    %c0_i32_0 = arith.constant 0 : i32
    %c0_i32_1 = arith.constant 0 : i32
    return %c0_i32, %c0_i32_0 : i32, i32
  }
  func.func @transform_3(%arg0: i32) -> (i32, i32) {
    %c0_i32 = arith.constant 0 : i32
    %c0_i32_0 = arith.constant 0 : i32
    %c0_i32_1 = arith.constant 0 : i32
    return %c0_i32, %c0_i32_0 : i32, i32
  }
  func.func @transform_4(%arg0: i32) -> (i32, i32) {
    %c0_i32 = arith.constant 0 : i32
    %c0_i32_0 = arith.constant 0 : i32
    %c0_i32_1 = arith.constant 0 : i32
    return %c0_i32, %c0_i32_0 : i32, i32
  }
  func.func @transform_5(%arg0: i32) -> (i32, i32) {
    %c0_i32 = arith.constant 0 : i32
    %c0_i32_0 = arith.constant 0 : i32
    %c0_i32_1 = arith.constant 0 : i32
    return %c0_i32, %c0_i32_0 : i32, i32
  }
  func.func @transform_6(%arg0: i32) -> (i32, i32) {
    %c0_i32 = arith.constant 0 : i32
    %c0_i32_0 = arith.constant 0 : i32
    %c0_i32_1 = arith.constant 0 : i32
    return %c0_i32, %c0_i32_0 : i32, i32
  }
  func.func @transform_7(%arg0: i32) -> (i32, i32) {
    %c0_i32 = arith.constant 0 : i32
    %c0_i32_0 = arith.constant 0 : i32
    return %arg0, %c0_i32 : i32, i32
  }
}

</mosaic_0001>

<bundles_post_ra>
// kernel: actor_forward.1
= control target key start
LH: loop header
LB: loop body
LE: loop exit
PB: predicated region body
PF: predicated region fallthrough
CT: control target
= control target key end

     0   :  { %12 = vsyncpa [#allocation3], 0  ;;  %s11061_s0 = inlined_call_operand.vmem [shape: f32[256,32], index: 0, kind: input, shape index: {}]   ;;  %s11062_s1 = inlined_call_operand.hbm [shape: bf16[32,1024], index: 1, kind: input, shape index: {}]   ;;  %s11063_s2 = inlined_call_operand.hbm [shape: f32[1,1024], index: 2, kind: input, shape index: {}]   ;;  %s11064_s3 = inlined_call_operand.hbm [shape: bf16[1024,1024], index: 3, kind: input, shape index: {}]   ;;  %s11065_s4 = inlined_call_operand.hbm [shape: f32[1,1024], index: 4, kind: input, shape index: {}]   ;;  %s11066_s5 = inlined_call_operand.vmem [shape: bf16[1024,4], index: 5, kind: input, shape index: {}]   ;;  %s11067_s6 = inlined_call_operand.hbm [shape: f32[1,4], index: 6, kind: input, shape index: {}]   ;;  %s11068_s7 = inlined_call_operand.vmem [shape: f32[256,4], index: 7, kind: output, shape index: {}]  }
   0x1   :  { %13 = vsyncpa [#allocation5], 0 }
   0x2   :  { %14 = vsyncpa [#allocation8], 0  ;;  %s9074_s24 = smov 0  }
   0x3 LB: > { %s9026_s25 = smov [#allocation4]   ;;  %s7325_s27 = sadd.s32 4294967295, %s9024_s24   ;;  %s9024_s24 = sphi %s9074_s24, %s20_s24  }
   0x4   : > { %s229_s26 = sshll.u32 %s9026_s25, 4  ;;  %p7327_p0 = scmp.ge.s32.totalorder %s9024_s24, 1  ;;  %s9088_s26 = int_to_ptr.vmem [resolvable:$true] %s229_s26 }
   0x5   : > { %p203_p1 = scmp.lt.s32.totalorder %s9024_s24, 3  ;;  %p9084_p2 = scmp.eq.s32.totalorder %s7325_s27, 0 }
   0x6   : > { %s9027_s30 = smov [#allocation7]   ;;  %s9028_s9 = smov [#allocation2]  }
   0x7   : > { %s11141_s28 = scalar_select %p9084_p2, 1, 0 }
   0x8   : > { %p9090_p3 = pnand %p7327_p0, %p203_p1  ;;  %s253_s8 = sshll.u32 %s9027_s30, 4  ;;  %s9096_s8 = int_to_ptr.vmem [resolvable:$true] %s253_s8 }
   0x9   : > { %s215_s10 = sshll.u32 %s9028_s9, 4  ;;  %s9029_s12 = smov [#allocation6]   ;;  %s9104_s10 = int_to_ptr.vmem [resolvable:$true] %s215_s10 }
   0xa   : > { %s11142_s29 = scalar_select %p9090_p3, 1, 0 }
   0xb   : > { %p8759_p4 = pneg %p9090_p3  ;;  %s9106_s13 = sshll.u32 %s9029_s12, 4  ;;  %s240_s13 = int_to_ptr.vmem [resolvable:$true] %s9106_s13 }
   0xc   : > { %s8866_s16 = scalar_lea.hbm %s11063_s2, 128 }
   0xd   : > { %p9100_p5 = pnand %p9084_p2, %p8759_p4  ;;  %p8867_p6 = scmp.ne.s32.totalorder %s11063_s2, %s8866_s16 }
   0xe   : > { %p8873_p10 = scmp.lt.u32.totalorder %s8866_s16, %s11063_s2 }
   0xf   : > { %p9116_p7 = pneg %p9100_p5 }
  0x11   : > { %p8869_p8 = pnand %p9116_p7, %p8867_p6 }
  0x13   : > { %p8870_p9 = pneg %p8869_p8 }
  0x15   : > { %p8875_p11 = pnand %p8873_p10, %p8870_p9 }
  0x17   : > { %8878 = shalt.err (!%p8875_p11)
}
  0x18   : > { %s8879_s22 = scalar_lea.vmem %s9088_s26, 128  ;;  %p8887_p1 = scmp.lt.s32.totalorder %s9088_s26, %s9088_s26 }
  0x19   : > { %p8880_p12 = scmp.ne.s32.totalorder %s9088_s26, %s8879_s22  ;;  %p8888_p4 = scmp.lt.s32.totalorder %s8879_s22, %s8879_s22 }
  0x1b   : > { %p8882_p13 = pnand %p8880_p12, %p9116_p7  ;;  %p8889_p6 = por %p8888_p4, %p8887_p1 }
  0x1d   : > { %p8883_p0 = pneg %p8882_p13 }
  0x1f   : > { %p8890_p8 = pnand %p8889_p6, %p8883_p0 }
  0x21   : > { %8893 = shalt.err (!%p8890_p8)
}
  0x22   : > { %8765 = dma.hbm_to_vmem [thread:$0]  (!%p9100_p5), %s11063_s2, 128, %s9088_s26, [#allocation5]  }
  0x23   : > { %s8894_s12 = scalar_lea.hbm %s11065_s4, 128 }
  0x24   : > { %p8895_p9 = scmp.ne.s32.totalorder %s11065_s4, %s8894_s12  ;;  %p8901_p12 = scmp.lt.u32.totalorder %s8894_s12, %s11065_s4 }
  0x26   : > { %p8897_p10 = pnand %p8895_p9, %p9116_p7 }
  0x28   : > { %p8898_p11 = pneg %p8897_p10 }
  0x2a   : > { %p8903_p13 = pnand %p8901_p12, %p8898_p11 }
  0x2c   : > { %8906 = shalt.err (!%p8903_p13)
}
  0x2d   : > { %s8907_s26 = scalar_lea.vmem %s9096_s8, 128  ;;  %p8915_p6 = scmp.lt.s32.totalorder %s9096_s8, %s9096_s8 }
  0x2e   : > { %p8908_p0 = scmp.ne.s32.totalorder %s9096_s8, %s8907_s26  ;;  %p8916_p8 = scmp.lt.s32.totalorder %s8907_s26, %s8907_s26 }
  0x30   : > { %p8910_p1 = pnand %p8908_p0, %p9116_p7  ;;  %p8917_p9 = por %p8916_p8, %p8915_p6 }
  0x32   : > { %p8911_p4 = pneg %p8910_p1 }
  0x34   : > { %p8918_p10 = pnand %p8917_p9, %p8911_p4 }
  0x36   : > { %8921 = shalt.err (!%p8918_p10)
}
  0x37   : > { %8771 = dma.hbm_to_vmem [thread:$0]  (!%p9100_p5), %s11065_s4, 128, %s9096_s8, [#allocation8]  }
  0x38   : > { %s8922_s23 = scalar_lea.hbm %s11062_s1, 2048 }
  0x39   : > { %p8923_p11 = scmp.ne.s32.totalorder %s11062_s1, %s8922_s23  ;;  %p8929_p0 = scmp.lt.u32.totalorder %s8922_s23, %s11062_s1 }
  0x3b   : > { %p8925_p12 = pnand %p8923_p11, %p9116_p7 }
  0x3d   : > { %p8926_p13 = pneg %p8925_p12 }
  0x3f   : > { %p8931_p1 = pnand %p8929_p0, %p8926_p13 }
  0x41   : > { %8934 = shalt.err (!%p8931_p1)
}
  0x42   : > { %s8935_s8 = scalar_lea.vmem %s9104_s10, 2048  ;;  %p8943_p9 = scmp.lt.s32.totalorder %s9104_s10, %s9104_s10 }
  0x43   : > { %p8936_p4 = scmp.ne.s32.totalorder %s9104_s10, %s8935_s8  ;;  %p8944_p10 = scmp.lt.s32.totalorder %s8935_s8, %s8935_s8 }
  0x45   : > { %p8938_p6 = pnand %p8936_p4, %p9116_p7  ;;  %p8945_p11 = por %p8944_p10, %p8943_p9 }
  0x47   : > { %p8939_p8 = pneg %p8938_p6 }
  0x49   : > { %p8946_p12 = pnand %p8945_p11, %p8939_p8 }
  0x4b   : > { %8949 = shalt.err (!%p8946_p12)
}
  0x4c   : > { %s9030_s14 = smov 512   ;;  %s9031_s15 = smov 32  }
  0x4d   : > { %8762 = dma.hbm_to_vmem [thread:$0]  (!%p9100_p5), %s11062_s1, 2048, %s9104_s10, [#allocation3], %s9030_s14, %s9030_s14, %s9031_s15  }
  0x4e   : > { %s8950_s20 = scalar_lea.hbm %s11064_s3, 65536 }
  0x4f   : > { %p8951_p13 = scmp.ne.s32.totalorder %s11064_s3, %s8950_s20  ;;  %p8957_p4 = scmp.lt.u32.totalorder %s8950_s20, %s11064_s3 }
  0x51   : > { %p8953_p0 = pnand %p8951_p13, %p9116_p7 }
  0x53   : > { %p8954_p1 = pneg %p8953_p0 }
  0x55   : > { %p8959_p6 = pnand %p8957_p4, %p8954_p1 }
  0x57   : > { %8962 = shalt.err (!%p8959_p6)
}
  0x58   : > { %s8963_s30 = scalar_lea.vmem %s240_s13, 65536  ;;  %p8971_p11 = scmp.lt.s32.totalorder %s240_s13, %s240_s13 }
  0x59   : > { %p8964_p8 = scmp.ne.s32.totalorder %s240_s13, %s8963_s30  ;;  %p8972_p12 = scmp.lt.s32.totalorder %s8963_s30, %s8963_s30 }
  0x5b   : > { %p8966_p9 = pnand %p8964_p8, %p9116_p7  ;;  %p8973_p2 = por %p8972_p12, %p8971_p11 }
  0x5d   : > { %p8967_p10 = pneg %p8966_p9 }
  0x5f   : > { %p8974_p3 = pnand %p8973_p2, %p8967_p10 }
  0x61   : > { %8977 = shalt.err (!%p8974_p3)
}
  0x62   : > { %8768 = dma.hbm_to_vmem [thread:$0]  (!%p9100_p5), %s11064_s3, 65536, %s240_s13, [#allocation5], %s9030_s14, %s9030_s14, %s9031_s15  }
  0x63   : > { %s9032_s12 = smov [#allocation9]   ;;  %s8978_s26 = scalar_lea.hbm %s11067_s6, 16 }
  0x64   : > { %s267_s8 = sshll.u32 %s9032_s12, 4  ;;  %p8979_p13 = scmp.ne.s32.totalorder %s11067_s6, %s8978_s26  ;;  %s268_s8 = int_to_ptr.vmem [resolvable:$true] %s267_s8 }
  0x65   : > { %p8985_p0 = scmp.lt.u32.totalorder %s8978_s26, %s11067_s6 }
  0x66   : > { %p8981_p2 = pnand %p8979_p13, %p9116_p7 }
  0x68   : > { %p8982_p3 = pneg %p8981_p2 }
  0x6a   : > { %p8987_p1 = pnand %p8985_p0, %p8982_p3 }
  0x6c   : > { %8990 = shalt.err (!%p8987_p1)
}
  0x6d   : > { %s8991_s13 = scalar_lea.vmem %s268_s8, 16  ;;  %s8998_s14 = scalar_lea.vmem %s268_s8, 32 }
  0x6e   : > { %p8992_p4 = scmp.ne.s32.totalorder %s268_s8, %s8991_s13  ;;  %p8999_p9 = scmp.lt.s32.totalorder %s268_s8, %s268_s8 }
  0x6f   : > { %p9000_p10 = scmp.lt.s32.totalorder %s8998_s14, %s8991_s13 }
  0x70   : > { %p8994_p6 = pnand %p8992_p4, %p9116_p7 }
  0x71   : > { %p9001_p11 = por %p9000_p10, %p8999_p9 }
  0x72   : > { %p8995_p8 = pneg %p8994_p6 }
  0x74   : > { %p9002_p12 = pnand %p9001_p11, %p8995_p8 }
  0x76   : > { %9005 = shalt.err (!%p9002_p12)
}
  0x77   : > { %8774 = dma.hbm_to_vmem [thread:$0]  (!%p9100_p5), %s11067_s6, 16, %s268_s8, [#allocation8]  }
  0x78   : > { %p11145_p13 = scmp.ne.s32.totalorder %s11142_s29, 0 }
  0x7a   : > { %289 = sbr.rel (%p11145_p13) target bundleno = 1320 (0x528), region = 48 }
  0x81   : > { %p11146_p2 = scmp.ne.s32.totalorder %s11141_s28, 0 }
  0x83   : > { %9011 = dma.done.wait (%p11146_p2), [#allocation3], 2048  }
  0x84   : > { %9013 = vsyncadd (%p11146_p2), [#allocation3], 4294965248 }
  0x85   : > { %9015 = dma.done.wait (%p11146_p2), [#allocation5], 65664  }
  0x86   : > { %9017 = vsyncadd (%p11146_p2), [#allocation5], 4294901632 }
  0x87   : > { %9019 = dma.done.wait (%p11146_p2), [#allocation8], 144  }
  0x88   : > { %9021 = vsyncadd (%p11146_p2), [#allocation8], 4294967152  ;;  %s7340_s29 = sshll.u32 %s7325_s27, 4  ;;  %v9033_v0 = vmov 0   ;;  %v374_v1 = vld [vmem:[#allocation2] sm:$0xff]  ;;  %v375_v11 = vld [vmem:[#allocation2 + $0x8] sm:$0xff] }
  0x89   : > { %569 = vmatprep.mubr.bf16.mxu0 %v9033_v0  ;;  %p338_p5 = scmp.lt.s32.totalorder %s7340_s29, 31  ;;  %682 = vmatprep.mubr.bf16.mxu1 %v9033_v0  ;;  %v378_v2 = vld [vmem:[#allocation2 + $0x20] sm:$0xff]  ;;  %v379_v12 = vld [vmem:[#allocation2 + $0x28] sm:$0xff]  ;;  %vm512_vm0 = vcmask 261120   ;;  %v376_v19 = vld [vmem:[#allocation2 + $0x10] sm:$0xff]  ;;  %vm7202_vm1 = vcmask 31744  }
  0x8a   : > { %v382_v3 = vld [vmem:[#allocation2 + $0x40] sm:$0xff]  ;;  %v7345_v4 = vcombine.high %v374_v1, %v378_v2  ;;  %v7344_v5 = vcombine.low %v374_v1, %v378_v2  ;;  %v7347_v14 = vcombine.high %v375_v11, %v379_v12  ;;  %v7346_v15 = vcombine.low %v375_v11, %v379_v12  ;;  %v383_v16 = vld [vmem:[#allocation2 + $0x48] sm:$0xff]  ;;  %v380_v20 = vld [vmem:[#allocation2 + $0x30] sm:$0xff] }
  0x8b   : > { %s11225_s29 = smov (!%p338_p5, %s7340_s29), 31  ;;  %v386_v6 = vld [vmem:[#allocation2 + $0x60] sm:$0xff]  ;;  %v387_v17 = vld [vmem:[#allocation2 + $0x68] sm:$0xff]  ;;  %v384_v21 = vld [vmem:[#allocation2 + $0x50] sm:$0xff]  ;;  %v7348_v22 = vcombine.low %v376_v19, %v380_v20  ;;  %v7349_v23 = vcombine.high %v376_v19, %v380_v20 }
  0x8c   : > { %s7341_s11 = sshll.u32 %s11225_s29, 3  ;;  %v7353_v7 = vcombine.high %v382_v3, %v386_v6  ;;  %537 = vmatprep.subr.bf16.mxu0 %v7345_v4  ;;  %v7352_v8 = vcombine.low %v382_v3, %v386_v6  ;;  %v7355_v18 = vcombine.high %v383_v16, %v387_v17  ;;  %650 = vmatprep.subr.bf16.mxu1 %v7347_v14  ;;  %v388_v24 = vld [vmem:[#allocation2 + $0x70] sm:$0xff]  ;;  %v377_v25 = vld [vmem:[#allocation2 + $0x18] sm:$0xff]  ;;  %v9257_v35 = vld [vmem:[#allocation6] sm:$0xff] }
  0x8d   : > { %s9246_s19 = scalar_lea.vmem %s11061_s0, %s7341_s11  ;;  %538 = vmatpush1.bf16.msra.mxu0 %v7344_v5  ;;  %v381_v26 = vld [vmem:[#allocation2 + $0x38] sm:$0xff]  ;;  %651 = vmatpush1.bf16.msra.mxu1 %v7346_v15  ;;  %v7354_v27 = vcombine.low %v383_v16, %v387_v17  ;;  %v7357_v28 = vcombine.high %v384_v21, %v388_v24  ;;  %v7356_v34 = vcombine.low %v384_v21, %v388_v24  ;;  %v9259_v36 = vld [vmem:[#allocation6 + $0x20] sm:$0xff]  ;;  %v9265_v41 = vld [vmem:[#allocation6 + $0x8] sm:$0xff]  ;;  %s11009_s20 = scalar_lea.vmem %s11068_s7, %s7341_s11 }
  0x8e   : > { %v350_v9 = vld [vmem:[%s9246_s19] sm:$0xff]  ;;  %v351_v10 = vld [vmem:[%s9246_s19 + $0x8] sm:$0xff]  ;;  %539 = vmatprep.subr.bf16.mxu0 %v7353_v7  ;;  %v352_v29 = vld [vmem:[%s9246_s19 + $0x10] sm:$0xff]  ;;  %652 = vmatprep.subr.bf16.mxu1 %v7355_v18  ;;  %v7351_v30 = vcombine.high %v377_v25, %v381_v26  ;;  %v7350_v37 = vcombine.low %v377_v25, %v381_v26  ;;  %v7393_v40 = vcombine.high %v9257_v35, %v9259_v36 }
  0x8f   : > { %v9250_v13 = vpack.c.bf16 %v351_v10, %v350_v9  ;;  %v353_v31 = vld [vmem:[%s9246_s19 + $0x18] sm:$0xff]  ;;  %v9267_v42 = vld [vmem:[#allocation6 + $0x28] sm:$0xff]  ;;  %v354_v45 = vld [vmem:[%s9246_s19 + $0x20] sm:$0xff]  ;;  %v7392_v2 = vcombine.low %v9257_v35, %v9259_v36 }
  0x90   : > { %v385_v32 = vld [vmem:[#allocation2 + $0x58] sm:$0xff]  ;;  %v9261_v38 = vpack.c.bf16 %v353_v31, %v352_v29  ;;  %v7395_v44 = vcombine.high %v9265_v41, %v9267_v42  ;;  %v355_v46 = vld [vmem:[%s9246_s19 + $0x28] sm:$0xff]  ;;  %v356_v48 = vld [vmem:[%s9246_s19 + $0x30] sm:$0xff]  ;;  %v7394_v10 = vcombine.low %v9265_v41, %v9267_v42 }
  0x91   : > { %540 = vmatpush1.bf16.msra.mxu0 %v7352_v8  ;;  %v389_v33 = vld [vmem:[#allocation2 + $0x78] sm:$0xff]  ;;  %653 = vmatpush1.bf16.msra.mxu1 %v7354_v27  ;;  %v9279_v47 = vpack.c.bf16 %v355_v46, %v354_v45  ;;  %v358_v51 = vld [vmem:[%s9246_s19 + $0x40] sm:$0xff]  ;;  %v359_v52 = vld [vmem:[%s9246_s19 + $0x48] sm:$0xff] }
  0x92   : > { %763 = vmatprep.subr.bf16.mxu0 %v7349_v23  ;;  %876 = vmatprep.subr.bf16.mxu1 %v7351_v30  ;;  %v7359_v39 = vcombine.high %v385_v32, %v389_v33  ;;  %v7358_v43 = vcombine.low %v385_v32, %v389_v33  ;;  %v357_v49 = vld [vmem:[%s9246_s19 + $0x38] sm:$0xff]  ;;  %v9299_v53 = vpack.c.bf16 %v359_v52, %v358_v51  ;;  %v360_v54 = vld [vmem:[%s9246_s19 + $0x50] sm:$0xff]  ;;  %v362_v57 = vld [vmem:[%s9246_s19 + $0x60] sm:$0xff] }
  0x93   : > { %v9289_v50 = vpack.c.bf16 %v357_v49, %v356_v48  ;;  %v361_v55 = vld [vmem:[%s9246_s19 + $0x58] sm:$0xff]  ;;  %v363_v58 = vld [vmem:[%s9246_s19 + $0x68] sm:$0xff]  ;;  %v364_v60 = vld [vmem:[%s9246_s19 + $0x70] sm:$0xff] }
  0x94   : > { %7360 = vmatmul.mubr.msk.bf16.vlgmr.msra.gmra.mrb[0].mxu0 %vm512_vm0, %v9250_v13  ;;  %7368 = vmatmul.mubr.msk.bf16.vlgmr.msra.gmra.mrb[0].mxu1 %vm512_vm0, %v9250_v13  ;;  %v9309_v56 = vpack.c.bf16 %v361_v55, %v360_v54  ;;  %v9319_v59 = vpack.c.bf16 %v363_v58, %v362_v57  ;;  %v365_v61 = vld [vmem:[%s9246_s19 + $0x78] sm:$0xff]  ;;  %v1189_v63 = vld [vmem:[#allocation6 + $0x40] sm:$0xff]  ;;  %v1190_v7 = vld [vmem:[#allocation6 + $0x48] sm:$0xff] }
  0x95   : > { %579 = vmatprep.mubr.bf16.mxu0 %v9033_v0  ;;  %764 = vmatpush1.bf16.msra.mxu0 %v7348_v22  ;;  %v9329_v62 = vpack.c.bf16 %v365_v61, %v364_v60  ;;  %v1193_v1 = vld [vmem:[#allocation6 + $0x60] sm:$0xff]  ;;  %v1194_v8 = vld [vmem:[#allocation6 + $0x68] sm:$0xff] }
  0x96   : > { %765 = vmatprep.subr.bf16.mxu0 %v7357_v28  ;;  %692 = vmatprep.mubr.bf16.mxu1 %v9033_v0  ;;  %v7401_v3 = vcombine.high %v1189_v63, %v1193_v1  ;;  %v1197_v4 = vld [vmem:[#allocation6 + $0x80] sm:$0xff]  ;;  %v7400_v6 = vcombine.low %v1189_v63, %v1193_v1  ;;  %v7403_v14 = vcombine.high %v1190_v7, %v1194_v8  ;;  %v1198_v16 = vld [vmem:[#allocation6 + $0x88] sm:$0xff] }
  0x97   : > { %877 = vmatpush1.bf16.msra.mxu1 %v7350_v37  ;;  %v1201_v5 = vld [vmem:[#allocation6 + $0xa0] sm:$0xff]  ;;  %v1202_v17 = vld [vmem:[#allocation6 + $0xa8] sm:$0xff]  ;;  %v7402_v19 = vcombine.low %v1190_v7, %v1194_v8 }
  0x98   : > { %878 = vmatprep.subr.bf16.mxu1 %v7359_v39  ;;  %v7409_v9 = vcombine.high %v1197_v4, %v1201_v5  ;;  %v1205_v11 = vld [vmem:[#allocation6 + $0xc0] sm:$0xff]  ;;  %v7408_v15 = vcombine.low %v1197_v4, %v1201_v5  ;;  %v7411_v22 = vcombine.high %v1198_v16, %v1202_v17  ;;  %v1206_v24 = vld [vmem:[#allocation6 + $0xc8] sm:$0xff]  ;;  %v7410_v26 = vcombine.low %v1198_v16, %v1202_v17 }
  0x99   : > { %766 = vmatpush1.bf16.msra.mxu0 %v7356_v34  ;;  %v1209_v12 = vld [vmem:[#allocation6 + $0xe0] sm:$0xff]  ;;  %v1210_v25 = vld [vmem:[#allocation6 + $0xe8] sm:$0xff] }
  0x9a   : > { %4295 = vmatprep.subr.bf16.mxu0 %v7393_v40  ;;  %v7417_v18 = vcombine.high %v1205_v11, %v1209_v12  ;;  %v1213_v20 = vld [vmem:[#allocation6 + $0x100] sm:$0xff]  ;;  %v7416_v23 = vcombine.low %v1205_v11, %v1209_v12  ;;  %v7419_v29 = vcombine.high %v1206_v24, %v1210_v25  ;;  %v1214_v31 = vld [vmem:[#allocation6 + $0x108] sm:$0xff]  ;;  %v7418_v34 = vcombine.low %v1206_v24, %v1210_v25 }
  0x9b   : > { %879 = vmatpush1.bf16.msra.mxu1 %v7358_v43  ;;  %v1217_v21 = vld [vmem:[#allocation6 + $0x120] sm:$0xff]  ;;  %v1218_v32 = vld [vmem:[#allocation6 + $0x128] sm:$0xff] }
  0x9c   : > { %7361 = vmatmul.mubr.msk.bf16.gmra.mrb[4].mxu0 %vm512_vm0, %v9261_v38  ;;  %4747 = vmatprep.subr.bf16.mxu1 %v7395_v44  ;;  %v1221_v27 = vld [vmem:[#allocation6 + $0x140] sm:$0xff]  ;;  %v7424_v30 = vcombine.low %v1213_v20, %v1217_v21  ;;  %v7427_v37 = vcombine.high %v1214_v31, %v1218_v32  ;;  %v1222_v40 = vld [vmem:[#allocation6 + $0x148] sm:$0xff]  ;;  %v7426_v42 = vcombine.low %v1214_v31, %v1218_v32 }
  0x9d   : > { %589 = vmatprep.mubr.bf16.mxu0 %v9033_v0  ;;  %7369 = vmatmul.mubr.msk.bf16.gmra.mrb[4].mxu1 %vm512_vm0, %v9261_v38  ;;  %v1225_v28 = vld [vmem:[#allocation6 + $0x160] sm:$0xff]  ;;  %v1226_v41 = vld [vmem:[#allocation6 + $0x168] sm:$0xff] }
  0x9e   : > { %702 = vmatprep.mubr.bf16.mxu1 %v9033_v0  ;;  %v7433_v33 = vcombine.high %v1221_v27, %v1225_v28  ;;  %v1229_v35 = vld [vmem:[#allocation6 + $0x180] sm:$0xff]  ;;  %v7432_v39 = vcombine.low %v1221_v27, %v1225_v28  ;;  %v7435_v45 = vcombine.high %v1222_v40, %v1226_v41  ;;  %v1230_v48 = vld [vmem:[#allocation6 + $0x188] sm:$0xff]  ;;  %v7434_v52 = vcombine.low %v1222_v40, %v1226_v41 }
  0x9f   : > { %v1233_v36 = vld [vmem:[#allocation6 + $0x1a0] sm:$0xff]  ;;  %v1234_v49 = vld [vmem:[#allocation6 + $0x1a8] sm:$0xff] }
  0xa0   : > { %v1237_v43 = vld [vmem:[#allocation6 + $0x1c0] sm:$0xff]  ;;  %v7440_v46 = vcombine.low %v1229_v35, %v1233_v36  ;;  %v7443_v57 = vcombine.high %v1230_v48, %v1234_v49  ;;  %v1238_v60 = vld [vmem:[#allocation6 + $0x1c8] sm:$0xff] }
  0xa1   : > { %v1241_v44 = vld [vmem:[#allocation6 + $0x1e0] sm:$0xff]  ;;  %v1242_v61 = vld [vmem:[#allocation6 + $0x1e8] sm:$0xff] }
  0xa2   : > { %v7449_v51 = vcombine.high %v1237_v43, %v1241_v44  ;;  %v1245_v54 = vld [vmem:[#allocation6 + $0x200] sm:$0xff]  ;;  %v7448_v58 = vcombine.low %v1237_v43, %v1241_v44  ;;  %v9369_v5 = vld [vmem:[#allocation6 + $0x408] sm:$0xff] }
  0xa3   : > { %v1249_v55 = vld [vmem:[#allocation6 + $0x220] sm:$0xff]  ;;  %v9371_v7 = vld [vmem:[#allocation6 + $0x428] sm:$0xff] }
  0xa4   : > { %7362 = vmatmul.mubr.msk.bf16.gmra.mrb[8].mxu0 %vm512_vm0, %v9279_v47  ;;  %v1253_v63 = vld [vmem:[#allocation6 + $0x240] sm:$0xff]  ;;  %v7456_v8 = vcombine.low %v1245_v54, %v1249_v55  ;;  %v7522_v12 = vcombine.low %v9369_v5, %v9371_v7  ;;  %v1266_v27 = vld [vmem:[#allocation6 + $0x2a8] sm:$0xff] }
  0xa5   : > { %599 = vmatprep.mubr.bf16.mxu0 %v9033_v0  ;;  %7370 = vmatmul.mubr.msk.bf16.gmra.mrb[8].mxu1 %vm512_vm0, %v9279_v47  ;;  %v1257_v1 = vld [vmem:[#allocation6 + $0x260] sm:$0xff] }
  0xa6   : > { %712 = vmatprep.mubr.bf16.mxu1 %v9033_v0  ;;  %v9367_v4 = vld [vmem:[#allocation6 + $0x420] sm:$0xff] }
  0xa7   : > { %v1261_v16 = vld [vmem:[#allocation6 + $0x280] sm:$0xff] }
  0xa8   : > { %v1265_v17 = vld [vmem:[#allocation6 + $0x2a0] sm:$0xff] }
  0xa9   : > { %v1273_v24 = vld [vmem:[#allocation6 + $0x2e0] sm:$0xff] }
  0xaa   : > { %v1281_v31 = vld [vmem:[#allocation6 + $0x320] sm:$0xff] }
  0xac   : > { %7363 = vmatmul.mubr.msk.bf16.gmra.mrb[12].mxu0 %vm512_vm0, %v9289_v50 }
  0xad   : > { %609 = vmatprep.mubr.bf16.mxu0 %v9033_v0  ;;  %7371 = vmatmul.mubr.msk.bf16.gmra.mrb[12].mxu1 %vm512_vm0, %v9289_v50 }
  0xae   : > { %722 = vmatprep.mubr.bf16.mxu1 %v9033_v0 }
  0xb4   : > { %7364 = vmatmul.mubr.msk.bf16.gmra.mrb[16].mxu0 %vm512_vm0, %v9299_v53 }
  0xb5   : > { %619 = vmatprep.mubr.bf16.mxu0 %v9033_v0  ;;  %7372 = vmatmul.mubr.msk.bf16.gmra.mrb[16].mxu1 %vm512_vm0, %v9299_v53 }
  0xb6   : > { %732 = vmatprep.mubr.bf16.mxu1 %v9033_v0 }
  0xbc   : > { %7365 = vmatmul.mubr.msk.bf16.gmra.mrb[20].mxu0 %vm512_vm0, %v9309_v56 }
  0xbd   : > { %629 = vmatprep.mubr.bf16.mxu0 %v9033_v0  ;;  %7373 = vmatmul.mubr.msk.bf16.gmra.mrb[20].mxu1 %vm512_vm0, %v9309_v56 }
  0xbe   : > { %742 = vmatprep.mubr.bf16.mxu1 %v9033_v0 }
  0xc4   : > { %7366 = vmatmul.mubr.msk.bf16.gmra.mrb[24].mxu0 %vm512_vm0, %v9319_v59 }
  0xc5   : > { %639 = vmatprep.mubr.bf16.mxu0 %v9033_v0  ;;  %7374 = vmatmul.mubr.msk.bf16.gmra.mrb[24].mxu1 %vm512_vm0, %v9319_v59 }
  0xc6   : > { %752 = vmatprep.mubr.bf16.mxu1 %v9033_v0 }
  0xcc   : > { %7367 = vmatmul.mubr.msk.bf16.gmra.mrb[28].mxu0 %vm512_vm0, %v9329_v62 }
  0xcd   : > { %795 = vmatprep.mubr.bf16.mxu0 %v9033_v0  ;;  %7375 = vmatmul.mubr.msk.bf16.gmra.mrb[28].mxu1 %vm512_vm0, %v9329_v62 }
  0xce   : > { %908 = vmatprep.mubr.bf16.mxu1 %v9033_v0 }
  0xd4   : > { %7376 = vmatmul.mubr.msk.bf16.vlgmr.msra.gmra.mrb[32].mxu0 %vm512_vm0, %v9250_v13 }
  0xd5   : > { %805 = vmatprep.mubr.bf16.mxu0 %v9033_v0  ;;  %4296 = vmatpush1.bf16.msra.mxu0 %v7392_v2  ;;  %v7442_v2 = vcombine.low %v1230_v48, %v1234_v49 }
  0xd6   : > { %4297 = vmatprep.subr.bf16.mxu0 %v7401_v3  ;;  %7384 = vmatmul.mubr.msk.bf16.vlgmr.msra.gmra.mrb[32].mxu1 %vm512_vm0, %v9250_v13  ;;  %v7425_v13 = vcombine.high %v1213_v20, %v1217_v21  ;;  %v9365_v3 = vld [vmem:[#allocation6 + $0x400] sm:$0xff]  ;;  %v1254_v20 = vld [vmem:[#allocation6 + $0x248] sm:$0xff] }
  0xd7   : > { %4748 = vmatpush1.bf16.msra.mxu1 %v7394_v10  ;;  %918 = vmatprep.mubr.bf16.mxu1 %v9033_v0  ;;  %v1250_v10 = vld [vmem:[#allocation6 + $0x228] sm:$0xff]  ;;  %v7520_v11 = vcombine.low %v9365_v3, %v9367_v4 }
  0xd8   : > { %4749 = vmatprep.subr.bf16.mxu1 %v7403_v14  ;;  %v7465_v14 = vcombine.high %v1253_v63, %v1257_v1  ;;  %v1258_v21 = vld [vmem:[#allocation6 + $0x268] sm:$0xff] }
  0xd9   : > { %4298 = vmatpush1.bf16.msra.mxu0 %v7400_v6  ;;  %v7451_v6 = vcombine.high %v1238_v60, %v1242_v61  ;;  %v7467_v25 = vcombine.high %v1254_v20, %v1258_v21 }
  0xda   : > { %4299 = vmatprep.subr.bf16.mxu0 %v7409_v9  ;;  %v1246_v9 = vld [vmem:[#allocation6 + $0x208] sm:$0xff] }
  0xdb   : > { %4750 = vmatpush1.bf16.msra.mxu1 %v7402_v19  ;;  %v7464_v19 = vcombine.low %v1253_v63, %v1257_v1 }
  0xdc   : > { %7377 = vmatmul.mubr.msk.bf16.gmra.mrb[36].mxu0 %vm512_vm0, %v9261_v38  ;;  %4751 = vmatprep.subr.bf16.mxu1 %v7411_v22  ;;  %v7458_v22 = vcombine.low %v1246_v9, %v1250_v10 }
  0xdd   : > { %815 = vmatprep.mubr.bf16.mxu0 %v9033_v0  ;;  %4300 = vmatpush1.bf16.msra.mxu0 %v7408_v15  ;;  %v7450_v15 = vcombine.low %v1238_v60, %v1242_v61  ;;  %v1294_v61 = vld [vmem:[#allocation6 + $0x388] sm:$0xff] }
  0xde   : > { %4301 = vmatprep.subr.bf16.mxu0 %v7417_v18  ;;  %7385 = vmatmul.mubr.msk.bf16.gmra.mrb[36].mxu1 %vm512_vm0, %v9261_v38  ;;  %v7441_v38 = vcombine.high %v1229_v35, %v1233_v36  ;;  %v7459_v18 = vcombine.high %v1246_v9, %v1250_v10  ;;  %v1274_v35 = vld [vmem:[#allocation6 + $0x2e8] sm:$0xff]  ;;  %v7521_v10 = vcombine.high %v9365_v3, %v9367_v4  ;;  %v9478_v3 = vld [vmem:[#allocation6 + $0x4e0] sm:$0xff] }
  0xdf   : > { %4752 = vmatpush1.bf16.msra.mxu1 %v7410_v26  ;;  %928 = vmatprep.mubr.bf16.mxu1 %v9033_v0  ;;  %v1262_v26 = vld [vmem:[#allocation6 + $0x288] sm:$0xff] }
  0xe0   : > { %4753 = vmatprep.subr.bf16.mxu1 %v7419_v29  ;;  %v7466_v29 = vcombine.low %v1254_v20, %v1258_v21  ;;  %v7475_v32 = vcombine.high %v1262_v26, %v1266_v27  ;;  %v7474_v36 = vcombine.low %v1262_v26, %v1266_v27  ;;  %v1306_v9 = vld [vmem:[#allocation6 + $0x3e8] sm:$0xff] }
  0xe1   : > { %4302 = vmatpush1.bf16.msra.mxu0 %v7416_v23  ;;  %v1269_v23 = vld [vmem:[#allocation6 + $0x2c0] sm:$0xff] }
  0xe2   : > { %4303 = vmatprep.subr.bf16.mxu0 %v7425_v13  ;;  %v7472_v13 = vcombine.low %v1261_v16, %v1265_v17  ;;  %v7481_v28 = vcombine.high %v1269_v23, %v1273_v24 }
  0xe3   : > { %4754 = vmatpush1.bf16.msra.mxu1 %v7418_v34  ;;  %v1270_v34 = vld [vmem:[#allocation6 + $0x2c8] sm:$0xff] }
  0xe4   : > { %7378 = vmatmul.mubr.msk.bf16.gmra.mrb[40].mxu0 %vm512_vm0, %v9279_v47  ;;  %4755 = vmatprep.subr.bf16.mxu1 %v7427_v37  ;;  %v1285_v37 = vld [vmem:[#allocation6 + $0x340] sm:$0xff]  ;;  %v7483_v40 = vcombine.high %v1270_v34, %v1274_v35  ;;  %v7482_v44 = vcombine.low %v1270_v34, %v1274_v35 }
  0xe5   : > { %825 = vmatprep.mubr.bf16.mxu0 %v9033_v0  ;;  %4304 = vmatpush1.bf16.msra.mxu0 %v7424_v30  ;;  %v1277_v30 = vld [vmem:[#allocation6 + $0x300] sm:$0xff] }
  0xe6   : > { %4305 = vmatprep.subr.bf16.mxu0 %v7433_v33  ;;  %7386 = vmatmul.mubr.msk.bf16.gmra.mrb[40].mxu1 %vm512_vm0, %v9279_v47  ;;  %v7457_v47 = vcombine.high %v1245_v54, %v1249_v55  ;;  %v7480_v33 = vcombine.low %v1269_v23, %v1273_v24  ;;  %v7488_v41 = vcombine.low %v1277_v30, %v1281_v31  ;;  %v1301_v55 = vld [vmem:[#allocation6 + $0x3c0] sm:$0xff] }
  0xe7   : > { %4756 = vmatpush1.bf16.msra.mxu1 %v7426_v42  ;;  %938 = vmatprep.mubr.bf16.mxu1 %v9033_v0  ;;  %v1282_v42 = vld [vmem:[#allocation6 + $0x328] sm:$0xff]  ;;  %v9438_v34 = vld [vmem:[#allocation6 + $0x440] sm:$0xff] }
  0xe8   : > { %4757 = vmatprep.subr.bf16.mxu1 %v7435_v45  ;;  %v1293_v45 = vld [vmem:[#allocation6 + $0x380] sm:$0xff] }
  0xe9   : > { %4306 = vmatpush1.bf16.msra.mxu0 %v7432_v39  ;;  %v1289_v39 = vld [vmem:[#allocation6 + $0x360] sm:$0xff] }
  0xea   : > { %4307 = vmatprep.subr.bf16.mxu0 %v7441_v38  ;;  %v1278_v38 = vld [vmem:[#allocation6 + $0x308] sm:$0xff]  ;;  %v7497_v43 = vcombine.high %v1285_v37, %v1289_v39  ;;  %v7496_v49 = vcombine.low %v1285_v37, %v1289_v39  ;;  %v1321_v35 = vld [vmem:[#allocation6 + $0x460] sm:$0xff] }
  0xeb   : > { %4758 = vmatpush1.bf16.msra.mxu1 %v7434_v52  ;;  %v7491_v48 = vcombine.high %v1278_v38, %v1282_v42  ;;  %v1290_v52 = vld [vmem:[#allocation6 + $0x368] sm:$0xff]  ;;  %v7490_v54 = vcombine.low %v1278_v38, %v1282_v42 }
  0xec   : > { %7379 = vmatmul.mubr.msk.bf16.gmra.mrb[44].mxu0 %vm512_vm0, %v9289_v50  ;;  %4759 = vmatprep.subr.bf16.mxu1 %v7443_v57  ;;  %v1305_v57 = vld [vmem:[#allocation6 + $0x3e0] sm:$0xff]  ;;  %v1318_v37 = vld [vmem:[#allocation6 + $0x448] sm:$0xff] }
  0xed   : > { %835 = vmatprep.mubr.bf16.mxu0 %v9033_v0  ;;  %4308 = vmatpush1.bf16.msra.mxu0 %v7440_v46  ;;  %v1297_v46 = vld [vmem:[#allocation6 + $0x3a0] sm:$0xff]  ;;  %v7513_v63 = vcombine.high %v1301_v55, %v1305_v57  ;;  %v1322_v39 = vld [vmem:[#allocation6 + $0x468] sm:$0xff] }
  0xee   : > { %4309 = vmatprep.subr.bf16.mxu0 %v7449_v51  ;;  %7387 = vmatmul.mubr.msk.bf16.gmra.mrb[44].mxu1 %vm512_vm0, %v9289_v50  ;;  %v7473_v50 = vcombine.high %v1261_v16, %v1265_v17  ;;  %v1286_v51 = vld [vmem:[#allocation6 + $0x348] sm:$0xff]  ;;  %v7504_v60 = vcombine.low %v1293_v45, %v1297_v46  ;;  %v392_v16 = vlaneseq }
  0xef   : > { %4760 = vmatpush1.bf16.msra.mxu1 %v7442_v2  ;;  %948 = vmatprep.mubr.bf16.mxu1 %v9033_v0  ;;  %v7498_v1 = vcombine.low %v1286_v51, %v1290_v52 }
  0xf0   : > { %4761 = vmatprep.subr.bf16.mxu1 %v7451_v6  ;;  %v7512_v6 = vcombine.low %v1301_v55, %v1305_v57  ;;  %v9406_v17 = vshrl.u32 %v392_v16, 7 }
  0xf1   : > { %4310 = vmatpush1.bf16.msra.mxu0 %v7448_v58  ;;  %v7499_v58 = vcombine.high %v1286_v51, %v1290_v52  ;;  %v7531_v52 = vcombine.high %v1318_v37, %v1322_v39 }
  0xf2   : > { %4311 = vmatprep.subr.bf16.mxu0 %v7457_v47  ;;  %v1298_v47 = vld [vmem:[#allocation6 + $0x3a8] sm:$0xff]  ;;  %11147 = vst [vmem:[#allocation13_spill] sm:$0xff] %v9406_v17  ;;  %v11073_v20 = vsub.s32 1, %v9406_v17  ;;  %v11072_v23 = vsub.s32 3, %v9406_v17 }
  0xf3   : > { %4762 = vmatpush1.bf16.msra.mxu1 %v7450_v15  ;;  %v7507_v2 = vcombine.high %v1294_v61, %v1298_v47  ;;  %v7523_v15 = vcombine.high %v9369_v5, %v9371_v7 }
  0xf4   : > { %7380 = vmatmul.mubr.msk.bf16.gmra.mrb[48].mxu0 %vm512_vm0, %v9299_v53  ;;  %4763 = vmatprep.subr.bf16.mxu1 %v7459_v18  ;;  %v11075_v18 = vsub.s32 0, %v9406_v17 }
  0xf5   : > { %845 = vmatprep.mubr.bf16.mxu0 %v9033_v0  ;;  %4312 = vmatpush1.bf16.msra.mxu0 %v7456_v8  ;;  %v1302_v8 = vld [vmem:[#allocation6 + $0x3c8] sm:$0xff] }
  0xf6   : > { %4313 = vmatprep.subr.bf16.mxu0 %v7465_v14  ;;  %7388 = vmatmul.mubr.msk.bf16.gmra.mrb[48].mxu1 %vm512_vm0, %v9299_v53  ;;  %v7489_v53 = vcombine.high %v1277_v30, %v1281_v31  ;;  %v7515_v14 = vcombine.high %v1302_v8, %v1306_v9 }
  0xf7   : > { %4764 = vmatpush1.bf16.msra.mxu1 %v7458_v22  ;;  %958 = vmatprep.mubr.bf16.mxu1 %v9033_v0 }
  0xf8   : > { %4765 = vmatprep.subr.bf16.mxu1 %v7467_v25 }
  0xf9   : > { %4314 = vmatpush1.bf16.msra.mxu0 %v7464_v19  ;;  %v9409_v19 = vld [vmem:[#allocation4] sm:$0xff] }
  0xfa   : > { %4315 = vmatprep.subr.bf16.mxu0 %v7473_v50  ;;  %v9420_v21 = vrot.slane %v9409_v19, %v11073_v20  ;;  %v11074_v50 = vsub.s32 2, %v9406_v17  ;;  %v9436_v31 = vrot.slane %v9409_v19, %v11072_v23 }
  0xfb   : > { %4766 = vmatpush1.bf16.msra.mxu1 %v7466_v29 }
  0xfc   : > { %7381 = vmatmul.mubr.msk.bf16.gmra.mrb[52].mxu0 %vm512_vm0, %v9309_v56  ;;  %4767 = vmatprep.subr.bf16.mxu1 %v7475_v32  ;;  %v9430_v29 = vrot.slane %v9409_v19, %v11074_v50  ;;  %v9796_v50 = vld [vmem:[#allocation6 + $0x7e0] sm:$0xff] }
  0xfd   : > { %855 = vmatprep.mubr.bf16.mxu0 %v9033_v0  ;;  %4316 = vmatpush1.bf16.msra.mxu0 %v7472_v13 }
  0xfe   : > { %4317 = vmatprep.subr.bf16.mxu0 %v7481_v28  ;;  %7389 = vmatmul.mubr.msk.bf16.gmra.mrb[52].mxu1 %vm512_vm0, %v9309_v56  ;;  %v7505_v56 = vcombine.high %v1293_v45, %v1297_v46  ;;  %v7529_v45 = vcombine.high %v9438_v34, %v1321_v35 }
  0xff   : > { %4768 = vmatpush1.bf16.msra.mxu1 %v7474_v36  ;;  %968 = vmatprep.mubr.bf16.mxu1 %v9033_v0 }
 0x100   : > { %4769 = vmatprep.subr.bf16.mxu1 %v7483_v40 }
 0x101   : > { %4318 = vmatpush1.bf16.msra.mxu0 %v7480_v33 }
 0x102   : > { %4319 = vmatprep.subr.bf16.mxu0 %v7489_v53 }
 0x103   : > { %4770 = vmatpush1.bf16.msra.mxu1 %v7482_v44 }
 0x104   : > { %7382 = vmatmul.mubr.msk.bf16.gmra.mrb[56].mxu0 %vm512_vm0, %v9319_v59  ;;  %4771 = vmatprep.subr.bf16.mxu1 %v7491_v48 }
 0x105   : > { %865 = vmatprep.mubr.bf16.mxu0 %v9033_v0  ;;  %4320 = vmatpush1.bf16.msra.mxu0 %v7488_v41 }
 0x106   : > { %4321 = vmatprep.subr.bf16.mxu0 %v7497_v43  ;;  %7390 = vmatmul.mubr.msk.bf16.gmra.mrb[56].mxu1 %vm512_vm0, %v9319_v59  ;;  %v7506_v59 = vcombine.low %v1294_v61, %v1298_v47  ;;  %v9456_v47 = vld [vmem:[#allocation6 + $0x488] sm:$0xff] }
 0x107   : > { %4772 = vmatpush1.bf16.msra.mxu1 %v7490_v54  ;;  %978 = vmatprep.mubr.bf16.mxu1 %v9033_v0  ;;  %v7514_v0 = vcombine.low %v1302_v8, %v1306_v9  ;;  %v9450_v54 = vld [vmem:[#allocation6 + $0x4a0] sm:$0xff]  ;;  %v7528_v9 = vcombine.low %v9438_v34, %v1321_v35 }
 0x108   : > { %4773 = vmatprep.subr.bf16.mxu1 %v7499_v58 }
 0x109   : > { %4322 = vmatpush1.bf16.msra.mxu0 %v7496_v49 }
 0x10a   : > { %4323 = vmatprep.subr.bf16.mxu0 %v7505_v56  ;;  %v9448_v56 = vld [vmem:[#allocation6 + $0x480] sm:$0xff] }
 0x10b   : > { %4774 = vmatpush1.bf16.msra.mxu1 %v7498_v1 }
 0x10c   : > { %7383 = vmatmul.mubr.msk.bf16.gmra.mrb[60].mxu0 %vm512_vm0, %v9329_v62  ;;  %4775 = vmatprep.subr.bf16.mxu1 %v7507_v2 }
 0x10d   : > { %4324 = vmatpush1.bf16.msra.mxu0 %v7504_v60 }
 0x10e   : > { %4325 = vmatprep.subr.bf16.mxu0 %v7513_v63  ;;  %7391 = vmatmul.mubr.msk.bf16.gmra.mrb[60].mxu1 %vm512_vm0, %v9329_v62  ;;  %v9415_v62 = vrot.slane %v9409_v19, %v11075_v18  ;;  %v9458_v63 = vld [vmem:[#allocation6 + $0x4a8] sm:$0xff] }
 0x10f   : > { %4776 = vmatpush1.bf16.msra.mxu1 %v7506_v59 }
 0x110   : > { %4777 = vmatprep.subr.bf16.mxu1 %v7515_v14  ;;  %v7530_v14 = vcombine.low %v1318_v37, %v1322_v39 }
 0x111   : > { %4326 = vmatpush1.bf16.msra.mxu0 %v7512_v6 }
 0x112   : > { %4408 = vmatprep.subr.bf16.mxu0 %v7521_v10 }
 0x113   : > { %4778 = vmatpush1.bf16.msra.mxu1 %v7514_v0  ;;  %v7537_v0 = vcombine.high %v9448_v56, %v9450_v54 }
 0x114   : > { %4860 = vmatprep.subr.bf16.mxu1 %v7523_v15 }
 0x167   : > { %v571_v22 = vpop.f32.mrb[0].mxu0  ;;  %v684_v40 = vpop.f32.mrb[0].mxu1 }
 0x168   : > { %v572_v24 = vadd.f32 %v571_v22, %v9415_v62  ;;  %v573_v25 = vpop.f32.mrb[1].mxu0  ;;  %v685_v38 = vadd.f32 %v684_v40, %v9430_v29  ;;  %v686_v42 = vpop.f32.mrb[1].mxu1 }
 0x169   : > { %v574_v13 = vadd.f32 %v573_v25, %v9420_v21  ;;  %v575_v26 = vpop.f32.mrb[2].mxu0  ;;  %v687_v46 = vadd.f32 %v686_v42, %v9436_v31  ;;  %v688_v48 = vpop.f32.mrb[2].mxu1  ;;  %v9476_v25 = vld [vmem:[#allocation6 + $0x4c0] sm:$0xff] }
 0x16a   : > { %v576_v27 = vadd.f32 %v575_v26, %v9415_v62  ;;  %v577_v28 = vpop.f32.mrb[3].mxu0  ;;  %v989_v32 = vmax.f32 %v572_v24, 0.0  ;;  %v991_v55 = vmax.f32 %v685_v38, 0.0  ;;  %v689_v57 = vadd.f32 %v688_v48, %v9430_v29  ;;  %v690_v58 = vpop.f32.mrb[3].mxu1  ;;  %v9503_v42 = vld [vmem:[#allocation6 + $0x500] sm:$0xff] }
 0x16b   : > { %v578_v30 = vadd.f32 %v577_v28, %v9420_v21  ;;  %v990_v53 = vmax.f32 %v574_v13, 0.0  ;;  %v992_v1 = vmax.f32 %v687_v46, 0.0  ;;  %v691_v2 = vadd.f32 %v690_v58, %v9436_v31 }
 0x16c   : > { %v997_v33 = vmax.f32 %v576_v27, 0.0  ;;  %v999_v10 = vmax.f32 %v689_v57, 0.0  ;;  %v7539_v24 = vcombine.high %v9456_v47, %v9458_v63  ;;  %v7536_v28 = vcombine.low %v9448_v56, %v9450_v54  ;;  %v9513_v56 = vld [vmem:[#allocation6 + $0x528] sm:$0xff] }
 0x16d   : > { %v998_v36 = vmax.f32 %v578_v30, 0.0  ;;  %v1000_v15 = vmax.f32 %v691_v2, 0.0  ;;  %v7538_v30 = vcombine.low %v9456_v47, %v9458_v63 }
 0x16e   : > { %v9440_v41 = vpack.c.bf16 %v997_v33, %v989_v32  ;;  %v9480_v4 = vpack.c.bf16 %v999_v10, %v991_v55  ;;  %v9528_v10 = vld [vmem:[#allocation6 + $0x540] sm:$0xff] }
 0x16f   : > { %v9443_v43 = vpack.c.bf16 %v998_v36, %v990_v53  ;;  %v581_v44 = vpop.f32.mrb[4].mxu0  ;;  %v9486_v13 = vpack.c.bf16 %v1000_v15, %v992_v1  ;;  %v7545_v53 = vcombine.high %v9476_v25, %v9478_v3 }
 0x170   : > { %11148 = vst [vmem:[#allocation14_spill] sm:$0xff] %v9440_v41  ;;  %v582_v49 = vadd.f32 %v581_v44, %v9415_v62  ;;  %v583_v51 = vpop.f32.mrb[5].mxu0  ;;  %11149 = vst [vmem:[#allocation15_spill] sm:$0xff] %v9480_v4  ;;  %v694_v26 = vpop.f32.mrb[4].mxu1  ;;  %v9505_v44 = vld [vmem:[#allocation6 + $0x520] sm:$0xff] }
 0x171   : > { %v584_v60 = vadd.f32 %v583_v51, %v9420_v21  ;;  %v585_v61 = vpop.f32.mrb[6].mxu0  ;;  %4327 = vmatprep.mubr.bf16.mxu0 %v9443_v43  ;;  %4779 = vmatprep.mubr.bf16.mxu1 %v9443_v43  ;;  %11150 = vst [vmem:[#allocation16_spill] sm:$0xff] %v9486_v13  ;;  %v695_v32 = vadd.f32 %v694_v26, %v9430_v29  ;;  %v696_v33 = vpop.f32.mrb[5].mxu1 }
 0x172   : > { %v586_v6 = vadd.f32 %v585_v61, %v9415_v62  ;;  %v587_v8 = vpop.f32.mrb[7].mxu0  ;;  %4328 = vmatmul.mubr.bf16.vlgmr.msra.gmra.mrb[64].mxu0 %v9440_v41  ;;  %4780 = vmatmul.mubr.bf16.vlgmr.msra.gmra.mrb[64].mxu1 %v9440_v41  ;;  %v1005_v16 = vmax.f32 %v582_v49, 0.0  ;;  %v697_v36 = vadd.f32 %v696_v33, %v9436_v31  ;;  %v698_v37 = vpop.f32.mrb[6].mxu1  ;;  %v7553_v1 = vcombine.high %v9503_v42, %v9505_v44 }
 0x173   : > { %v588_v59 = vadd.f32 %v587_v8, %v9420_v21  ;;  %4409 = vmatpush1.bf16.msra.mxu0 %v7520_v11  ;;  %4861 = vmatpush1.bf16.msra.mxu1 %v7522_v12  ;;  %v1006_v5 = vmax.f32 %v584_v60, 0.0  ;;  %v9482_v11 = vld [vmem:[#allocation6 + $0x4c8] sm:$0xff]  ;;  %v699_v46 = vadd.f32 %v698_v37, %v9430_v29  ;;  %v700_v48 = vpop.f32.mrb[7].mxu1  ;;  %v7544_v60 = vcombine.low %v9476_v25, %v9478_v3  ;;  %v9555_v37 = vld [vmem:[#allocation6 + $0x580] sm:$0xff] }
 0x174   : > { %v1013_v22 = vmax.f32 %v586_v6, 0.0  ;;  %4410 = vmatprep.subr.bf16.mxu0 %v7529_v45  ;;  %4862 = vmatprep.subr.bf16.mxu1 %v7531_v52  ;;  %v9484_v12 = vld [vmem:[#allocation6 + $0x4e8] sm:$0xff]  ;;  %v1007_v45 = vmax.f32 %v695_v32, 0.0  ;;  %v1008_v54 = vmax.f32 %v697_v36, 0.0  ;;  %v701_v55 = vadd.f32 %v700_v48, %v9436_v31 }
 0x175   : > { %v1014_v7 = vmax.f32 %v588_v59, 0.0  ;;  %v7547_v38 = vcombine.high %v9482_v11, %v9484_v12  ;;  %v9511_v52 = vld [vmem:[#allocation6 + $0x508] sm:$0xff]  ;;  %v1015_v61 = vmax.f32 %v699_v46, 0.0  ;;  %v7546_v63 = vcombine.low %v9482_v11, %v9484_v12  ;;  %v9530_v59 = vld [vmem:[#allocation6 + $0x560] sm:$0xff] }
 0x176   : > { %v9488_v27 = vpack.c.bf16 %v1013_v22, %v1005_v16  ;;  %v1016_v2 = vmax.f32 %v701_v55, 0.0  ;;  %v9534_v16 = vld [vmem:[#allocation6 + $0x548] sm:$0xff] }
 0x177   : > { %v9495_v34 = vpack.c.bf16 %v1014_v7, %v1006_v5  ;;  %4411 = vmatpush1.bf16.msra.mxu0 %v7528_v9  ;;  %v591_v35 = vpop.f32.mrb[8].mxu0  ;;  %4863 = vmatpush1.bf16.msra.mxu1 %v7530_v14  ;;  %v7555_v9 = vcombine.high %v9511_v52, %v9513_v56  ;;  %v9532_v14 = vpack.c.bf16 %v1015_v61, %v1007_v45  ;;  %v9536_v22 = vld [vmem:[#allocation6 + $0x568] sm:$0xff] }
 0x178   : > { %11151 = vst [vmem:[#allocation17_spill] sm:$0xff] %v9488_v27  ;;  %v592_v39 = vadd.f32 %v591_v35, %v9415_v62  ;;  %v593_v40 = vpop.f32.mrb[9].mxu0  ;;  %4412 = vmatprep.subr.bf16.mxu0 %v7537_v0  ;;  %4864 = vmatprep.subr.bf16.mxu1 %v7539_v24  ;;  %v9538_v24 = vpack.c.bf16 %v1016_v2, %v1008_v54  ;;  %v704_v25 = vpop.f32.mrb[8].mxu1  ;;  %v9563_v46 = vld [vmem:[#allocation6 + $0x588] sm:$0xff]  ;;  %v9580_v2 = vld [vmem:[#allocation6 + $0x5c0] sm:$0xff] }
 0x179   : > { %11152 = vst [vmem:[#allocation18_spill] sm:$0xff] %v9495_v34  ;;  %v594_v49 = vadd.f32 %v593_v40, %v9420_v21  ;;  %v595_v51 = vpop.f32.mrb[10].mxu0  ;;  %4337 = vmatprep.mubr.bf16.mxu0 %v9495_v34  ;;  %4789 = vmatprep.mubr.bf16.mxu1 %v9495_v34  ;;  %11153 = vst [vmem:[#allocation19_spill] sm:$0xff] %v9532_v14  ;;  %v7552_v5 = vcombine.low %v9503_v42, %v9505_v44  ;;  %v706_v12 = vpop.f32.mrb[9].mxu1  ;;  %v9565_v48 = vld [vmem:[#allocation6 + $0x5a8] sm:$0xff] }
 0x17a   : > { %v596_v57 = vadd.f32 %v595_v51, %v9415_v62  ;;  %v597_v58 = vpop.f32.mrb[11].mxu0  ;;  %4338 = vmatmul.mubr.bf16.gmra.mrb[68].mxu0 %v9488_v27  ;;  %4790 = vmatmul.mubr.bf16.gmra.mrb[68].mxu1 %v9488_v27  ;;  %v1021_v6 = vmax.f32 %v592_v39, 0.0  ;;  %11154 = vst [vmem:[#allocation20_spill] sm:$0xff] %v9538_v24  ;;  %v7554_v7 = vcombine.low %v9511_v52, %v9513_v56  ;;  %v708_v33 = vpop.f32.mrb[10].mxu1  ;;  %v9557_v39 = vld [vmem:[#allocation6 + $0x5a0] sm:$0xff] }
 0x17b   : > { %v598_v47 = vadd.f32 %v597_v58, %v9420_v21  ;;  %4413 = vmatpush1.bf16.msra.mxu0 %v7536_v28  ;;  %4865 = vmatpush1.bf16.msra.mxu1 %v7538_v30  ;;  %v1022_v0 = vmax.f32 %v594_v49, 0.0  ;;  %v705_v11 = vadd.f32 %v704_v25, %v9430_v29  ;;  %v7561_v30 = vcombine.high %v9528_v10, %v9530_v59  ;;  %v710_v42 = vpop.f32.mrb[11].mxu1 }
 0x17c   : > { %v1029_v8 = vmax.f32 %v596_v57, 0.0  ;;  %4414 = vmatprep.subr.bf16.mxu0 %v7545_v53  ;;  %4866 = vmatprep.subr.bf16.mxu1 %v7547_v38  ;;  %v707_v32 = vadd.f32 %v706_v12, %v9436_v31  ;;  %v7563_v36 = vcombine.high %v9534_v16, %v9536_v22  ;;  %v709_v38 = vadd.f32 %v708_v33, %v9430_v29 }
 0x17d   : > { %v1030_v15 = vmax.f32 %v598_v47, 0.0  ;;  %v1023_v40 = vmax.f32 %v705_v11, 0.0  ;;  %v711_v51 = vadd.f32 %v710_v42, %v9436_v31  ;;  %v7560_v54 = vcombine.low %v9528_v10, %v9530_v59  ;;  %v9586_v59 = vld [vmem:[#allocation6 + $0x5c8] sm:$0xff] }
 0x17e   : > { %v9540_v3 = vpack.c.bf16 %v1029_v8, %v1021_v6  ;;  %v1024_v49 = vmax.f32 %v707_v32, 0.0  ;;  %v1031_v55 = vmax.f32 %v709_v38, 0.0  ;;  %v7562_v58 = vcombine.low %v9534_v16, %v9536_v22  ;;  %v9582_v6 = vld [vmem:[#allocation6 + $0x5e0] sm:$0xff] }
 0x17f   : > { %v9547_v26 = vpack.c.bf16 %v1030_v15, %v1022_v0  ;;  %4415 = vmatpush1.bf16.msra.mxu0 %v7544_v60  ;;  %v601_v28 = vpop.f32.mrb[12].mxu0  ;;  %4867 = vmatpush1.bf16.msra.mxu1 %v7546_v63  ;;  %v7569_v60 = vcombine.high %v9555_v37, %v9557_v39  ;;  %v1032_v61 = vmax.f32 %v711_v51, 0.0  ;;  %v9588_v0 = vld [vmem:[#allocation6 + $0x5e8] sm:$0xff]  ;;  %v7568_v25 = vcombine.low %v9555_v37, %v9557_v39  ;;  %v9607_v37 = vld [vmem:[#allocation6 + $0x600] sm:$0xff] }
 0x180   : > { %11155 = vst [vmem:[#allocation21_spill] sm:$0xff] %v9540_v3  ;;  %v602_v35 = vadd.f32 %v601_v28, %v9415_v62  ;;  %v603_v53 = vpop.f32.mrb[13].mxu0  ;;  %4416 = vmatprep.subr.bf16.mxu0 %v7553_v1  ;;  %4868 = vmatprep.subr.bf16.mxu1 %v7555_v9  ;;  %v7571_v1 = vcombine.high %v9563_v46, %v9565_v48  ;;  %v714_v16 = vpop.f32.mrb[12].mxu1  ;;  %v9609_v39 = vld [vmem:[#allocation6 + $0x620] sm:$0xff] }
 0x181   : > { %11156 = vst [vmem:[#allocation22_spill] sm:$0xff] %v9547_v26  ;;  %v604_v44 = vadd.f32 %v603_v53, %v9420_v21  ;;  %v605_v45 = vpop.f32.mrb[14].mxu0  ;;  %4347 = vmatprep.mubr.bf16.mxu0 %v9547_v26  ;;  %4799 = vmatprep.mubr.bf16.mxu1 %v9547_v26  ;;  %v9584_v8 = vpack.c.bf16 %v1031_v55, %v1023_v40  ;;  %v716_v11 = vpop.f32.mrb[13].mxu1 }
 0x182   : > { %v606_v52 = vadd.f32 %v605_v45, %v9415_v62  ;;  %v607_v56 = vpop.f32.mrb[15].mxu0  ;;  %4348 = vmatmul.mubr.bf16.gmra.mrb[72].mxu0 %v9540_v3  ;;  %4800 = vmatmul.mubr.bf16.gmra.mrb[72].mxu1 %v9540_v3  ;;  %v1037_v47 = vmax.f32 %v602_v35, 0.0  ;;  %v9590_v15 = vpack.c.bf16 %v1032_v61, %v1024_v49  ;;  %v717_v32 = vadd.f32 %v716_v11, %v9436_v31  ;;  %v718_v33 = vpop.f32.mrb[14].mxu1 }
 0x183   : > { %v608_v57 = vadd.f32 %v607_v56, %v9420_v21  ;;  %4417 = vmatpush1.bf16.msra.mxu0 %v7552_v5  ;;  %4869 = vmatpush1.bf16.msra.mxu1 %v7554_v7  ;;  %11157 = vst [vmem:[#allocation23_spill] sm:$0xff] %v9584_v8  ;;  %v1038_v9 = vmax.f32 %v604_v44, 0.0  ;;  %v7570_v5 = vcombine.low %v9563_v46, %v9565_v48  ;;  %v720_v42 = vpop.f32.mrb[15].mxu1  ;;  %v9615_v46 = vld [vmem:[#allocation6 + $0x608] sm:$0xff] }
 0x184   : > { %v1045_v63 = vmax.f32 %v606_v52, 0.0  ;;  %4418 = vmatprep.subr.bf16.mxu0 %v7561_v30  ;;  %4870 = vmatprep.subr.bf16.mxu1 %v7563_v36  ;;  %11158 = vst [vmem:[#allocation24_spill] sm:$0xff] %v9590_v15  ;;  %v715_v7 = vadd.f32 %v714_v16, %v9430_v29  ;;  %v7577_v30 = vcombine.high %v9580_v2, %v9582_v6  ;;  %v9617_v48 = vld [vmem:[#allocation6 + $0x628] sm:$0xff]  ;;  %v1040_v49 = vmax.f32 %v717_v32, 0.0 }
 0x185   : > { %v1046_v10 = vmax.f32 %v608_v57, 0.0  ;;  %v7579_v36 = vcombine.high %v9586_v59, %v9588_v0  ;;  %v719_v38 = vadd.f32 %v718_v33, %v9430_v29  ;;  %v721_v51 = vadd.f32 %v720_v42, %v9436_v31  ;;  %v9659_v42 = vld [vmem:[#allocation6 + $0x680] sm:$0xff] }
 0x186   : > { %v9592_v22 = vpack.c.bf16 %v1045_v63, %v1037_v47  ;;  %v1039_v40 = vmax.f32 %v715_v7, 0.0  ;;  %v7584_v11 = vcombine.low %v9607_v37, %v9609_v39 }
 0x187   : > { %v9599_v12 = vpack.c.bf16 %v1046_v10, %v1038_v9  ;;  %4419 = vmatpush1.bf16.msra.mxu0 %v7560_v54  ;;  %v611_v28 = vpop.f32.mrb[16].mxu0  ;;  %4871 = vmatpush1.bf16.msra.mxu1 %v7562_v58  ;;  %v7576_v54 = vcombine.low %v9580_v2, %v9582_v6  ;;  %v1047_v55 = vmax.f32 %v719_v38, 0.0  ;;  %v7578_v58 = vcombine.low %v9586_v59, %v9588_v0  ;;  %v9632_v2 = vld [vmem:[#allocation6 + $0x640] sm:$0xff]  ;;  %v9638_v59 = vld [vmem:[#allocation6 + $0x648] sm:$0xff] }
 0x188   : > { %11159 = vst [vmem:[#allocation25_spill] sm:$0xff] %v9592_v22  ;;  %v612_v35 = vadd.f32 %v611_v28, %v9415_v62  ;;  %v613_v53 = vpop.f32.mrb[17].mxu0  ;;  %4420 = vmatprep.subr.bf16.mxu0 %v7569_v60  ;;  %4872 = vmatprep.subr.bf16.mxu1 %v7571_v1  ;;  %v7585_v60 = vcombine.high %v9607_v37, %v9609_v39  ;;  %v1048_v61 = vmax.f32 %v721_v51, 0.0  ;;  %v9634_v6 = vld [vmem:[#allocation6 + $0x660] sm:$0xff]  ;;  %v9640_v0 = vld [vmem:[#allocation6 + $0x668] sm:$0xff] }
 0x189   : > { %11160 = vst [vmem:[#allocation26_spill] sm:$0xff] %v9599_v12  ;;  %v614_v44 = vadd.f32 %v613_v53, %v9420_v21  ;;  %v615_v45 = vpop.f32.mrb[18].mxu0  ;;  %4357 = vmatprep.mubr.bf16.mxu0 %v9599_v12  ;;  %4809 = vmatprep.mubr.bf16.mxu1 %v9599_v12  ;;  %v7587_v1 = vcombine.high %v9615_v46, %v9617_v48 }
 0x18a   : > { %v616_v52 = vadd.f32 %v615_v45, %v9415_v62  ;;  %v617_v56 = vpop.f32.mrb[19].mxu0  ;;  %4358 = vmatmul.mubr.bf16.gmra.mrb[76].mxu0 %v9592_v22  ;;  %4810 = vmatmul.mubr.bf16.gmra.mrb[76].mxu1 %v9592_v22  ;;  %v1053_v47 = vmax.f32 %v612_v35, 0.0  ;;  %v9636_v9 = vpack.c.bf16 %v1047_v55, %v1039_v40  ;;  %v7586_v28 = vcombine.low %v9615_v46, %v9617_v48 }
 0x18b   : > { %v618_v57 = vadd.f32 %v617_v56, %v9420_v21  ;;  %4421 = vmatpush1.bf16.msra.mxu0 %v7568_v25  ;;  %4873 = vmatpush1.bf16.msra.mxu1 %v7570_v5  ;;  %v1054_v10 = vmax.f32 %v614_v44, 0.0  ;;  %v9642_v25 = vpack.c.bf16 %v1048_v61, %v1040_v49  ;;  %v724_v5 = vpop.f32.mrb[16].mxu1  ;;  %v7593_v53 = vcombine.high %v9632_v2, %v9634_v6  ;;  %v9661_v44 = vld [vmem:[#allocation6 + $0x6a0] sm:$0xff]  ;;  %v9669_v56 = vld [vmem:[#allocation6 + $0x6a8] sm:$0xff] }
 0x18c   : > { %v1061_v63 = vmax.f32 %v616_v52, 0.0  ;;  %4422 = vmatprep.subr.bf16.mxu0 %v7577_v30  ;;  %4874 = vmatprep.subr.bf16.mxu1 %v7579_v36  ;;  %11161 = vst [vmem:[#allocation27_spill] sm:$0xff] %v9636_v9  ;;  %v725_v30 = vadd.f32 %v724_v5, %v9430_v29  ;;  %v726_v32 = vpop.f32.mrb[17].mxu1  ;;  %v7595_v39 = vcombine.high %v9638_v59, %v9640_v0  ;;  %v9667_v52 = vld [vmem:[#allocation6 + $0x688] sm:$0xff] }
 0x18d   : > { %v1062_v16 = vmax.f32 %v618_v57, 0.0  ;;  %11162 = vst [vmem:[#allocation28_spill] sm:$0xff] %v9642_v25  ;;  %v727_v36 = vadd.f32 %v726_v32, %v9436_v31  ;;  %v728_v40 = vpop.f32.mrb[18].mxu1 }
 0x18e   : > { %v9644_v7 = vpack.c.bf16 %v1061_v63, %v1053_v47  ;;  %v1055_v45 = vmax.f32 %v725_v30, 0.0  ;;  %v729_v46 = vadd.f32 %v728_v40, %v9430_v29  ;;  %v730_v48 = vpop.f32.mrb[19].mxu1  ;;  %v7594_v63 = vcombine.low %v9638_v59, %v9640_v0  ;;  %v9690_v59 = vld [vmem:[#allocation6 + $0x6c8] sm:$0xff] }
 0x18f   : > { %v9651_v33 = vpack.c.bf16 %v1062_v16, %v1054_v10  ;;  %4423 = vmatpush1.bf16.msra.mxu0 %v7576_v54  ;;  %v621_v35 = vpop.f32.mrb[20].mxu0  ;;  %4875 = vmatpush1.bf16.msra.mxu1 %v7578_v58  ;;  %v1056_v54 = vmax.f32 %v727_v36, 0.0  ;;  %v731_v55 = vadd.f32 %v730_v48, %v9436_v31  ;;  %v7603_v30 = vcombine.high %v9667_v52, %v9669_v56  ;;  %v9692_v0 = vld [vmem:[#allocation6 + $0x6e8] sm:$0xff] }
 0x190   : > { %11163 = vst [vmem:[#allocation29_spill] sm:$0xff] %v9644_v7  ;;  %v622_v38 = vadd.f32 %v621_v35, %v9415_v62  ;;  %v623_v37 = vpop.f32.mrb[21].mxu0  ;;  %4424 = vmatprep.subr.bf16.mxu0 %v7585_v60  ;;  %4876 = vmatprep.subr.bf16.mxu1 %v7587_v1  ;;  %v7592_v60 = vcombine.low %v9632_v2, %v9634_v6  ;;  %v1063_v61 = vmax.f32 %v729_v46, 0.0  ;;  %v9684_v2 = vld [vmem:[#allocation6 + $0x6c0] sm:$0xff]  ;;  %v734_v36 = vpop.f32.mrb[20].mxu1 }
 0x191   : > { %11164 = vst [vmem:[#allocation30_spill] sm:$0xff] %v9651_v33  ;;  %v624_v49 = vadd.f32 %v623_v37, %v9420_v21  ;;  %v625_v51 = vpop.f32.mrb[22].mxu0  ;;  %4367 = vmatprep.mubr.bf16.mxu0 %v9651_v33  ;;  %4819 = vmatprep.mubr.bf16.mxu1 %v9651_v33  ;;  %v7601_v1 = vcombine.high %v9659_v42, %v9661_v44  ;;  %v1064_v10 = vmax.f32 %v731_v55, 0.0  ;;  %v9686_v6 = vld [vmem:[#allocation6 + $0x6e0] sm:$0xff]  ;;  %v9715_v55 = vld [vmem:[#allocation6 + $0x708] sm:$0xff] }
 0x192   : > { %v626_v57 = vadd.f32 %v625_v51, %v9415_v62  ;;  %v627_v58 = vpop.f32.mrb[23].mxu0  ;;  %4368 = vmatmul.mubr.bf16.gmra.mrb[80].mxu0 %v9644_v7  ;;  %4820 = vmatmul.mubr.bf16.gmra.mrb[80].mxu1 %v9644_v7  ;;  %v1069_v16 = vmax.f32 %v622_v38, 0.0  ;;  %v7600_v40 = vcombine.low %v9659_v42, %v9661_v44  ;;  %v7602_v38 = vcombine.low %v9667_v52, %v9669_v56  ;;  %v9709_v51 = vld [vmem:[#allocation6 + $0x720] sm:$0xff] }
 0x193   : > { %v628_v47 = vadd.f32 %v627_v58, %v9420_v21  ;;  %4425 = vmatpush1.bf16.msra.mxu0 %v7584_v11  ;;  %4877 = vmatpush1.bf16.msra.mxu1 %v7586_v28  ;;  %v9688_v11 = vpack.c.bf16 %v1063_v61, %v1055_v45  ;;  %v1070_v28 = vmax.f32 %v624_v49, 0.0  ;;  %v9694_v35 = vpack.c.bf16 %v1064_v10, %v1056_v54  ;;  %v9707_v49 = vld [vmem:[#allocation6 + $0x700] sm:$0xff] }
 0x194   : > { %v1077_v5 = vmax.f32 %v626_v57, 0.0  ;;  %4426 = vmatprep.subr.bf16.mxu0 %v7593_v53  ;;  %4878 = vmatprep.subr.bf16.mxu1 %v7595_v39  ;;  %v735_v37 = vadd.f32 %v734_v36, %v9430_v29  ;;  %v736_v39 = vpop.f32.mrb[21].mxu1  ;;  %v7609_v48 = vcombine.high %v9684_v2, %v9686_v6  ;;  %v7611_v54 = vcombine.high %v9690_v59, %v9692_v0  ;;  %v9717_v57 = vld [vmem:[#allocation6 + $0x728] sm:$0xff]  ;;  %v9733_v36 = vld [vmem:[#allocation6 + $0x740] sm:$0xff] }
 0x195   : > { %11165 = vst [vmem:[#allocation31_spill] sm:$0xff] %v9688_v11  ;;  %v1078_v32 = vmax.f32 %v628_v47, 0.0  ;;  %11166 = vst [vmem:[#allocation32_spill] sm:$0xff] %v9694_v35  ;;  %v737_v42 = vadd.f32 %v736_v39, %v9436_v31  ;;  %v738_v44 = vpop.f32.mrb[22].mxu1  ;;  %v7616_v39 = vcombine.low %v9707_v49, %v9709_v51 }
 0x196   : > { %v9696_v53 = vpack.c.bf16 %v1077_v5, %v1069_v16  ;;  %v1071_v58 = vmax.f32 %v735_v37, 0.0  ;;  %v740_v61 = vpop.f32.mrb[23].mxu1  ;;  %v9735_v37 = vld [vmem:[#allocation6 + $0x760] sm:$0xff] }
 0x197   : > { %v9703_v45 = vpack.c.bf16 %v1078_v32, %v1070_v28  ;;  %4427 = vmatpush1.bf16.msra.mxu0 %v7592_v60  ;;  %v631_v46 = vpop.f32.mrb[24].mxu0  ;;  %4879 = vmatpush1.bf16.msra.mxu1 %v7594_v63  ;;  %v739_v60 = vadd.f32 %v738_v44, %v9430_v29  ;;  %v1072_v10 = vmax.f32 %v737_v42, 0.0  ;;  %v741_v16 = vadd.f32 %v740_v61, %v9436_v31  ;;  %v9742_v42 = vld [vmem:[#allocation6 + $0x748] sm:$0xff] }
 0x198   : > { %11167 = vst [vmem:[#allocation33_spill] sm:$0xff] %v9696_v53  ;;  %v632_v52 = vadd.f32 %v631_v46, %v9415_v62  ;;  %v633_v56 = vpop.f32.mrb[25].mxu0  ;;  %4428 = vmatprep.subr.bf16.mxu0 %v7601_v1  ;;  %4880 = vmatprep.subr.bf16.mxu1 %v7603_v30  ;;  %v7608_v1 = vcombine.low %v9684_v2, %v9686_v6 }
 0x199   : > { %11168 = vst [vmem:[#allocation34_spill] sm:$0xff] %v9703_v45  ;;  %v634_v47 = vadd.f32 %v633_v56, %v9420_v21  ;;  %v635_v63 = vpop.f32.mrb[26].mxu0  ;;  %4377 = vmatprep.mubr.bf16.mxu0 %v9703_v45  ;;  %4829 = vmatprep.mubr.bf16.mxu1 %v9703_v45  ;;  %v7610_v28 = vcombine.low %v9690_v59, %v9692_v0  ;;  %v1079_v2 = vmax.f32 %v739_v60, 0.0  ;;  %v9744_v59 = vld [vmem:[#allocation6 + $0x768] sm:$0xff]  ;;  %v1080_v0 = vmax.f32 %v741_v16, 0.0  ;;  %v9767_v16 = vld [vmem:[#allocation6 + $0x7a0] sm:$0xff] }
 0x19a   : > { %v636_v5 = vadd.f32 %v635_v63, %v9415_v62  ;;  %v637_v30 = vpop.f32.mrb[27].mxu0  ;;  %4378 = vmatmul.mubr.bf16.gmra.mrb[84].mxu0 %v9696_v53  ;;  %4830 = vmatmul.mubr.bf16.gmra.mrb[84].mxu1 %v9696_v53  ;;  %v7617_v32 = vcombine.high %v9707_v49, %v9709_v51  ;;  %v7618_v46 = vcombine.low %v9715_v55, %v9717_v57  ;;  %v1085_v44 = vmax.f32 %v632_v52, 0.0  ;;  %v744_v63 = vpop.f32.mrb[24].mxu1 }
 0x19b   : > { %v638_v6 = vadd.f32 %v637_v30, %v9420_v21  ;;  %4429 = vmatpush1.bf16.msra.mxu0 %v7600_v40  ;;  %4881 = vmatpush1.bf16.msra.mxu1 %v7602_v38  ;;  %v7619_v60 = vcombine.high %v9715_v55, %v9717_v57  ;;  %v9748_v40 = vpack.c.bf16 %v1079_v2, %v1071_v58  ;;  %v1086_v38 = vmax.f32 %v634_v47, 0.0  ;;  %v746_v55 = vpop.f32.mrb[25].mxu1 }
 0x19c   : > { %v1093_v56 = vmax.f32 %v636_v5, 0.0  ;;  %4430 = vmatprep.subr.bf16.mxu0 %v7609_v48  ;;  %4882 = vmatprep.subr.bf16.mxu1 %v7611_v54  ;;  %v7625_v49 = vcombine.high %v9733_v36, %v9735_v37  ;;  %v9752_v51 = vpack.c.bf16 %v1080_v0, %v1072_v10  ;;  %v7624_v52 = vcombine.low %v9733_v36, %v9735_v37  ;;  %v9765_v10 = vld [vmem:[#allocation6 + $0x780] sm:$0xff]  ;;  %v748_v2 = vpop.f32.mrb[26].mxu1 }
 0x19d   : > { %11169 = vst [vmem:[#allocation35_spill] sm:$0xff] %v9748_v40  ;;  %v1094_v61 = vmax.f32 %v638_v6, 0.0  ;;  %v745_v54 = vadd.f32 %v744_v63, %v9430_v29  ;;  %v7627_v47 = vcombine.high %v9742_v42, %v9744_v59  ;;  %v747_v5 = vadd.f32 %v746_v55, %v9436_v31  ;;  %v9836_v36 = vld [vmem:[#allocation6 + $0x800] sm:$0xff] }
 0x19e   : > { %11170 = vst [vmem:[#allocation36_spill] sm:$0xff] %v9752_v51  ;;  %v9754_v30 = vpack.c.bf16 %v1093_v56, %v1085_v44  ;;  %v9771_v44 = vld [vmem:[#allocation6 + $0x788] sm:$0xff]  ;;  %v749_v56 = vadd.f32 %v748_v2, %v9430_v29 }
 0x19f   : > { %v9761_v57 = vpack.c.bf16 %v1094_v61, %v1086_v38  ;;  %4431 = vmatpush1.bf16.msra.mxu0 %v7608_v1  ;;  %v641_v58 = vpop.f32.mrb[28].mxu0  ;;  %4883 = vmatpush1.bf16.msra.mxu1 %v7610_v28  ;;  %v9773_v1 = vld [vmem:[#allocation6 + $0x7a8] sm:$0xff]  ;;  %v1087_v28 = vmax.f32 %v745_v54, 0.0  ;;  %v750_v38 = vpop.f32.mrb[27].mxu1  ;;  %v11079_v61 = vsub.s32 4, %v9406_v17  ;;  %v1088_v55 = vmax.f32 %v747_v5, 0.0 }
 0x1a0   : > { %11171 = vst [vmem:[#allocation37_spill] sm:$0xff] %v9754_v30  ;;  %v642_v6 = vadd.f32 %v641_v58, %v9415_v62  ;;  %v643_v0 = vpop.f32.mrb[29].mxu0  ;;  %4432 = vmatprep.subr.bf16.mxu0 %v7617_v32  ;;  %4884 = vmatprep.subr.bf16.mxu1 %v7619_v60  ;;  %v751_v32 = vadd.f32 %v750_v38, %v9436_v31  ;;  %v11076_v60 = vsub.s32 5, %v9406_v17  ;;  %v1095_v20 = vmax.f32 %v749_v56, 0.0 }
 0x1a1   : > { %11172 = vst [vmem:[#allocation38_spill] sm:$0xff] %v9761_v57  ;;  %v644_v63 = vadd.f32 %v643_v0, %v9420_v21  ;;  %v645_v23 = vpop.f32.mrb[30].mxu0  ;;  %4387 = vmatprep.mubr.bf16.mxu0 %v9761_v57  ;;  %4839 = vmatprep.mubr.bf16.mxu1 %v9761_v57  ;;  %v7633_v0 = vcombine.high %v9765_v10, %v9767_v16 }
 0x1a2   : > { %v646_v58 = vadd.f32 %v645_v23, %v9415_v62  ;;  %v647_v54 = vpop.f32.mrb[31].mxu0  ;;  %4388 = vmatmul.mubr.bf16.gmra.mrb[88].mxu0 %v9754_v30  ;;  %4840 = vmatmul.mubr.bf16.gmra.mrb[88].mxu1 %v9754_v30  ;;  %v7634_v38 = vcombine.low %v9771_v44, %v9773_v1  ;;  %v7635_v62 = vcombine.high %v9771_v44, %v9773_v1  ;;  %v9794_v23 = vld [vmem:[#allocation6 + $0x7c0] sm:$0xff]  ;;  %v1096_v18 = vmax.f32 %v751_v32, 0.0  ;;  %v9807_v44 = vld [vmem:[#allocation6 + $0x7e8] sm:$0xff]  ;;  %v754_v32 = vpop.f32.mrb[28].mxu1 }
 0x1a3   : > { %v648_v5 = vadd.f32 %v647_v54, %v9420_v21  ;;  %4433 = vmatpush1.bf16.msra.mxu0 %v7616_v39  ;;  %4885 = vmatpush1.bf16.msra.mxu1 %v7618_v46  ;;  %v1101_v2 = vmax.f32 %v642_v6, 0.0  ;;  %v9798_v56 = vpack.c.bf16 %v1095_v20, %v1087_v28  ;;  %v9803_v21 = vrot.slane %v9409_v19, %v11079_v61  ;;  %v9805_v54 = vld [vmem:[#allocation6 + $0x7c8] sm:$0xff]  ;;  %v756_v28 = vpop.f32.mrb[29].mxu1 }
 0x1a4   : > { %v1109_v48 = vmax.f32 %v646_v58, 0.0  ;;  %4434 = vmatprep.subr.bf16.mxu0 %v7625_v49  ;;  %4886 = vmatprep.subr.bf16.mxu1 %v7627_v47  ;;  %v1102_v39 = vmax.f32 %v644_v63, 0.0  ;;  %v9809_v1 = vpack.c.bf16 %v1096_v18, %v1088_v55  ;;  %v9814_v49 = vrot.slane %v9409_v19, %v11076_v60 }
 0x1a5   : > { %11173 = vst [vmem:[#allocation39_spill] sm:$0xff] %v9798_v56  ;;  %v1110_v46 = vmax.f32 %v648_v5, 0.0  ;;  %v7640_v47 = vcombine.low %v9794_v23, %v9796_v50  ;;  %v755_v6 = vadd.f32 %v754_v32, %v9430_v29  ;;  %v11078_v63 = vsub.s32 6, %v9406_v17 }
 0x1a6   : > { %11174 = vst [vmem:[#allocation40_spill] sm:$0xff] %v9809_v1  ;;  %v9816_v20 = vpack.c.bf16 %v1109_v48, %v1101_v2  ;;  %v11177_v18 = vcombine.low %v9742_v42, %v9744_v59  ;;  %v7641_v48 = vcombine.high %v9794_v23, %v9796_v50  ;;  %v757_v55 = vadd.f32 %v756_v28, %v9436_v31  ;;  %v758_v2 = vpop.f32.mrb[30].mxu1  ;;  %v9846_v23 = vld [vmem:[#allocation6 + $0x808] sm:$0xff] }
 0x1a7   : > { %v9822_v58 = vpack.c.bf16 %v1110_v46, %v1102_v39  ;;  %4435 = vmatpush1.bf16.msra.mxu0 %v7624_v52  ;;  %v797_v5 = vpop.f32.mrb[32].mxu0  ;;  %v11077_v32 = vsub.s32 7, %v9406_v17  ;;  %v7642_v39 = vcombine.low %v9805_v54, %v9807_v44  ;;  %v1103_v37 = vmax.f32 %v755_v6, 0.0  ;;  %v760_v59 = vpop.f32.mrb[31].mxu1  ;;  %v9848_v46 = vld [vmem:[#allocation6 + $0x828] sm:$0xff] }
 0x1a8   : > { %11175 = vst [vmem:[#allocation41_spill] sm:$0xff] %v9816_v20  ;;  %4887 = vmatpush1.bf16.msra.mxu1 %v11177_v18  ;;  %4436 = vmatprep.subr.bf16.mxu0 %v7633_v0  ;;  %v759_v42 = vadd.f32 %v758_v2, %v9430_v29  ;;  %v798_v52 = vadd.f32 %v797_v5, %v9803_v21  ;;  %v799_v50 = vpop.f32.mrb[33].mxu0  ;;  %v1104_v6 = vmax.f32 %v757_v55, 0.0 }
 0x1a9   : > { %11176 = vst [vmem:[#allocation42_spill] sm:$0xff] %v9822_v58  ;;  %4888 = vmatprep.subr.bf16.mxu1 %v7635_v62  ;;  %4397 = vmatprep.mubr.bf16.mxu0 %v9822_v58  ;;  %v7643_v0 = vcombine.high %v9805_v54, %v9807_v44  ;;  %v9844_v62 = vld [vmem:[#allocation6 + $0x820] sm:$0xff]  ;;  %v761_v29 = vadd.f32 %v760_v59, %v9436_v31  ;;  %v801_v18 = vpop.f32.mrb[34].mxu0 }
 0x1aa   : > { %4849 = vmatprep.mubr.bf16.mxu1 %v9822_v58  ;;  %v800_v28 = vadd.f32 %v799_v50, %v9814_v49  ;;  %4398 = vmatmul.mubr.bf16.gmra.mrb[92].mxu0 %v9816_v20  ;;  %v1111_v2 = vmax.f32 %v759_v42, 0.0  ;;  %v993_v5 = vmax.f32 %v798_v52, 0.0  ;;  %v802_v54 = vadd.f32 %v801_v18, %v9803_v21  ;;  %v803_v44 = vpop.f32.mrb[35].mxu0  ;;  %v910_v18 = vpop.f32.mrb[32].mxu1 }
 0x1ab   : > { %4850 = vmatmul.mubr.bf16.gmra.mrb[92].mxu1 %v9816_v20  ;;  %v9858_v60 = vrot.slane %v9409_v19, %v11078_v63  ;;  %v11178_v31 = vcombine.low %v9765_v10, %v9767_v16  ;;  %v1112_v55 = vmax.f32 %v761_v29, 0.0  ;;  %v804_v50 = vadd.f32 %v803_v44, %v9814_v49  ;;  %4440 = vmatprep.mubr.bf16.mxu0 %v9486_v13  ;;  %v9877_v29 = vld [vmem:[#allocation6 + $0x840] sm:$0xff] }
 0x1ac   : > { %4889 = vmatpush1.bf16.msra.mxu1 %v7634_v38  ;;  %v994_v59 = vmax.f32 %v800_v28, 0.0  ;;  %v9867_v42 = vrot.slane %v9409_v19, %v11077_v32  ;;  %v7649_v52 = vcombine.high %v9836_v36, %v9844_v62  ;;  %v7651_v10 = vcombine.high %v9846_v23, %v9848_v46  ;;  %4892 = vmatprep.mubr.bf16.mxu1 %v9486_v13  ;;  %v9879_v28 = vld [vmem:[#allocation6 + $0x860] sm:$0xff]  ;;  %v1450_v32 = vld [vmem:[#allocation6 + $0x868] sm:$0xff] }
 0x1ad   : > { %4437 = vmatpush1.bf16.msra.mxu0 %v11178_v31  ;;  %v9874_v16 = vpack.c.bf16 %v1111_v2, %v1103_v37  ;;  %v1001_v38 = vmax.f32 %v802_v54, 0.0  ;;  %4890 = vmatprep.subr.bf16.mxu1 %v7643_v0  ;;  %v9881_v19 = vpack.c.bf16 %v1112_v55, %v1104_v6  ;;  %v7648_v44 = vcombine.low %v9836_v36, %v9844_v62  ;;  %v1446_v31 = vld [vmem:[#allocation6 + $0x848] sm:$0xff]  ;;  %v912_v0 = vpop.f32.mrb[33].mxu1  ;;  %v9895_v62 = vld [vmem:[#allocation6 + $0x880] sm:$0xff] }
 0x1ae   : > { %4438 = vmatprep.subr.bf16.mxu0 %v7641_v48  ;;  %v1002_v48 = vmax.f32 %v804_v50, 0.0  ;;  %v911_v37 = vadd.f32 %v910_v18, %v9858_v60  ;;  %v7650_v2 = vcombine.low %v9846_v23, %v9848_v46  ;;  %v913_v55 = vadd.f32 %v912_v0, %v9867_v42  ;;  %v914_v50 = vpop.f32.mrb[34].mxu1  ;;  %v9903_v18 = vld [vmem:[#allocation6 + $0x8a8] sm:$0xff] }
 0x1af   : > { %v9885_v63 = vpack.c.bf16 %v1001_v38, %v993_v5  ;;  %v807_v6 = vpop.f32.mrb[36].mxu0  ;;  %v7657_v36 = vcombine.high %v9877_v29, %v9879_v28  ;;  %v915_v38 = vadd.f32 %v914_v50, %v9858_v60  ;;  %v916_v23 = vpop.f32.mrb[35].mxu1  ;;  %v7659_v46 = vcombine.high %v1446_v31, %v1450_v32 }
 0x1b0   : > { %4891 = vmatpush1.bf16.msra.mxu1 %v7642_v39  ;;  %v9890_v54 = vpack.c.bf16 %v1002_v48, %v994_v59  ;;  %v808_v5 = vadd.f32 %v807_v6, %v9803_v21  ;;  %v995_v39 = vmax.f32 %v911_v37, 0.0  ;;  %v9899_v59 = vld [vmem:[#allocation6 + $0x8a0] sm:$0xff]  ;;  %v9901_v48 = vld [vmem:[#allocation6 + $0x888] sm:$0xff]  ;;  %v996_v0 = vmax.f32 %v913_v55, 0.0 }
 0x1b1   : > { %4439 = vmatpush1.bf16.msra.mxu0 %v7640_v47  ;;  %4973 = vmatprep.subr.bf16.mxu1 %v7651_v10  ;;  %v809_v47 = vpop.f32.mrb[37].mxu0  ;;  %v917_v61 = vadd.f32 %v916_v23, %v9867_v42  ;;  %v7656_v37 = vcombine.low %v9877_v29, %v9879_v28  ;;  %v1003_v13 = vmax.f32 %v915_v38, 0.0  ;;  %v7658_v20 = vcombine.low %v1446_v31, %v1450_v32  ;;  %v9921_v32 = vld [vmem:[#allocation6 + $0x8c0] sm:$0xff]  ;;  %v920_v31 = vpop.f32.mrb[36].mxu1  ;;  %v1466_v38 = vld [vmem:[#allocation6 + $0x8e8] sm:$0xff] }
 0x1b2   : > { %4521 = vmatprep.subr.bf16.mxu0 %v7649_v52  ;;  %v810_v52 = vadd.f32 %v809_v47, %v9814_v49  ;;  %v811_v10 = vpop.f32.mrb[38].mxu0  ;;  %v1009_v6 = vmax.f32 %v808_v5, 0.0  ;;  %v7665_v23 = vcombine.high %v9895_v62, %v9899_v59  ;;  %v7667_v29 = vcombine.high %v9901_v48, %v9903_v18 }
 0x1b3   : > { %4893 = vmatmul.mubr.bf16.vlgmr.msra.gmra.mrb[64].mxu1 %v9480_v4  ;;  %v812_v50 = vadd.f32 %v811_v10, %v9803_v21  ;;  %v813_v17 = vpop.f32.mrb[39].mxu0  ;;  %v1004_v58 = vmax.f32 %v917_v61, 0.0  ;;  %v9918_v5 = vpack.c.bf16 %v1003_v13, %v995_v39  ;;  %v921_v13 = vadd.f32 %v920_v31, %v9858_v60  ;;  %v922_v39 = vpop.f32.mrb[37].mxu1 }
 0x1b4   : > { %4441 = vmatmul.mubr.bf16.vlgmr.msra.gmra.mrb[64].mxu0 %v9480_v4  ;;  %4974 = vmatpush1.bf16.msra.mxu1 %v7650_v2  ;;  %v1010_v47 = vmax.f32 %v810_v52, 0.0  ;;  %v814_v55 = vadd.f32 %v813_v17, %v9814_v49  ;;  %v7664_v2 = vcombine.low %v9895_v62, %v9899_v59  ;;  %v9939_v59 = vld [vmem:[#allocation6 + $0x900] sm:$0xff] }
 0x1b5   : > { %4522 = vmatpush1.bf16.msra.mxu0 %v7648_v44  ;;  %4450 = vmatprep.mubr.bf16.mxu0 %v9538_v24  ;;  %v1017_v28 = vmax.f32 %v812_v50, 0.0  ;;  %v9923_v44 = vld [vmem:[#allocation6 + $0x8e0] sm:$0xff]  ;;  %v9925_v61 = vpack.c.bf16 %v1004_v58, %v996_v0  ;;  %v923_v0 = vadd.f32 %v922_v39, %v9867_v42  ;;  %v924_v50 = vpop.f32.mrb[38].mxu1 }
 0x1b6   : > { %4523 = vmatprep.subr.bf16.mxu0 %v7657_v36  ;;  %4902 = vmatprep.mubr.bf16.mxu1 %v9538_v24  ;;  %v1018_v17 = vmax.f32 %v814_v55, 0.0  ;;  %v1462_v36 = vld [vmem:[#allocation6 + $0x8c8] sm:$0xff]  ;;  %v7673_v62 = vcombine.high %v9921_v32, %v9923_v44  ;;  %v925_v55 = vadd.f32 %v924_v50, %v9858_v60 }
 0x1b7   : > { %4975 = vmatprep.subr.bf16.mxu1 %v7659_v46  ;;  %v9929_v52 = vpack.c.bf16 %v1017_v28, %v1009_v6  ;;  %v7666_v46 = vcombine.low %v9901_v48, %v9903_v18  ;;  %v817_v58 = vpop.f32.mrb[40].mxu0  ;;  %v926_v48 = vpop.f32.mrb[39].mxu1  ;;  %v7675_v18 = vcombine.high %v1462_v36, %v1466_v38  ;;  %v9945_v28 = vld [vmem:[#allocation6 + $0x908] sm:$0xff]  ;;  %v1012_v31 = vmax.f32 %v923_v0, 0.0 }
 0x1b8   : > { %4976 = vmatpush1.bf16.msra.mxu1 %v7658_v20  ;;  %v9934_v10 = vpack.c.bf16 %v1018_v17, %v1010_v47  ;;  %v818_v6 = vadd.f32 %v817_v58, %v9803_v21  ;;  %v1011_v20 = vmax.f32 %v921_v13, 0.0  ;;  %v9943_v47 = vld [vmem:[#allocation6 + $0x920] sm:$0xff]  ;;  %v9947_v17 = vld [vmem:[#allocation6 + $0x928] sm:$0xff]  ;;  %v927_v39 = vadd.f32 %v926_v48, %v9867_v42 }
 0x1b9   : > { %4524 = vmatpush1.bf16.msra.mxu0 %v7656_v37  ;;  %4977 = vmatprep.subr.bf16.mxu1 %v7667_v29  ;;  %v819_v37 = vpop.f32.mrb[41].mxu0  ;;  %v7672_v13 = vcombine.low %v9921_v32, %v9923_v44  ;;  %v1019_v4 = vmax.f32 %v925_v55, 0.0  ;;  %v7674_v30 = vcombine.low %v1462_v36, %v1466_v38  ;;  %v7681_v48 = vcombine.high %v9939_v59, %v9943_v47  ;;  %v9967_v36 = vld [vmem:[#allocation6 + $0x960] sm:$0xff]  ;;  %v1478_v55 = vld [vmem:[#allocation6 + $0x948] sm:$0xff] }
 0x1ba   : > { %4525 = vmatprep.subr.bf16.mxu0 %v7665_v23  ;;  %v820_v23 = vadd.f32 %v819_v37, %v9814_v49  ;;  %v821_v29 = vpop.f32.mrb[42].mxu0  ;;  %v1025_v58 = vmax.f32 %v818_v6, 0.0  ;;  %v1020_v57 = vmax.f32 %v927_v39, 0.0  ;;  %v7683_v32 = vcombine.high %v9945_v28, %v9947_v17 }
 0x1bb   : > { %4903 = vmatmul.mubr.bf16.gmra.mrb[68].mxu1 %v9532_v14  ;;  %v822_v50 = vadd.f32 %v821_v29, %v9803_v21  ;;  %v823_v24 = vpop.f32.mrb[43].mxu0  ;;  %v9962_v6 = vpack.c.bf16 %v1019_v4, %v1011_v20 }
 0x1bc   : > { %4451 = vmatmul.mubr.bf16.gmra.mrb[68].mxu0 %v9532_v14  ;;  %4978 = vmatpush1.bf16.msra.mxu1 %v7666_v46  ;;  %v1026_v37 = vmax.f32 %v820_v23, 0.0  ;;  %v824_v0 = vadd.f32 %v823_v24, %v9814_v49  ;;  %v9969_v38 = vpack.c.bf16 %v1020_v57, %v1012_v31  ;;  %v930_v46 = vpop.f32.mrb[40].mxu1  ;;  %v1482_v23 = vld [vmem:[#allocation6 + $0x968] sm:$0xff] }
 0x1bd   : > { %4526 = vmatpush1.bf16.msra.mxu0 %v7664_v2  ;;  %4460 = vmatprep.mubr.bf16.mxu0 %v9590_v15  ;;  %v1033_v44 = vmax.f32 %v822_v50, 0.0  ;;  %v9965_v2 = vld [vmem:[#allocation6 + $0x940] sm:$0xff]  ;;  %v931_v4 = vadd.f32 %v930_v46, %v9858_v60  ;;  %v932_v20 = vpop.f32.mrb[41].mxu1  ;;  %v7690_v53 = vcombine.low %v1478_v55, %v1482_v23 }
 0x1be   : > { %4527 = vmatprep.subr.bf16.mxu0 %v7673_v62  ;;  %4912 = vmatprep.mubr.bf16.mxu1 %v9590_v15  ;;  %v1034_v24 = vmax.f32 %v824_v0, 0.0  ;;  %v7680_v62 = vcombine.low %v9939_v59, %v9943_v47  ;;  %v933_v31 = vadd.f32 %v932_v20, %v9867_v42  ;;  %v934_v50 = vpop.f32.mrb[42].mxu1  ;;  %v7689_v59 = vcombine.high %v9965_v2, %v9967_v36  ;;  %v9983_v47 = vld [vmem:[#allocation6 + $0x980] sm:$0xff] }
 0x1bf   : > { %4979 = vmatprep.subr.bf16.mxu1 %v7675_v18  ;;  %v9973_v29 = vpack.c.bf16 %v1033_v44, %v1025_v58  ;;  %v7682_v18 = vcombine.low %v9945_v28, %v9947_v17  ;;  %v827_v57 = vpop.f32.mrb[44].mxu0  ;;  %v935_v0 = vadd.f32 %v934_v50, %v9858_v60  ;;  %v936_v28 = vpop.f32.mrb[43].mxu1  ;;  %v7691_v17 = vcombine.high %v1478_v55, %v1482_v23  ;;  %v9989_v44 = vld [vmem:[#allocation6 + $0x988] sm:$0xff]  ;;  %v10011_v55 = vld [vmem:[#allocation6 + $0x9e0] sm:$0xff] }
 0x1c0   : > { %4980 = vmatpush1.bf16.msra.mxu1 %v7674_v30  ;;  %v9978_v39 = vpack.c.bf16 %v1034_v24, %v1026_v37  ;;  %v828_v58 = vadd.f32 %v827_v57, %v9803_v21  ;;  %v1027_v30 = vmax.f32 %v931_v4, 0.0  ;;  %v9987_v37 = vld [vmem:[#allocation6 + $0x9a0] sm:$0xff]  ;;  %v9991_v24 = vld [vmem:[#allocation6 + $0x9a8] sm:$0xff]  ;;  %v1028_v46 = vmax.f32 %v933_v31, 0.0 }
 0x1c1   : > { %4528 = vmatpush1.bf16.msra.mxu0 %v7672_v13  ;;  %4981 = vmatprep.subr.bf16.mxu1 %v7683_v32  ;;  %v829_v13 = vpop.f32.mrb[45].mxu0  ;;  %v937_v20 = vadd.f32 %v936_v28, %v9867_v42  ;;  %v7688_v4 = vcombine.low %v9965_v2, %v9967_v36  ;;  %v1035_v14 = vmax.f32 %v935_v0, 0.0  ;;  %v7697_v28 = vcombine.high %v9983_v47, %v9987_v37  ;;  %v1494_v0 = vld [vmem:[#allocation6 + $0x9c8] sm:$0xff] }
 0x1c2   : > { %4529 = vmatprep.subr.bf16.mxu0 %v7681_v48  ;;  %v830_v48 = vadd.f32 %v829_v13, %v9814_v49  ;;  %v831_v32 = vpop.f32.mrb[46].mxu0  ;;  %v1041_v57 = vmax.f32 %v828_v58, 0.0  ;;  %v7699_v2 = vcombine.high %v9989_v44, %v9991_v24 }
 0x1c3   : > { %4913 = vmatmul.mubr.bf16.gmra.mrb[72].mxu1 %v9584_v8  ;;  %v832_v50 = vadd.f32 %v831_v32, %v9803_v21  ;;  %v833_v15 = vpop.f32.mrb[47].mxu0  ;;  %v1036_v45 = vmax.f32 %v937_v20, 0.0  ;;  %v10006_v58 = vpack.c.bf16 %v1035_v14, %v1027_v30 }
 0x1c4   : > { %4461 = vmatmul.mubr.bf16.gmra.mrb[72].mxu0 %v9584_v8  ;;  %4982 = vmatpush1.bf16.msra.mxu1 %v7682_v18  ;;  %v1042_v13 = vmax.f32 %v830_v48, 0.0  ;;  %v834_v31 = vadd.f32 %v833_v15, %v9814_v49  ;;  %v940_v18 = vpop.f32.mrb[44].mxu1  ;;  %v1498_v48 = vld [vmem:[#allocation6 + $0x9e8] sm:$0xff] }
 0x1c5   : > { %4530 = vmatpush1.bf16.msra.mxu0 %v7680_v62  ;;  %4470 = vmatprep.mubr.bf16.mxu0 %v9642_v25  ;;  %v1049_v36 = vmax.f32 %v832_v50, 0.0  ;;  %v10009_v62 = vld [vmem:[#allocation6 + $0x9c0] sm:$0xff]  ;;  %v10013_v23 = vpack.c.bf16 %v1036_v45, %v1028_v46  ;;  %v941_v14 = vadd.f32 %v940_v18, %v9858_v60  ;;  %v942_v30 = vpop.f32.mrb[45].mxu1  ;;  %v7706_v7 = vcombine.low %v1494_v0, %v1498_v48 }
 0x1c6   : > { %4531 = vmatprep.subr.bf16.mxu0 %v7689_v59  ;;  %4922 = vmatprep.mubr.bf16.mxu1 %v9642_v25  ;;  %v1050_v15 = vmax.f32 %v834_v31, 0.0  ;;  %v7696_v59 = vcombine.low %v9983_v47, %v9987_v37  ;;  %v943_v46 = vadd.f32 %v942_v30, %v9867_v42  ;;  %v944_v50 = vpop.f32.mrb[46].mxu1  ;;  %v7705_v47 = vcombine.high %v10009_v62, %v10011_v55  ;;  %v10027_v37 = vld [vmem:[#allocation6 + $0xa00] sm:$0xff] }
 0x1c7   : > { %4983 = vmatprep.subr.bf16.mxu1 %v7691_v17  ;;  %v10017_v32 = vpack.c.bf16 %v1049_v36, %v1041_v57  ;;  %v7698_v17 = vcombine.low %v9989_v44, %v9991_v24  ;;  %v837_v45 = vpop.f32.mrb[48].mxu0  ;;  %v945_v31 = vadd.f32 %v944_v50, %v9858_v60  ;;  %v946_v44 = vpop.f32.mrb[47].mxu1  ;;  %v7707_v24 = vcombine.high %v1494_v0, %v1498_v48  ;;  %v10033_v36 = vld [vmem:[#allocation6 + $0xa08] sm:$0xff]  ;;  %v10055_v0 = vld [vmem:[#allocation6 + $0xa60] sm:$0xff] }
 0x1c8   : > { %4984 = vmatpush1.bf16.msra.mxu1 %v7690_v53  ;;  %v10022_v20 = vpack.c.bf16 %v1050_v15, %v1042_v13  ;;  %v838_v57 = vadd.f32 %v837_v45, %v9803_v21  ;;  %v1043_v53 = vmax.f32 %v941_v14, 0.0  ;;  %v10031_v13 = vld [vmem:[#allocation6 + $0xa20] sm:$0xff]  ;;  %v10035_v15 = vld [vmem:[#allocation6 + $0xa28] sm:$0xff]  ;;  %v1044_v18 = vmax.f32 %v943_v46, 0.0 }
 0x1c9   : > { %4532 = vmatpush1.bf16.msra.mxu0 %v7688_v4  ;;  %4985 = vmatprep.subr.bf16.mxu1 %v7699_v2  ;;  %v839_v4 = vpop.f32.mrb[49].mxu0  ;;  %v947_v30 = vadd.f32 %v946_v44, %v9867_v42  ;;  %v7704_v14 = vcombine.low %v10009_v62, %v10011_v55  ;;  %v1051_v8 = vmax.f32 %v945_v31, 0.0  ;;  %v7713_v44 = vcombine.high %v10027_v37, %v10031_v13  ;;  %v1510_v31 = vld [vmem:[#allocation6 + $0xa48] sm:$0xff] }
 0x1ca   : > { %4533 = vmatprep.subr.bf16.mxu0 %v7697_v28  ;;  %v840_v28 = vadd.f32 %v839_v4, %v9814_v49  ;;  %v841_v2 = vpop.f32.mrb[50].mxu0  ;;  %v1057_v45 = vmax.f32 %v838_v57, 0.0  ;;  %v7715_v62 = vcombine.high %v10033_v36, %v10035_v15 }
 0x1cb   : > { %4923 = vmatmul.mubr.bf16.gmra.mrb[76].mxu1 %v9636_v9  ;;  %v842_v50 = vadd.f32 %v841_v2, %v9803_v21  ;;  %v843_v25 = vpop.f32.mrb[51].mxu0  ;;  %v1052_v33 = vmax.f32 %v947_v30, 0.0  ;;  %v10050_v57 = vpack.c.bf16 %v1051_v8, %v1043_v53 }
 0x1cc   : > { %4471 = vmatmul.mubr.bf16.gmra.mrb[76].mxu0 %v9636_v9  ;;  %4986 = vmatpush1.bf16.msra.mxu1 %v7698_v17  ;;  %v1058_v4 = vmax.f32 %v840_v28, 0.0  ;;  %v844_v46 = vadd.f32 %v843_v25, %v9814_v49  ;;  %v950_v17 = vpop.f32.mrb[48].mxu1  ;;  %v1514_v28 = vld [vmem:[#allocation6 + $0xa68] sm:$0xff] }
 0x1cd   : > { %4534 = vmatpush1.bf16.msra.mxu0 %v7696_v59  ;;  %4480 = vmatprep.mubr.bf16.mxu0 %v9694_v35  ;;  %v1065_v55 = vmax.f32 %v842_v50, 0.0  ;;  %v10053_v59 = vld [vmem:[#allocation6 + $0xa40] sm:$0xff]  ;;  %v10057_v48 = vpack.c.bf16 %v1052_v33, %v1044_v18  ;;  %v951_v8 = vadd.f32 %v950_v17, %v9858_v60  ;;  %v952_v53 = vpop.f32.mrb[49].mxu1  ;;  %v7722_v22 = vcombine.low %v1510_v31, %v1514_v28 }
 0x1ce   : > { %4535 = vmatprep.subr.bf16.mxu0 %v7705_v47  ;;  %4932 = vmatprep.mubr.bf16.mxu1 %v9694_v35  ;;  %v1066_v25 = vmax.f32 %v844_v46, 0.0  ;;  %v7712_v47 = vcombine.low %v10027_v37, %v10031_v13  ;;  %v953_v18 = vadd.f32 %v952_v53, %v9867_v42  ;;  %v954_v50 = vpop.f32.mrb[50].mxu1  ;;  %v7721_v37 = vcombine.high %v10053_v59, %v10055_v0  ;;  %v10071_v13 = vld [vmem:[#allocation6 + $0xa80] sm:$0xff] }
 0x1cf   : > { %4987 = vmatprep.subr.bf16.mxu1 %v7707_v24  ;;  %v10061_v2 = vpack.c.bf16 %v1065_v55, %v1057_v45  ;;  %v7714_v24 = vcombine.low %v10033_v36, %v10035_v15  ;;  %v847_v33 = vpop.f32.mrb[52].mxu0  ;;  %v955_v46 = vadd.f32 %v954_v50, %v9858_v60  ;;  %v956_v36 = vpop.f32.mrb[51].mxu1  ;;  %v7723_v15 = vcombine.high %v1510_v31, %v1514_v28  ;;  %v10077_v55 = vld [vmem:[#allocation6 + $0xa88] sm:$0xff]  ;;  %v10099_v31 = vld [vmem:[#allocation6 + $0xae0] sm:$0xff] }
 0x1d0   : > { %4988 = vmatpush1.bf16.msra.mxu1 %v7706_v7  ;;  %v10066_v30 = vpack.c.bf16 %v1066_v25, %v1058_v4  ;;  %v848_v45 = vadd.f32 %v847_v33, %v9803_v21  ;;  %v1059_v7 = vmax.f32 %v951_v8, 0.0  ;;  %v10075_v4 = vld [vmem:[#allocation6 + $0xaa0] sm:$0xff]  ;;  %v10079_v25 = vld [vmem:[#allocation6 + $0xaa8] sm:$0xff]  ;;  %v1060_v17 = vmax.f32 %v953_v18, 0.0 }
 0x1d1   : > { %4536 = vmatpush1.bf16.msra.mxu0 %v7704_v14  ;;  %4989 = vmatprep.subr.bf16.mxu1 %v7715_v62  ;;  %v849_v14 = vpop.f32.mrb[53].mxu0  ;;  %v957_v53 = vadd.f32 %v956_v36, %v9867_v42  ;;  %v7720_v8 = vcombine.low %v10053_v59, %v10055_v0  ;;  %v1067_v9 = vmax.f32 %v955_v46, 0.0  ;;  %v7729_v36 = vcombine.high %v10071_v13, %v10075_v4  ;;  %v1526_v46 = vld [vmem:[#allocation6 + $0xac8] sm:$0xff] }
 0x1d2   : > { %4537 = vmatprep.subr.bf16.mxu0 %v7713_v44  ;;  %v850_v44 = vadd.f32 %v849_v14, %v9814_v49  ;;  %v851_v62 = vpop.f32.mrb[54].mxu0  ;;  %v1073_v33 = vmax.f32 %v848_v45, 0.0  ;;  %v7731_v59 = vcombine.high %v10077_v55, %v10079_v25 }
 0x1d3   : > { %4933 = vmatmul.mubr.bf16.gmra.mrb[80].mxu1 %v9688_v11  ;;  %v852_v50 = vadd.f32 %v851_v62, %v9803_v21  ;;  %v853_v35 = vpop.f32.mrb[55].mxu0  ;;  %v1068_v12 = vmax.f32 %v957_v53, 0.0  ;;  %v10094_v45 = vpack.c.bf16 %v1067_v9, %v1059_v7 }
 0x1d4   : > { %4481 = vmatmul.mubr.bf16.gmra.mrb[80].mxu0 %v9688_v11  ;;  %4990 = vmatpush1.bf16.msra.mxu1 %v7714_v24  ;;  %v1074_v14 = vmax.f32 %v850_v44, 0.0  ;;  %v854_v18 = vadd.f32 %v853_v35, %v9814_v49  ;;  %v960_v24 = vpop.f32.mrb[52].mxu1  ;;  %v1530_v44 = vld [vmem:[#allocation6 + $0xae8] sm:$0xff] }
 0x1d5   : > { %4538 = vmatpush1.bf16.msra.mxu0 %v7712_v47  ;;  %4490 = vmatprep.mubr.bf16.mxu0 %v9752_v51  ;;  %v1081_v0 = vmax.f32 %v852_v50, 0.0  ;;  %v10097_v47 = vld [vmem:[#allocation6 + $0xac0] sm:$0xff]  ;;  %v10101_v28 = vpack.c.bf16 %v1068_v12, %v1060_v17  ;;  %v961_v9 = vadd.f32 %v960_v24, %v9858_v60  ;;  %v962_v7 = vpop.f32.mrb[53].mxu1  ;;  %v7738_v3 = vcombine.low %v1526_v46, %v1530_v44 }
 0x1d6   : > { %4539 = vmatprep.subr.bf16.mxu0 %v7721_v37  ;;  %4942 = vmatprep.mubr.bf16.mxu1 %v9752_v51  ;;  %v1082_v35 = vmax.f32 %v854_v18, 0.0  ;;  %v7728_v37 = vcombine.low %v10071_v13, %v10075_v4  ;;  %v963_v17 = vadd.f32 %v962_v7, %v9867_v42  ;;  %v964_v50 = vpop.f32.mrb[54].mxu1  ;;  %v7737_v13 = vcombine.high %v10097_v47, %v10099_v31  ;;  %v10115_v4 = vld [vmem:[#allocation6 + $0xb00] sm:$0xff] }
 0x1d7   : > { %4991 = vmatprep.subr.bf16.mxu1 %v7723_v15  ;;  %v10105_v62 = vpack.c.bf16 %v1081_v0, %v1073_v33  ;;  %v7730_v15 = vcombine.low %v10077_v55, %v10079_v25  ;;  %v857_v12 = vpop.f32.mrb[56].mxu0  ;;  %v965_v18 = vadd.f32 %v964_v50, %v9858_v60  ;;  %v966_v55 = vpop.f32.mrb[55].mxu1  ;;  %v7739_v25 = vcombine.high %v1526_v46, %v1530_v44  ;;  %v10121_v0 = vld [vmem:[#allocation6 + $0xb08] sm:$0xff]  ;;  %v10143_v46 = vld [vmem:[#allocation6 + $0xb60] sm:$0xff] }
 0x1d8   : > { %4992 = vmatpush1.bf16.msra.mxu1 %v7722_v22  ;;  %v10110_v53 = vpack.c.bf16 %v1082_v35, %v1074_v14  ;;  %v858_v33 = vadd.f32 %v857_v12, %v9803_v21  ;;  %v1075_v22 = vmax.f32 %v961_v9, 0.0  ;;  %v10119_v14 = vld [vmem:[#allocation6 + $0xb20] sm:$0xff]  ;;  %v10123_v35 = vld [vmem:[#allocation6 + $0xb28] sm:$0xff]  ;;  %v1076_v24 = vmax.f32 %v963_v17, 0.0 }
 0x1d9   : > { %4540 = vmatpush1.bf16.msra.mxu0 %v7720_v8  ;;  %4993 = vmatprep.subr.bf16.mxu1 %v7731_v59  ;;  %v859_v8 = vpop.f32.mrb[57].mxu0  ;;  %v967_v7 = vadd.f32 %v966_v55, %v9867_v42  ;;  %v7736_v9 = vcombine.low %v10097_v47, %v10099_v31  ;;  %v1083_v11 = vmax.f32 %v965_v18, 0.0  ;;  %v7745_v55 = vcombine.high %v10115_v4, %v10119_v14  ;;  %v1542_v18 = vld [vmem:[#allocation6 + $0xb48] sm:$0xff] }
 0x1da   : > { %4541 = vmatprep.subr.bf16.mxu0 %v7729_v36  ;;  %v860_v36 = vadd.f32 %v859_v8, %v9814_v49  ;;  %v861_v59 = vpop.f32.mrb[58].mxu0  ;;  %v1089_v12 = vmax.f32 %v858_v33, 0.0  ;;  %v7747_v47 = vcombine.high %v10121_v0, %v10123_v35 }
 0x1db   : > { %4943 = vmatmul.mubr.bf16.gmra.mrb[84].mxu1 %v9748_v40  ;;  %v862_v50 = vadd.f32 %v861_v59, %v9803_v21  ;;  %v863_v51 = vpop.f32.mrb[59].mxu0  ;;  %v1084_v26 = vmax.f32 %v967_v7, 0.0  ;;  %v10138_v33 = vpack.c.bf16 %v1083_v11, %v1075_v22 }
 0x1dc   : > { %4491 = vmatmul.mubr.bf16.gmra.mrb[84].mxu0 %v9748_v40  ;;  %4994 = vmatpush1.bf16.msra.mxu1 %v7730_v15  ;;  %v1090_v8 = vmax.f32 %v860_v36, 0.0  ;;  %v864_v17 = vadd.f32 %v863_v51, %v9814_v49  ;;  %v970_v15 = vpop.f32.mrb[56].mxu1  ;;  %v1546_v36 = vld [vmem:[#allocation6 + $0xb68] sm:$0xff] }
 0x1dd   : > { %4542 = vmatpush1.bf16.msra.mxu0 %v7728_v37  ;;  %4500 = vmatprep.mubr.bf16.mxu0 %v9809_v1  ;;  %v1097_v31 = vmax.f32 %v862_v50, 0.0  ;;  %v10141_v37 = vld [vmem:[#allocation6 + $0xb40] sm:$0xff]  ;;  %v10145_v44 = vpack.c.bf16 %v1084_v26, %v1076_v24  ;;  %v971_v11 = vadd.f32 %v970_v15, %v9858_v60  ;;  %v972_v22 = vpop.f32.mrb[57].mxu1  ;;  %v7754_v27 = vcombine.low %v1542_v18, %v1546_v36 }
 0x1de   : > { %4543 = vmatprep.subr.bf16.mxu0 %v7737_v13  ;;  %4952 = vmatprep.mubr.bf16.mxu1 %v9809_v1  ;;  %v1098_v51 = vmax.f32 %v864_v17, 0.0  ;;  %v7744_v13 = vcombine.low %v10115_v4, %v10119_v14  ;;  %v973_v24 = vadd.f32 %v972_v22, %v9867_v42  ;;  %v974_v50 = vpop.f32.mrb[58].mxu1  ;;  %v7753_v4 = vcombine.high %v10141_v37, %v10143_v46  ;;  %v10159_v14 = vld [vmem:[#allocation6 + $0xb80] sm:$0xff] }
 0x1df   : > { %4995 = vmatprep.subr.bf16.mxu1 %v7739_v25  ;;  %v10149_v59 = vpack.c.bf16 %v1097_v31, %v1089_v12  ;;  %v7746_v25 = vcombine.low %v10121_v0, %v10123_v35  ;;  %v867_v26 = vpop.f32.mrb[60].mxu0  ;;  %v975_v17 = vadd.f32 %v974_v50, %v9858_v60  ;;  %v976_v0 = vpop.f32.mrb[59].mxu1  ;;  %v7755_v35 = vcombine.high %v1542_v18, %v1546_v36  ;;  %v1550_v31 = vld [vmem:[#allocation6 + $0xb88] sm:$0xff] }
 0x1e0   : > { %4996 = vmatpush1.bf16.msra.mxu1 %v7738_v3  ;;  %v10154_v7 = vpack.c.bf16 %v1098_v51, %v1090_v8  ;;  %v868_v12 = vadd.f32 %v867_v26, %v9803_v21  ;;  %v1091_v3 = vmax.f32 %v971_v11, 0.0  ;;  %v1553_v8 = vld [vmem:[#allocation6 + $0xba0] sm:$0xff]  ;;  %v1554_v51 = vld [vmem:[#allocation6 + $0xba8] sm:$0xff]  ;;  %v977_v22 = vadd.f32 %v976_v0, %v9867_v42 }
 0x1e1   : > { %4544 = vmatpush1.bf16.msra.mxu0 %v7736_v9  ;;  %4997 = vmatprep.subr.bf16.mxu1 %v7747_v47  ;;  %v869_v9 = vpop.f32.mrb[61].mxu0  ;;  %v1092_v47 = vmax.f32 %v973_v24, 0.0  ;;  %v7752_v11 = vcombine.low %v10141_v37, %v10143_v46  ;;  %v1099_v40 = vmax.f32 %v975_v17, 0.0  ;;  %v7761_v0 = vcombine.high %v10159_v14, %v1553_v8  ;;  %v1561_v46 = vld [vmem:[#allocation6 + $0xbe0] sm:$0xff]  ;;  %v980_v36 = vpop.f32.mrb[60].mxu1 }
 0x1e2   : > { %4545 = vmatprep.subr.bf16.mxu0 %v7745_v55  ;;  %v870_v15 = vadd.f32 %v869_v9, %v9814_v49  ;;  %v871_v55 = vpop.f32.mrb[62].mxu0  ;;  %v1105_v26 = vmax.f32 %v868_v12, 0.0  ;;  %v1100_v34 = vmax.f32 %v977_v22, 0.0  ;;  %v981_v12 = vadd.f32 %v980_v36, %v9858_v60  ;;  %v982_v17 = vpop.f32.mrb[61].mxu1  ;;  %v1569_v22 = vld [vmem:[#allocation6 + $0xc20] sm:$0xff] }
 0x1e3   : > { %4953 = vmatmul.mubr.bf16.gmra.mrb[88].mxu1 %v9798_v56  ;;  %v872_v50 = vadd.f32 %v871_v55, %v9803_v21  ;;  %v873_v1 = vpop.f32.mrb[63].mxu0  ;;  %v10173_v37 = vpack.c.bf16 %v1099_v40, %v1091_v3  ;;  %v1557_v21 = vld [vmem:[#allocation6 + $0xbc0] sm:$0xff]  ;;  %v7762_v40 = vcombine.low %v1550_v31, %v1554_v51 }
 0x1e4   : > { %4501 = vmatmul.mubr.bf16.gmra.mrb[88].mxu0 %v9798_v56  ;;  %4998 = vmatpush1.bf16.msra.mxu1 %v7746_v25  ;;  %v1106_v9 = vmax.f32 %v870_v15, 0.0  ;;  %v874_v24 = vadd.f32 %v873_v1, %v9814_v49  ;;  %v7763_v56 = vcombine.high %v1550_v31, %v1554_v51  ;;  %v10176_v18 = vpack.c.bf16 %v1100_v34, %v1092_v47  ;;  %v1558_v49 = vld [vmem:[#allocation6 + $0xbc8] sm:$0xff]  ;;  %v984_v15 = vpop.f32.mrb[62].mxu1  ;;  %v1565_v55 = vld [vmem:[#allocation6 + $0xc00] sm:$0xff] }
 0x1e5   : > { %4546 = vmatpush1.bf16.msra.mxu0 %v7744_v13  ;;  %4510 = vmatprep.mubr.bf16.mxu0 %v9881_v19  ;;  %v1113_v41 = vmax.f32 %v872_v50, 0.0  ;;  %v7760_v1 = vcombine.low %v10159_v14, %v1553_v8  ;;  %v1562_v25 = vld [vmem:[#allocation6 + $0xbe8] sm:$0xff]  ;;  %v7769_v34 = vcombine.high %v1557_v21, %v1561_v46  ;;  %v1107_v14 = vmax.f32 %v981_v12, 0.0 }
 0x1e6   : > { %4547 = vmatprep.subr.bf16.mxu0 %v7753_v4  ;;  %4962 = vmatprep.mubr.bf16.mxu1 %v9881_v19  ;;  %v1114_v13 = vmax.f32 %v874_v24, 0.0  ;;  %v985_v8 = vadd.f32 %v984_v15, %v9858_v60  ;;  %v7771_v47 = vcombine.high %v1558_v49, %v1562_v25  ;;  %v1570_v50 = vld [vmem:[#allocation6 + $0xc28] sm:$0xff]  ;;  %v7770_v51 = vcombine.low %v1558_v49, %v1562_v25  ;;  %v1581_v25 = vld [vmem:[#allocation6 + $0xc80] sm:$0xff] }
 0x1e7   : > { %4999 = vmatprep.subr.bf16.mxu1 %v7755_v35  ;;  %v10179_v4 = vpack.c.bf16 %v1113_v41, %v1105_v26  ;;  %v983_v35 = vadd.f32 %v982_v17, %v9867_v42  ;;  %v986_v41 = vpop.f32.mrb[63].mxu1  ;;  %v1566_v26 = vld [vmem:[#allocation6 + $0xc08] sm:$0xff]  ;;  %v7777_v60 = vcombine.high %v1565_v55, %v1569_v22 }
 0x1e8   : > { %5000 = vmatpush1.bf16.msra.mxu1 %v7754_v27  ;;  %v10182_v3 = vpack.c.bf16 %v1114_v13, %v1106_v9  ;;  %v987_v27 = vadd.f32 %v986_v41, %v9867_v42  ;;  %v1115_v31 = vmax.f32 %v985_v8, 0.0  ;;  %v7779_v24 = vcombine.high %v1566_v26, %v1570_v50  ;;  %v1573_v42 = vld [vmem:[#allocation6 + $0xc40] sm:$0xff]  ;;  %v1574_v12 = vld [vmem:[#allocation6 + $0xc48] sm:$0xff] }
 0x1e9   : > { %4548 = vmatpush1.bf16.msra.mxu0 %v7752_v11  ;;  %5001 = vmatprep.subr.bf16.mxu1 %v7763_v56  ;;  %v1108_v11 = vmax.f32 %v983_v35, 0.0  ;;  %v7768_v56 = vcombine.low %v1557_v21, %v1561_v46  ;;  %v1577_v13 = vld [vmem:[#allocation6 + $0xc60] sm:$0xff]  ;;  %v7776_v21 = vcombine.low %v1565_v55, %v1569_v22  ;;  %v7778_v46 = vcombine.low %v1566_v26, %v1570_v50  ;;  %v1582_v35 = vld [vmem:[#allocation6 + $0xc88] sm:$0xff] }
 0x1ea   : > { %4549 = vmatprep.subr.bf16.mxu0 %v7761_v0  ;;  %v1116_v9 = vmax.f32 %v987_v27, 0.0  ;;  %v10190_v0 = vpack.c.bf16 %v1115_v31, %v1107_v14  ;;  %v7785_v49 = vcombine.high %v1573_v42, %v1577_v13  ;;  %v1586_v15 = vld [vmem:[#allocation6 + $0xca8] sm:$0xff]  ;;  %v1589_v41 = vld [vmem:[#allocation6 + $0xcc0] sm:$0xff] }
 0x1eb   : > { %4963 = vmatmul.mubr.bf16.gmra.mrb[92].mxu1 %v9874_v16  ;;  %v7795_v8 = vcombine.high %v1582_v35, %v1586_v15  ;;  %v1590_v22 = vld [vmem:[#allocation6 + $0xcc8] sm:$0xff]  ;;  %v1597_v31 = vld [vmem:[#allocation6 + $0xd00] sm:$0xff] }
 0x1ec   : > { %4511 = vmatmul.mubr.bf16.gmra.mrb[92].mxu0 %v9874_v16  ;;  %5002 = vmatpush1.bf16.msra.mxu1 %v7762_v40  ;;  %v10193_v36 = vpack.c.bf16 %v1116_v9, %v1108_v11  ;;  %v1585_v40 = vld [vmem:[#allocation6 + $0xca0] sm:$0xff]  ;;  %v1594_v26 = vld [vmem:[#allocation6 + $0xce8] sm:$0xff]  ;;  %v7794_v11 = vcombine.low %v1582_v35, %v1586_v15 }
 0x1ed   : > { %4550 = vmatpush1.bf16.msra.mxu0 %v7760_v1  ;;  %4553 = vmatprep.mubr.bf16.mxu0 %v9890_v54  ;;  %v1578_v1 = vld [vmem:[#allocation6 + $0xc68] sm:$0xff]  ;;  %v7793_v55 = vcombine.high %v1581_v25, %v1585_v40  ;;  %v7792_v50 = vcombine.low %v1581_v25, %v1585_v40  ;;  %v1613_v35 = vld [vmem:[#allocation6 + $0xd80] sm:$0xff] }
 0x1ee   : > { %4551 = vmatprep.subr.bf16.mxu0 %v7769_v34  ;;  %5003 = vmatprep.subr.bf16.mxu1 %v7771_v47  ;;  %v7787_v17 = vcombine.high %v1574_v12, %v1578_v1  ;;  %v7784_v34 = vcombine.low %v1573_v42, %v1577_v13  ;;  %v7786_v14 = vcombine.low %v1574_v12, %v1578_v1  ;;  %v1593_v47 = vld [vmem:[#allocation6 + $0xce0] sm:$0xff]  ;;  %v1598_v9 = vld [vmem:[#allocation6 + $0xd08] sm:$0xff] }
 0x1ef   : > { %5005 = vmatprep.mubr.bf16.mxu1 %v9890_v54  ;;  %v7801_v27 = vcombine.high %v1589_v41, %v1593_v47  ;;  %v7802_v42 = vcombine.low %v1590_v22, %v1594_v26  ;;  %v1605_v1 = vld [vmem:[#allocation6 + $0xd40] sm:$0xff] }
 0x1f0   : > { %5004 = vmatpush1.bf16.msra.mxu1 %v7770_v51  ;;  %v1601_v51 = vld [vmem:[#allocation6 + $0xd20] sm:$0xff] }
 0x1f1   : > { %4552 = vmatpush1.bf16.msra.mxu0 %v7768_v56  ;;  %5086 = vmatprep.subr.bf16.mxu1 %v7779_v24  ;;  %v7803_v56 = vcombine.high %v1590_v22, %v1594_v26  ;;  %v7800_v24 = vcombine.low %v1589_v41, %v1593_v47  ;;  %v7809_v13 = vcombine.high %v1597_v31, %v1601_v51  ;;  %v1621_v26 = vld [vmem:[#allocation6 + $0xdc0] sm:$0xff] }
 0x1f2   : > { %4634 = vmatprep.subr.bf16.mxu0 %v7777_v60  ;;  %v1602_v60 = vld [vmem:[#allocation6 + $0xd28] sm:$0xff]  ;;  %v7808_v25 = vcombine.low %v1597_v31, %v1601_v51 }
 0x1f3   : > { %5006 = vmatmul.mubr.bf16.vlgmr.msra.gmra.mrb[64].mxu1 %v9885_v63  ;;  %v7811_v12 = vcombine.high %v1598_v9, %v1602_v60 }
 0x1f4   : > { %4554 = vmatmul.mubr.bf16.vlgmr.msra.gmra.mrb[64].mxu0 %v9885_v63  ;;  %5087 = vmatpush1.bf16.msra.mxu1 %v7778_v46  ;;  %v1606_v46 = vld [vmem:[#allocation6 + $0xd48] sm:$0xff] }
 0x1f5   : > { %4635 = vmatpush1.bf16.msra.mxu0 %v7776_v21  ;;  %4563 = vmatprep.mubr.bf16.mxu0 %v9934_v10  ;;  %v1609_v21 = vld [vmem:[#allocation6 + $0xd60] sm:$0xff] }
 0x1f6   : > { %4636 = vmatprep.subr.bf16.mxu0 %v7785_v49  ;;  %5015 = vmatprep.mubr.bf16.mxu1 %v9934_v10  ;;  %v1610_v49 = vld [vmem:[#allocation6 + $0xd68] sm:$0xff]  ;;  %v7817_v40 = vcombine.high %v1605_v1, %v1609_v21 }
 0x1f7   : > { %5088 = vmatprep.subr.bf16.mxu1 %v7787_v17  ;;  %v7810_v17 = vcombine.low %v1598_v9, %v1602_v60  ;;  %v7819_v15 = vcombine.high %v1606_v46, %v1610_v49  ;;  %v7818_v41 = vcombine.low %v1606_v46, %v1610_v49  ;;  %v1629_v9 = vld [vmem:[#allocation6 + $0xe00] sm:$0xff] }
 0x1f8   : > { %5089 = vmatpush1.bf16.msra.mxu1 %v7786_v14  ;;  %v1614_v14 = vld [vmem:[#allocation6 + $0xd88] sm:$0xff]  ;;  %v1637_v49 = vld [vmem:[#allocation6 + $0xe40] sm:$0xff] }
 0x1f9   : > { %4637 = vmatpush1.bf16.msra.mxu0 %v7784_v34  ;;  %5090 = vmatprep.subr.bf16.mxu1 %v7795_v8  ;;  %v1617_v34 = vld [vmem:[#allocation6 + $0xda0] sm:$0xff]  ;;  %v7816_v8 = vcombine.low %v1605_v1, %v1609_v21 }
 0x1fa   : > { %4638 = vmatprep.subr.bf16.mxu0 %v7793_v55  ;;  %v1618_v55 = vld [vmem:[#allocation6 + $0xda8] sm:$0xff]  ;;  %v7825_v47 = vcombine.high %v1613_v35, %v1617_v34  ;;  %v7824_v31 = vcombine.low %v1613_v35, %v1617_v34 }
 0x1fb   : > { %5016 = vmatmul.mubr.bf16.gmra.mrb[68].mxu1 %v9929_v52  ;;  %v7827_v22 = vcombine.high %v1614_v14, %v1618_v55 }
 0x1fc   : > { %4564 = vmatmul.mubr.bf16.gmra.mrb[68].mxu0 %v9929_v52  ;;  %5091 = vmatpush1.bf16.msra.mxu1 %v7794_v11  ;;  %v1622_v11 = vld [vmem:[#allocation6 + $0xdc8] sm:$0xff] }
 0x1fd   : > { %4639 = vmatpush1.bf16.msra.mxu0 %v7792_v50  ;;  %4573 = vmatprep.mubr.bf16.mxu0 %v9978_v39  ;;  %v1625_v50 = vld [vmem:[#allocation6 + $0xde0] sm:$0xff] }
 0x1fe   : > { %4640 = vmatprep.subr.bf16.mxu0 %v7801_v27  ;;  %5025 = vmatprep.mubr.bf16.mxu1 %v9978_v39  ;;  %v1626_v27 = vld [vmem:[#allocation6 + $0xde8] sm:$0xff]  ;;  %v7833_v51 = vcombine.high %v1621_v26, %v1625_v50 }
 0x1ff   : > { %5092 = vmatprep.subr.bf16.mxu1 %v7803_v56  ;;  %v7826_v56 = vcombine.low %v1614_v14, %v1618_v55  ;;  %v7835_v60 = vcombine.high %v1622_v11, %v1626_v27  ;;  %v7834_v1 = vcombine.low %v1622_v11, %v1626_v27  ;;  %v1645_v14 = vld [vmem:[#allocation6 + $0xe80] sm:$0xff] }
 0x200   : > { %5093 = vmatpush1.bf16.msra.mxu1 %v7802_v42  ;;  %v1630_v42 = vld [vmem:[#allocation6 + $0xe08] sm:$0xff]  ;;  %v1653_v27 = vld [vmem:[#allocation6 + $0xec0] sm:$0xff] }
 0x201   : > { %4641 = vmatpush1.bf16.msra.mxu0 %v7800_v24  ;;  %5094 = vmatprep.subr.bf16.mxu1 %v7811_v12  ;;  %v1633_v24 = vld [vmem:[#allocation6 + $0xe20] sm:$0xff]  ;;  %v7832_v12 = vcombine.low %v1621_v26, %v1625_v50 }
 0x202   : > { %4642 = vmatprep.subr.bf16.mxu0 %v7809_v13  ;;  %v1634_v13 = vld [vmem:[#allocation6 + $0xe28] sm:$0xff]  ;;  %v7841_v21 = vcombine.high %v1629_v9, %v1633_v24  ;;  %v7840_v35 = vcombine.low %v1629_v9, %v1633_v24 }
 0x203   : > { %5026 = vmatmul.mubr.bf16.gmra.mrb[72].mxu1 %v9973_v29  ;;  %v7843_v46 = vcombine.high %v1630_v42, %v1634_v13 }
 0x204   : > { %4574 = vmatmul.mubr.bf16.gmra.mrb[72].mxu0 %v9973_v29  ;;  %5095 = vmatpush1.bf16.msra.mxu1 %v7810_v17  ;;  %v1638_v17 = vld [vmem:[#allocation6 + $0xe48] sm:$0xff] }
 0x205   : > { %4643 = vmatpush1.bf16.msra.mxu0 %v7808_v25  ;;  %4583 = vmatprep.mubr.bf16.mxu0 %v10022_v20  ;;  %v1641_v25 = vld [vmem:[#allocation6 + $0xe60] sm:$0xff] }
 0x206   : > { %4644 = vmatprep.subr.bf16.mxu0 %v7817_v40  ;;  %5035 = vmatprep.mubr.bf16.mxu1 %v10022_v20  ;;  %v1642_v40 = vld [vmem:[#allocation6 + $0xe68] sm:$0xff]  ;;  %v7849_v34 = vcombine.high %v1637_v49, %v1641_v25 }
 0x207   : > { %5096 = vmatprep.subr.bf16.mxu1 %v7819_v15  ;;  %v7842_v15 = vcombine.low %v1630_v42, %v1634_v13  ;;  %v7851_v55 = vcombine.high %v1638_v17, %v1642_v40  ;;  %v7850_v26 = vcombine.low %v1638_v17, %v1642_v40  ;;  %v1661_v42 = vld [vmem:[#allocation6 + $0xf00] sm:$0xff] }
 0x208   : > { %5097 = vmatpush1.bf16.msra.mxu1 %v7818_v41  ;;  %v1646_v41 = vld [vmem:[#allocation6 + $0xe88] sm:$0xff]  ;;  %v1669_v40 = vld [vmem:[#allocation6 + $0xf40] sm:$0xff] }
 0x209   : > { %4645 = vmatpush1.bf16.msra.mxu0 %v7816_v8  ;;  %5098 = vmatprep.subr.bf16.mxu1 %v7827_v22  ;;  %v1649_v8 = vld [vmem:[#allocation6 + $0xea0] sm:$0xff]  ;;  %v7848_v22 = vcombine.low %v1637_v49, %v1641_v25 }
 0x20a   : > { %4646 = vmatprep.subr.bf16.mxu0 %v7825_v47  ;;  %v1650_v47 = vld [vmem:[#allocation6 + $0xea8] sm:$0xff]  ;;  %v7857_v50 = vcombine.high %v1645_v14, %v1649_v8  ;;  %v7856_v9 = vcombine.low %v1645_v14, %v1649_v8 }
 0x20b   : > { %5036 = vmatmul.mubr.bf16.gmra.mrb[76].mxu1 %v10017_v32  ;;  %v7859_v11 = vcombine.high %v1646_v41, %v1650_v47 }
 0x20c   : > { %4584 = vmatmul.mubr.bf16.gmra.mrb[76].mxu0 %v10017_v32  ;;  %5099 = vmatpush1.bf16.msra.mxu1 %v7826_v56  ;;  %v1654_v56 = vld [vmem:[#allocation6 + $0xec8] sm:$0xff] }
 0x20d   : > { %4647 = vmatpush1.bf16.msra.mxu0 %v7824_v31  ;;  %4593 = vmatprep.mubr.bf16.mxu0 %v10066_v30  ;;  %v1657_v31 = vld [vmem:[#allocation6 + $0xee0] sm:$0xff] }
 0x20e   : > { %4648 = vmatprep.subr.bf16.mxu0 %v7833_v51  ;;  %5045 = vmatprep.mubr.bf16.mxu1 %v10066_v30  ;;  %v1658_v51 = vld [vmem:[#allocation6 + $0xee8] sm:$0xff]  ;;  %v7865_v24 = vcombine.high %v1653_v27, %v1657_v31 }
 0x20f   : > { %5100 = vmatprep.subr.bf16.mxu1 %v7835_v60  ;;  %v7858_v60 = vcombine.low %v1646_v41, %v1650_v47  ;;  %v7867_v13 = vcombine.high %v1654_v56, %v1658_v51  ;;  %v7866_v49 = vcombine.low %v1654_v56, %v1658_v51  ;;  %v1677_v41 = vld [vmem:[#allocation6 + $0xf80] sm:$0xff] }
 0x210   : > { %5101 = vmatpush1.bf16.msra.mxu1 %v7834_v1  ;;  %v1662_v1 = vld [vmem:[#allocation6 + $0xf08] sm:$0xff]  ;;  %v1685_v51 = vld [vmem:[#allocation6 + $0xfc0] sm:$0xff] }
 0x211   : > { %4649 = vmatpush1.bf16.msra.mxu0 %v7832_v12  ;;  %5102 = vmatprep.subr.bf16.mxu1 %v7843_v46  ;;  %v1665_v12 = vld [vmem:[#allocation6 + $0xf20] sm:$0xff]  ;;  %v7864_v46 = vcombine.low %v1653_v27, %v1657_v31 }
 0x212   : > { %4650 = vmatprep.subr.bf16.mxu0 %v7841_v21  ;;  %v1666_v21 = vld [vmem:[#allocation6 + $0xf28] sm:$0xff]  ;;  %v7873_v25 = vcombine.high %v1661_v42, %v1665_v12  ;;  %v7872_v14 = vcombine.low %v1661_v42, %v1665_v12 }
 0x213   : > { %5046 = vmatmul.mubr.bf16.gmra.mrb[80].mxu1 %v10061_v2  ;;  %v7875_v17 = vcombine.high %v1662_v1, %v1666_v21 }
 0x214   : > { %4594 = vmatmul.mubr.bf16.gmra.mrb[80].mxu0 %v10061_v2  ;;  %5103 = vmatpush1.bf16.msra.mxu1 %v7842_v15  ;;  %v1670_v15 = vld [vmem:[#allocation6 + $0xf48] sm:$0xff] }
 0x215   : > { %4651 = vmatpush1.bf16.msra.mxu0 %v7840_v35  ;;  %4603 = vmatprep.mubr.bf16.mxu0 %v10110_v53  ;;  %v1673_v35 = vld [vmem:[#allocation6 + $0xf60] sm:$0xff] }
 0x216   : > { %4652 = vmatprep.subr.bf16.mxu0 %v7849_v34  ;;  %5055 = vmatprep.mubr.bf16.mxu1 %v10110_v53  ;;  %v1674_v34 = vld [vmem:[#allocation6 + $0xf68] sm:$0xff]  ;;  %v7881_v8 = vcombine.high %v1669_v40, %v1673_v35 }
 0x217   : > { %5104 = vmatprep.subr.bf16.mxu1 %v7851_v55  ;;  %v7874_v55 = vcombine.low %v1662_v1, %v1666_v21  ;;  %v7883_v47 = vcombine.high %v1670_v15, %v1674_v34  ;;  %v7882_v27 = vcombine.low %v1670_v15, %v1674_v34  ;;  %v1183_v21 = vld [vmem:[#allocation6 + $0x10] sm:$0xff] }
 0x218   : > { %5105 = vmatpush1.bf16.msra.mxu1 %v7850_v26  ;;  %v1678_v26 = vld [vmem:[#allocation6 + $0xf88] sm:$0xff]  ;;  %v1191_v34 = vld [vmem:[#allocation6 + $0x50] sm:$0xff] }
 0x219   : > { %4653 = vmatpush1.bf16.msra.mxu0 %v7848_v22  ;;  %5106 = vmatprep.subr.bf16.mxu1 %v7859_v11  ;;  %v1681_v22 = vld [vmem:[#allocation6 + $0xfa0] sm:$0xff]  ;;  %v7880_v11 = vcombine.low %v1669_v40, %v1673_v35 }
 0x21a   : > { %4654 = vmatprep.subr.bf16.mxu0 %v7857_v50  ;;  %v1682_v50 = vld [vmem:[#allocation6 + $0xfa8] sm:$0xff]  ;;  %v7889_v31 = vcombine.high %v1677_v41, %v1681_v22  ;;  %v7888_v42 = vcombine.low %v1677_v41, %v1681_v22  ;;  %v1196_v41 = vld [vmem:[#allocation6 + $0x78] sm:$0xff] }
 0x21b   : > { %5056 = vmatmul.mubr.bf16.gmra.mrb[84].mxu1 %v10105_v62  ;;  %v7891_v56 = vcombine.high %v1678_v26, %v1682_v50 }
 0x21c   : > { %4604 = vmatmul.mubr.bf16.gmra.mrb[84].mxu0 %v10105_v62  ;;  %5107 = vmatpush1.bf16.msra.mxu1 %v7858_v60  ;;  %v1686_v60 = vld [vmem:[#allocation6 + $0xfc8] sm:$0xff] }
 0x21d   : > { %4655 = vmatpush1.bf16.msra.mxu0 %v7856_v9  ;;  %4613 = vmatprep.mubr.bf16.mxu0 %v10154_v7  ;;  %v1689_v9 = vld [vmem:[#allocation6 + $0xfe0] sm:$0xff] }
 0x21e   : > { %4656 = vmatprep.subr.bf16.mxu0 %v7865_v24  ;;  %5065 = vmatprep.mubr.bf16.mxu1 %v10154_v7  ;;  %v1690_v24 = vld [vmem:[#allocation6 + $0xfe8] sm:$0xff]  ;;  %v7897_v12 = vcombine.high %v1685_v51, %v1689_v9 }
 0x21f   : > { %5108 = vmatprep.subr.bf16.mxu1 %v7867_v13  ;;  %v7890_v13 = vcombine.low %v1678_v26, %v1682_v50  ;;  %v7899_v1 = vcombine.high %v1686_v60, %v1690_v24  ;;  %v7898_v40 = vcombine.low %v1686_v60, %v1690_v24  ;;  %v1199_v26 = vld [vmem:[#allocation6 + $0x90] sm:$0xff] }
 0x220   : > { %5109 = vmatpush1.bf16.msra.mxu1 %v7866_v49  ;;  %v1184_v49 = vld [vmem:[#allocation6 + $0x18] sm:$0xff]  ;;  %v1203_v50 = vld [vmem:[#allocation6 + $0xb0] sm:$0xff] }
 0x221   : > { %4657 = vmatpush1.bf16.msra.mxu0 %v7864_v46  ;;  %5110 = vmatprep.subr.bf16.mxu1 %v7875_v17  ;;  %v1187_v46 = vld [vmem:[#allocation6 + $0x30] sm:$0xff]  ;;  %v7896_v17 = vcombine.low %v1685_v51, %v1689_v9  ;;  %v7413_v51 = vcombine.high %v1199_v26, %v1203_v50 }
 0x222   : > { %4658 = vmatprep.subr.bf16.mxu0 %v7873_v25  ;;  %v1188_v25 = vld [vmem:[#allocation6 + $0x38] sm:$0xff]  ;;  %v7397_v35 = vcombine.high %v1183_v21, %v1187_v46  ;;  %v1207_v24 = vld [vmem:[#allocation6 + $0xd0] sm:$0xff] }
 0x223   : > { %5066 = vmatmul.mubr.bf16.gmra.mrb[88].mxu1 %v10149_v59  ;;  %v7399_v15 = vcombine.high %v1184_v49, %v1188_v25 }
 0x224   : > { %4614 = vmatmul.mubr.bf16.gmra.mrb[88].mxu0 %v10149_v59  ;;  %5111 = vmatpush1.bf16.msra.mxu1 %v7874_v55  ;;  %v7396_v55 = vcombine.low %v1183_v21, %v1187_v46 }
 0x225   : > { %4659 = vmatpush1.bf16.msra.mxu0 %v7872_v14  ;;  %4623 = vmatprep.mubr.bf16.mxu0 %v10182_v3  ;;  %v1195_v14 = vld [vmem:[#allocation6 + $0x70] sm:$0xff] }
 0x226   : > { %4660 = vmatprep.subr.bf16.mxu0 %v7881_v8  ;;  %5075 = vmatprep.mubr.bf16.mxu1 %v10182_v3  ;;  %v1192_v8 = vld [vmem:[#allocation6 + $0x58] sm:$0xff]  ;;  %v7405_v22 = vcombine.high %v1191_v34, %v1195_v14 }
 0x227   : > { %5112 = vmatprep.subr.bf16.mxu1 %v7883_v47  ;;  %v7398_v47 = vcombine.low %v1184_v49, %v1188_v25  ;;  %v7406_v9 = vcombine.low %v1192_v8, %v1196_v41  ;;  %v1215_v49 = vld [vmem:[#allocation6 + $0x110] sm:$0xff] }
 0x228   : > { %5113 = vmatpush1.bf16.msra.mxu1 %v7882_v27  ;;  %v7404_v27 = vcombine.low %v1191_v34, %v1195_v14  ;;  %v1219_v25 = vld [vmem:[#allocation6 + $0x130] sm:$0xff] }
 0x229   : > { %4661 = vmatpush1.bf16.msra.mxu0 %v7880_v11  ;;  %5114 = vmatprep.subr.bf16.mxu1 %v7891_v56  ;;  %v7407_v11 = vcombine.high %v1192_v8, %v1196_v41  ;;  %v1204_v56 = vld [vmem:[#allocation6 + $0xb8] sm:$0xff]  ;;  %v7429_v34 = vcombine.high %v1215_v49, %v1219_v25  ;;  %v1223_v8 = vld [vmem:[#allocation6 + $0x150] sm:$0xff] }
 0x22a   : > { %4662 = vmatprep.subr.bf16.mxu0 %v7889_v31  ;;  %v1200_v31 = vld [vmem:[#allocation6 + $0x98] sm:$0xff]  ;;  %v1227_v41 = vld [vmem:[#allocation6 + $0x170] sm:$0xff] }
 0x22b   : > { %5076 = vmatmul.mubr.bf16.gmra.mrb[92].mxu1 %v10179_v4  ;;  %v7415_v60 = vcombine.high %v1200_v31, %v1204_v56  ;;  %v7414_v21 = vcombine.low %v1200_v31, %v1204_v56  ;;  %v1235_v31 = vld [vmem:[#allocation6 + $0x1b0] sm:$0xff] }
 0x22c   : > { %4624 = vmatmul.mubr.bf16.gmra.mrb[92].mxu0 %v10179_v4  ;;  %5115 = vmatpush1.bf16.msra.mxu1 %v7890_v13  ;;  %v7412_v13 = vcombine.low %v1199_v26, %v1203_v50  ;;  %v1228_v26 = vld [vmem:[#allocation6 + $0x178] sm:$0xff] }
 0x22d   : > { %4663 = vmatpush1.bf16.msra.mxu0 %v7888_v42  ;;  %4666 = vmatprep.mubr.bf16.mxu0 %v9925_v61  ;;  %v1211_v42 = vld [vmem:[#allocation6 + $0xf0] sm:$0xff] }
 0x22e   : > { %5118 = vmatprep.mubr.bf16.mxu1 %v9925_v61  ;;  %4664 = vmatprep.subr.bf16.mxu0 %v7897_v12  ;;  %v1208_v12 = vld [vmem:[#allocation6 + $0xd8] sm:$0xff]  ;;  %v7421_v46 = vcombine.high %v1207_v24, %v1211_v42 }
 0x22f   : > { %5116 = vmatprep.subr.bf16.mxu1 %v7899_v1  ;;  %v1212_v1 = vld [vmem:[#allocation6 + $0xf8] sm:$0xff] }
 0x230   : > { %5117 = vmatpush1.bf16.msra.mxu1 %v7898_v40  ;;  %v7420_v40 = vcombine.low %v1207_v24, %v1211_v42  ;;  %v7422_v14 = vcombine.low %v1208_v12, %v1212_v1 }
 0x231   : > { %4665 = vmatpush1.bf16.msra.mxu0 %v7896_v17  ;;  %5651 = vmatprep.subr.bf16.mxu1 %v7399_v15  ;;  %v7423_v17 = vcombine.high %v1208_v12, %v1212_v1  ;;  %v1220_v15 = vld [vmem:[#allocation6 + $0x138] sm:$0xff]  ;;  %v1239_v12 = vld [vmem:[#allocation6 + $0x1d0] sm:$0xff] }
 0x232   : > { %5199 = vmatprep.subr.bf16.mxu0 %v7397_v35  ;;  %v1216_v35 = vld [vmem:[#allocation6 + $0x118] sm:$0xff]  ;;  %v1243_v1 = vld [vmem:[#allocation6 + $0x1f0] sm:$0xff] }
 0x233   : > { %5119 = vmatmul.mubr.bf16.vlgmr.msra.gmra.mrb[64].mxu1 %v9918_v5  ;;  %v7430_v50 = vcombine.low %v1216_v35, %v1220_v15 }
 0x234   : > { %4667 = vmatmul.mubr.bf16.vlgmr.msra.gmra.mrb[64].mxu0 %v9918_v5  ;;  %5128 = vmatprep.mubr.bf16.mxu1 %v9969_v38 }
 0x235   : > { %5200 = vmatpush1.bf16.msra.mxu0 %v7396_v55  ;;  %4676 = vmatprep.mubr.bf16.mxu0 %v9969_v38  ;;  %v7431_v55 = vcombine.high %v1216_v35, %v1220_v15  ;;  %v1251_v35 = vld [vmem:[#allocation6 + $0x230] sm:$0xff] }
 0x236   : > { %5652 = vmatpush1.bf16.msra.mxu1 %v7398_v47  ;;  %5201 = vmatprep.subr.bf16.mxu0 %v7405_v22  ;;  %v7428_v47 = vcombine.low %v1215_v49, %v1219_v25  ;;  %v1224_v22 = vld [vmem:[#allocation6 + $0x158] sm:$0xff] }
 0x237   : > { %5653 = vmatprep.subr.bf16.mxu1 %v7407_v11  ;;  %v7437_v11 = vcombine.high %v1223_v8, %v1227_v41  ;;  %v7439_v56 = vcombine.high %v1224_v22, %v1228_v26  ;;  %v7438_v42 = vcombine.low %v1224_v22, %v1228_v26  ;;  %v1244_v49 = vld [vmem:[#allocation6 + $0x1f8] sm:$0xff]  ;;  %v1255_v22 = vld [vmem:[#allocation6 + $0x250] sm:$0xff] }
 0x238   : > { %v1259_v26 = vld [vmem:[#allocation6 + $0x270] sm:$0xff] }
 0x239   : > { %5202 = vmatpush1.bf16.msra.mxu0 %v7404_v27  ;;  %v1231_v27 = vld [vmem:[#allocation6 + $0x190] sm:$0xff] }
 0x23a   : > { %5203 = vmatprep.subr.bf16.mxu0 %v7413_v51  ;;  %5654 = vmatpush1.bf16.msra.mxu1 %v7406_v9  ;;  %v7436_v51 = vcombine.low %v1223_v8, %v1227_v41  ;;  %v1232_v9 = vld [vmem:[#allocation6 + $0x198] sm:$0xff]  ;;  %v7445_v24 = vcombine.high %v1231_v27, %v1235_v31 }
 0x23b   : > { %5655 = vmatprep.subr.bf16.mxu1 %v7415_v60  ;;  %5129 = vmatmul.mubr.bf16.gmra.mrb[68].mxu1 %v9962_v6  ;;  %v1236_v60 = vld [vmem:[#allocation6 + $0x1b8] sm:$0xff] }
 0x23c   : > { %4677 = vmatmul.mubr.bf16.gmra.mrb[68].mxu0 %v9962_v6  ;;  %5138 = vmatprep.mubr.bf16.mxu1 %v10013_v23  ;;  %v7446_v25 = vcombine.low %v1232_v9, %v1236_v60 }
 0x23d   : > { %5204 = vmatpush1.bf16.msra.mxu0 %v7412_v13  ;;  %4686 = vmatprep.mubr.bf16.mxu0 %v10013_v23  ;;  %v7447_v13 = vcombine.high %v1232_v9, %v1236_v60  ;;  %v1267_v9 = vld [vmem:[#allocation6 + $0x2b0] sm:$0xff] }
 0x23e   : > { %5656 = vmatpush1.bf16.msra.mxu1 %v7414_v21  ;;  %5205 = vmatprep.subr.bf16.mxu0 %v7421_v46  ;;  %v7444_v21 = vcombine.low %v1231_v27, %v1235_v31  ;;  %v1240_v46 = vld [vmem:[#allocation6 + $0x1d8] sm:$0xff] }
 0x23f   : > { %5657 = vmatprep.subr.bf16.mxu1 %v7423_v17  ;;  %v7453_v17 = vcombine.high %v1239_v12, %v1243_v1  ;;  %v7455_v15 = vcombine.high %v1240_v46, %v1244_v49  ;;  %v7454_v41 = vcombine.low %v1240_v46, %v1244_v49  ;;  %v1260_v27 = vld [vmem:[#allocation6 + $0x278] sm:$0xff]  ;;  %v1271_v46 = vld [vmem:[#allocation6 + $0x2d0] sm:$0xff] }
 0x240   : > { %v1275_v49 = vld [vmem:[#allocation6 + $0x2f0] sm:$0xff] }
 0x241   : > { %5206 = vmatpush1.bf16.msra.mxu0 %v7420_v40  ;;  %v1247_v40 = vld [vmem:[#allocation6 + $0x210] sm:$0xff] }
 0x242   : > { %5207 = vmatprep.subr.bf16.mxu0 %v7429_v34  ;;  %5658 = vmatpush1.bf16.msra.mxu1 %v7422_v14  ;;  %v7452_v34 = vcombine.low %v1239_v12, %v1243_v1  ;;  %v1248_v14 = vld [vmem:[#allocation6 + $0x218] sm:$0xff]  ;;  %v7461_v8 = vcombine.high %v1247_v40, %v1251_v35 }
 0x243   : > { %5659 = vmatprep.subr.bf16.mxu1 %v7431_v55  ;;  %5139 = vmatmul.mubr.bf16.gmra.mrb[72].mxu1 %v10006_v58  ;;  %v1252_v55 = vld [vmem:[#allocation6 + $0x238] sm:$0xff] }
 0x244   : > { %4687 = vmatmul.mubr.bf16.gmra.mrb[72].mxu0 %v10006_v58  ;;  %5148 = vmatprep.mubr.bf16.mxu1 %v10057_v48  ;;  %v7462_v31 = vcombine.low %v1248_v14, %v1252_v55 }
 0x245   : > { %5208 = vmatpush1.bf16.msra.mxu0 %v7428_v47  ;;  %4696 = vmatprep.mubr.bf16.mxu0 %v10057_v48  ;;  %v7463_v47 = vcombine.high %v1248_v14, %v1252_v55  ;;  %v1283_v14 = vld [vmem:[#allocation6 + $0x330] sm:$0xff] }
 0x246   : > { %5660 = vmatpush1.bf16.msra.mxu1 %v7430_v50  ;;  %5209 = vmatprep.subr.bf16.mxu0 %v7437_v11  ;;  %v7460_v50 = vcombine.low %v1247_v40, %v1251_v35  ;;  %v1256_v11 = vld [vmem:[#allocation6 + $0x258] sm:$0xff] }
 0x247   : > { %5661 = vmatprep.subr.bf16.mxu1 %v7439_v56  ;;  %v7469_v56 = vcombine.high %v1255_v22, %v1259_v26  ;;  %v7471_v60 = vcombine.high %v1256_v11, %v1260_v27  ;;  %v7470_v1 = vcombine.low %v1256_v11, %v1260_v27  ;;  %v1276_v40 = vld [vmem:[#allocation6 + $0x2f8] sm:$0xff]  ;;  %v1287_v11 = vld [vmem:[#allocation6 + $0x350] sm:$0xff] }
 0x248   : > { %v1291_v27 = vld [vmem:[#allocation6 + $0x370] sm:$0xff] }
 0x249   : > { %5210 = vmatpush1.bf16.msra.mxu0 %v7436_v51  ;;  %v1263_v51 = vld [vmem:[#allocation6 + $0x290] sm:$0xff] }
 0x24a   : > { %5211 = vmatprep.subr.bf16.mxu0 %v7445_v24  ;;  %5662 = vmatpush1.bf16.msra.mxu1 %v7438_v42  ;;  %v7468_v24 = vcombine.low %v1255_v22, %v1259_v26  ;;  %v1264_v42 = vld [vmem:[#allocation6 + $0x298] sm:$0xff]  ;;  %v7477_v12 = vcombine.high %v1263_v51, %v1267_v9 }
 0x24b   : > { %5663 = vmatprep.subr.bf16.mxu1 %v7447_v13  ;;  %5149 = vmatmul.mubr.bf16.gmra.mrb[76].mxu1 %v10050_v57  ;;  %v1268_v13 = vld [vmem:[#allocation6 + $0x2b8] sm:$0xff] }
 0x24c   : > { %4697 = vmatmul.mubr.bf16.gmra.mrb[76].mxu0 %v10050_v57  ;;  %5158 = vmatprep.mubr.bf16.mxu1 %v10101_v28  ;;  %v7478_v35 = vcombine.low %v1264_v42, %v1268_v13 }
 0x24d   : > { %5212 = vmatpush1.bf16.msra.mxu0 %v7444_v21  ;;  %4706 = vmatprep.mubr.bf16.mxu0 %v10101_v28  ;;  %v7479_v21 = vcombine.high %v1264_v42, %v1268_v13  ;;  %v1299_v42 = vld [vmem:[#allocation6 + $0x3b0] sm:$0xff] }
 0x24e   : > { %5664 = vmatpush1.bf16.msra.mxu1 %v7446_v25  ;;  %5213 = vmatprep.subr.bf16.mxu0 %v7453_v17  ;;  %v7476_v25 = vcombine.low %v1263_v51, %v1267_v9  ;;  %v1272_v17 = vld [vmem:[#allocation6 + $0x2d8] sm:$0xff] }
 0x24f   : > { %5665 = vmatprep.subr.bf16.mxu1 %v7455_v15  ;;  %v7485_v15 = vcombine.high %v1271_v46, %v1275_v49  ;;  %v7487_v55 = vcombine.high %v1272_v17, %v1276_v40  ;;  %v7486_v26 = vcombine.low %v1272_v17, %v1276_v40  ;;  %v1292_v51 = vld [vmem:[#allocation6 + $0x378] sm:$0xff]  ;;  %v1303_v17 = vld [vmem:[#allocation6 + $0x3d0] sm:$0xff] }
 0x250   : > { %v1307_v40 = vld [vmem:[#allocation6 + $0x3f0] sm:$0xff] }
 0x251   : > { %5214 = vmatpush1.bf16.msra.mxu0 %v7452_v34  ;;  %v1279_v34 = vld [vmem:[#allocation6 + $0x310] sm:$0xff] }
 0x252   : > { %5215 = vmatprep.subr.bf16.mxu0 %v7461_v8  ;;  %5666 = vmatpush1.bf16.msra.mxu1 %v7454_v41  ;;  %v7484_v8 = vcombine.low %v1271_v46, %v1275_v49  ;;  %v1280_v41 = vld [vmem:[#allocation6 + $0x318] sm:$0xff]  ;;  %v7493_v22 = vcombine.high %v1279_v34, %v1283_v14 }
 0x253   : > { %5667 = vmatprep.subr.bf16.mxu1 %v7463_v47  ;;  %5159 = vmatmul.mubr.bf16.gmra.mrb[80].mxu1 %v10094_v45  ;;  %v1284_v47 = vld [vmem:[#allocation6 + $0x338] sm:$0xff] }
 0x254   : > { %4707 = vmatmul.mubr.bf16.gmra.mrb[80].mxu0 %v10094_v45  ;;  %5168 = vmatprep.mubr.bf16.mxu1 %v10145_v44  ;;  %v7494_v9 = vcombine.low %v1280_v41, %v1284_v47 }
 0x255   : > { %5216 = vmatpush1.bf16.msra.mxu0 %v7460_v50  ;;  %4716 = vmatprep.mubr.bf16.mxu0 %v10145_v44  ;;  %v7495_v50 = vcombine.high %v1280_v41, %v1284_v47  ;;  %v1315_v41 = vld [vmem:[#allocation6 + $0x430] sm:$0xff] }
 0x256   : > { %5668 = vmatpush1.bf16.msra.mxu1 %v7462_v31  ;;  %5217 = vmatprep.subr.bf16.mxu0 %v7469_v56  ;;  %v7492_v31 = vcombine.low %v1279_v34, %v1283_v14  ;;  %v1288_v56 = vld [vmem:[#allocation6 + $0x358] sm:$0xff] }
 0x257   : > { %5669 = vmatprep.subr.bf16.mxu1 %v7471_v60  ;;  %v7501_v60 = vcombine.high %v1287_v11, %v1291_v27  ;;  %v7503_v13 = vcombine.high %v1288_v56, %v1292_v51  ;;  %v7502_v49 = vcombine.low %v1288_v56, %v1292_v51  ;;  %v1308_v34 = vld [vmem:[#allocation6 + $0x3f8] sm:$0xff]  ;;  %v1323_v56 = vld [vmem:[#allocation6 + $0x470] sm:$0xff] }
 0x259   : > { %5218 = vmatpush1.bf16.msra.mxu0 %v7468_v24  ;;  %v1295_v24 = vld [vmem:[#allocation6 + $0x390] sm:$0xff] }
 0x25a   : > { %5219 = vmatprep.subr.bf16.mxu0 %v7477_v12  ;;  %5670 = vmatpush1.bf16.msra.mxu1 %v7470_v1  ;;  %v7500_v12 = vcombine.low %v1287_v11, %v1291_v27  ;;  %v1296_v1 = vld [vmem:[#allocation6 + $0x398] sm:$0xff]  ;;  %v7509_v46 = vcombine.high %v1295_v24, %v1299_v42 }
 0x25b   : > { %5671 = vmatprep.subr.bf16.mxu1 %v7479_v21  ;;  %5169 = vmatmul.mubr.bf16.gmra.mrb[84].mxu1 %v10138_v33  ;;  %v1300_v21 = vld [vmem:[#allocation6 + $0x3b8] sm:$0xff] }
 0x25c   : > { %4717 = vmatmul.mubr.bf16.gmra.mrb[84].mxu0 %v10138_v33  ;;  %5178 = vmatprep.mubr.bf16.mxu1 %v10176_v18  ;;  %v7510_v14 = vcombine.low %v1296_v1, %v1300_v21 }
 0x25d   : > { %5220 = vmatpush1.bf16.msra.mxu0 %v7476_v25  ;;  %4726 = vmatprep.mubr.bf16.mxu0 %v10176_v18  ;;  %v7511_v25 = vcombine.high %v1296_v1, %v1300_v21  ;;  %v1331_v1 = vld [vmem:[#allocation6 + $0x4b0] sm:$0xff] }
 0x25e   : > { %5672 = vmatpush1.bf16.msra.mxu1 %v7478_v35  ;;  %5221 = vmatprep.subr.bf16.mxu0 %v7485_v15  ;;  %v7508_v35 = vcombine.low %v1295_v24, %v1299_v42  ;;  %v1304_v15 = vld [vmem:[#allocation6 + $0x3d8] sm:$0xff] }
 0x25f   : > { %5673 = vmatprep.subr.bf16.mxu1 %v7487_v55  ;;  %v7517_v55 = vcombine.high %v1303_v17, %v1307_v40  ;;  %v7519_v47 = vcombine.high %v1304_v15, %v1308_v34  ;;  %v7518_v27 = vcombine.low %v1304_v15, %v1308_v34  ;;  %v1324_v24 = vld [vmem:[#allocation6 + $0x478] sm:$0xff]  ;;  %v1335_v15 = vld [vmem:[#allocation6 + $0x4d0] sm:$0xff] }
 0x260   : > { %v11179_v21 = vld [vmem:[#allocation14_spill] sm:$0xff] }
 0x261   : > { %5222 = vmatpush1.bf16.msra.mxu0 %v7484_v8  ;;  %v1311_v8 = vld [vmem:[#allocation6 + $0x410] sm:$0xff] }
 0x262   : > { %5223 = vmatprep.subr.bf16.mxu0 %v7493_v22  ;;  %5674 = vmatpush1.bf16.msra.mxu1 %v7486_v26  ;;  %v7516_v22 = vcombine.low %v1303_v17, %v1307_v40  ;;  %v1312_v26 = vld [vmem:[#allocation6 + $0x418] sm:$0xff]  ;;  %v7525_v11 = vcombine.high %v1311_v8, %v1315_v41  ;;  %v1339_v34 = vld [vmem:[#allocation6 + $0x4f0] sm:$0xff] }
 0x263   : > { %5675 = vmatprep.subr.bf16.mxu1 %v7495_v50  ;;  %5179 = vmatmul.mubr.bf16.gmra.mrb[88].mxu1 %v10173_v37  ;;  %v1316_v50 = vld [vmem:[#allocation6 + $0x438] sm:$0xff] }
 0x264   : > { %4727 = vmatmul.mubr.bf16.gmra.mrb[88].mxu0 %v10173_v37  ;;  %5188 = vmatprep.mubr.bf16.mxu1 %v10193_v36  ;;  %v7527_v51 = vcombine.high %v1312_v26, %v1316_v50  ;;  %v1332_v17 = vld [vmem:[#allocation6 + $0x4b8] sm:$0xff] }
 0x265   : > { %5224 = vmatpush1.bf16.msra.mxu0 %v7492_v31  ;;  %4736 = vmatprep.mubr.bf16.mxu0 %v10193_v36  ;;  %v1319_v31 = vld [vmem:[#allocation6 + $0x450] sm:$0xff] }
 0x266   : > { %5676 = vmatpush1.bf16.msra.mxu1 %v7494_v9  ;;  %5225 = vmatprep.subr.bf16.mxu0 %v7501_v60  ;;  %v7524_v9 = vcombine.low %v1311_v8, %v1315_v41  ;;  %v1320_v60 = vld [vmem:[#allocation6 + $0x458] sm:$0xff]  ;;  %v7533_v42 = vcombine.high %v1319_v31, %v1323_v56 }
 0x267   : > { %5677 = vmatprep.subr.bf16.mxu1 %v7503_v13  ;;  %v7526_v13 = vcombine.low %v1312_v26, %v1316_v50  ;;  %v1336_v8 = vld [vmem:[#allocation6 + $0x4d8] sm:$0xff]  ;;  %v1343_v26 = vld [vmem:[#allocation6 + $0x510] sm:$0xff] }
 0x268   : > { %v1340_v41 = vld [vmem:[#allocation6 + $0x4f8] sm:$0xff]  ;;  %v1347_v50 = vld [vmem:[#allocation6 + $0x530] sm:$0xff] }
 0x269   : > { %5226 = vmatpush1.bf16.msra.mxu0 %v7500_v12  ;;  %v1327_v12 = vld [vmem:[#allocation6 + $0x490] sm:$0xff] }
 0x26a   : > { %5227 = vmatprep.subr.bf16.mxu0 %v7509_v46  ;;  %5678 = vmatpush1.bf16.msra.mxu1 %v7502_v49  ;;  %v11180_v46 = vld [vmem:[#allocation18_spill] sm:$0xff]  ;;  %v7532_v49 = vcombine.low %v1319_v31, %v1323_v56  ;;  %v7541_v40 = vcombine.high %v1327_v12, %v1331_v1  ;;  %v7548_v56 = vcombine.low %v1335_v15, %v1339_v34 }
 0x26b   : > { %5679 = vmatprep.subr.bf16.mxu1 %v7511_v25  ;;  %5189 = vmatmul.mubr.bf16.gmra.mrb[92].mxu1 %v10190_v0  ;;  %v1328_v25 = vld [vmem:[#allocation6 + $0x498] sm:$0xff] }
 0x26c   : > { %4737 = vmatmul.mubr.bf16.gmra.mrb[92].mxu0 %v10190_v0  ;;  %5683 = vmatprep.mubr.bf16.mxu1 %v9443_v43  ;;  %v11182_v31 = vld [vmem:[#allocation22_spill] sm:$0xff] }
 0x26d   : > { %5228 = vmatpush1.bf16.msra.mxu0 %v7508_v35  ;;  %5231 = vmatprep.mubr.bf16.mxu0 %v9443_v43  ;;  %v7535_v43 = vcombine.high %v1320_v60, %v1324_v24  ;;  %v7534_v35 = vcombine.low %v1320_v60, %v1324_v24  ;;  %v7557_v60 = vcombine.high %v1343_v26, %v1347_v50 }
 0x26e   : > { %5680 = vmatpush1.bf16.msra.mxu1 %v7510_v14  ;;  %5229 = vmatprep.subr.bf16.mxu0 %v7517_v55  ;;  %v7543_v14 = vcombine.high %v1328_v25, %v1332_v17  ;;  %v7540_v55 = vcombine.low %v1327_v12, %v1331_v1  ;;  %v7550_v24 = vcombine.low %v1336_v8, %v1340_v41 }
 0x26f   : > { %5681 = vmatprep.subr.bf16.mxu1 %v7519_v47  ;;  %v7549_v47 = vcombine.high %v1335_v15, %v1339_v34  ;;  %v7556_v1 = vcombine.low %v1343_v26, %v1347_v50  ;;  %v11184_v15 = vld [vmem:[#allocation26_spill] sm:$0xff] }
 0x271   : > { %5230 = vmatpush1.bf16.msra.mxu0 %v7516_v22  ;;  %v7542_v22 = vcombine.low %v1328_v25, %v1332_v17  ;;  %v1359_v25 = vld [vmem:[#allocation6 + $0x590] sm:$0xff] }
 0x272   : > { %5312 = vmatprep.subr.bf16.mxu0 %v7525_v11  ;;  %5682 = vmatpush1.bf16.msra.mxu1 %v7518_v27  ;;  %v11181_v11 = vld [vmem:[#allocation17_spill] sm:$0xff]  ;;  %v7551_v27 = vcombine.high %v1336_v8, %v1340_v41 }
 0x273   : > { %5764 = vmatprep.subr.bf16.mxu1 %v7527_v51  ;;  %v1344_v51 = vld [vmem:[#allocation6 + $0x518] sm:$0xff]  ;;  %v1363_v17 = vld [vmem:[#allocation6 + $0x5b0] sm:$0xff] }
 0x274   : > { %5232 = vmatmul.mubr.bf16.vlgmr.msra.gmra.mrb[96].mxu0 %v11179_v21  ;;  %v7573_v8 = vcombine.high %v1359_v25, %v1363_v17  ;;  %v7572_v50 = vcombine.low %v1359_v25, %v1363_v17 }
 0x275   : > { %5313 = vmatpush1.bf16.msra.mxu0 %v7524_v9  ;;  %5241 = vmatprep.mubr.bf16.mxu0 %v11180_v46  ;;  %v1348_v9 = vld [vmem:[#allocation6 + $0x538] sm:$0xff] }
 0x276   : > { %5684 = vmatmul.mubr.bf16.vlgmr.msra.gmra.mrb[96].mxu1 %v11179_v21  ;;  %5314 = vmatprep.subr.bf16.mxu0 %v7533_v42  ;;  %v1351_v42 = vld [vmem:[#allocation6 + $0x550] sm:$0xff]  ;;  %v7559_v12 = vcombine.high %v1344_v51, %v1348_v9  ;;  %v1352_v21 = vld [vmem:[#allocation6 + $0x558] sm:$0xff] }
 0x277   : > { %5693 = vmatprep.mubr.bf16.mxu1 %v11180_v46  ;;  %5765 = vmatpush1.bf16.msra.mxu1 %v7526_v13  ;;  %v1355_v13 = vld [vmem:[#allocation6 + $0x570] sm:$0xff] }
 0x278   : > { %5766 = vmatprep.subr.bf16.mxu1 %v7535_v43  ;;  %v1356_v43 = vld [vmem:[#allocation6 + $0x578] sm:$0xff]  ;;  %v7565_v46 = vcombine.high %v1351_v42, %v1355_v13  ;;  %v7564_v34 = vcombine.low %v1351_v42, %v1355_v13 }
 0x279   : > { %5315 = vmatpush1.bf16.msra.mxu0 %v7532_v49  ;;  %v7558_v49 = vcombine.low %v1344_v51, %v1348_v9  ;;  %v7566_v41 = vcombine.low %v1352_v21, %v1356_v43  ;;  %v1375_v51 = vld [vmem:[#allocation6 + $0x610] sm:$0xff] }
 0x27a   : > { %5316 = vmatprep.subr.bf16.mxu0 %v7541_v40  ;;  %v11183_v40 = vld [vmem:[#allocation21_spill] sm:$0xff]  ;;  %v11186_v42 = vld [vmem:[#allocation30_spill] sm:$0xff] }
 0x27b   : > { %5767 = vmatpush1.bf16.msra.mxu1 %v7534_v35  ;;  %v7567_v35 = vcombine.high %v1352_v21, %v1356_v43  ;;  %v1379_v9 = vld [vmem:[#allocation6 + $0x630] sm:$0xff] }
 0x27c   : > { %5242 = vmatmul.mubr.bf16.gmra.mrb[100].mxu0 %v11181_v11  ;;  %5768 = vmatprep.subr.bf16.mxu1 %v7543_v14  ;;  %v1360_v14 = vld [vmem:[#allocation6 + $0x598] sm:$0xff]  ;;  %v7589_v21 = vcombine.high %v1375_v51, %v1379_v9  ;;  %v7588_v17 = vcombine.low %v1375_v51, %v1379_v9 }
 0x27d   : > { %5317 = vmatpush1.bf16.msra.mxu0 %v7540_v55  ;;  %5251 = vmatprep.mubr.bf16.mxu0 %v11182_v31  ;;  %v1364_v55 = vld [vmem:[#allocation6 + $0x5b8] sm:$0xff] }
 0x27e   : > { %5694 = vmatmul.mubr.bf16.gmra.mrb[100].mxu1 %v11181_v11  ;;  %5318 = vmatprep.subr.bf16.mxu0 %v7549_v47  ;;  %v1367_v47 = vld [vmem:[#allocation6 + $0x5d0] sm:$0xff]  ;;  %v7575_v26 = vcombine.high %v1360_v14, %v1364_v55  ;;  %v1368_v11 = vld [vmem:[#allocation6 + $0x5d8] sm:$0xff] }
 0x27f   : > { %5703 = vmatprep.mubr.bf16.mxu1 %v11182_v31  ;;  %5769 = vmatpush1.bf16.msra.mxu1 %v7542_v22  ;;  %v1371_v22 = vld [vmem:[#allocation6 + $0x5f0] sm:$0xff] }
 0x280   : > { %5770 = vmatprep.subr.bf16.mxu1 %v7551_v27  ;;  %v1372_v27 = vld [vmem:[#allocation6 + $0x5f8] sm:$0xff]  ;;  %v7581_v31 = vcombine.high %v1367_v47, %v1371_v22  ;;  %v7580_v13 = vcombine.low %v1367_v47, %v1371_v22 }
 0x281   : > { %5319 = vmatpush1.bf16.msra.mxu0 %v7548_v56  ;;  %v7574_v56 = vcombine.low %v1360_v14, %v1364_v55  ;;  %v7582_v43 = vcombine.low %v1368_v11, %v1372_v27  ;;  %v1391_v14 = vld [vmem:[#allocation6 + $0x690] sm:$0xff] }
 0x282   : > { %5320 = vmatprep.subr.bf16.mxu0 %v7557_v60  ;;  %v11185_v60 = vld [vmem:[#allocation25_spill] sm:$0xff]  ;;  %v11188_v47 = vld [vmem:[#allocation34_spill] sm:$0xff] }
 0x283   : > { %5771 = vmatpush1.bf16.msra.mxu1 %v7550_v24  ;;  %v7583_v24 = vcombine.high %v1368_v11, %v1372_v27  ;;  %v1395_v55 = vld [vmem:[#allocation6 + $0x6b0] sm:$0xff] }
 0x284   : > { %5252 = vmatmul.mubr.bf16.gmra.mrb[104].mxu0 %v11183_v40  ;;  %5772 = vmatprep.subr.bf16.mxu1 %v7559_v12  ;;  %v1376_v12 = vld [vmem:[#allocation6 + $0x618] sm:$0xff]  ;;  %v7605_v11 = vcombine.high %v1391_v14, %v1395_v55  ;;  %v7604_v9 = vcombine.low %v1391_v14, %v1395_v55 }
 0x285   : > { %5321 = vmatpush1.bf16.msra.mxu0 %v7556_v1  ;;  %5261 = vmatprep.mubr.bf16.mxu0 %v11184_v15  ;;  %v1380_v1 = vld [vmem:[#allocation6 + $0x638] sm:$0xff] }
 0x286   : > { %5704 = vmatmul.mubr.bf16.gmra.mrb[104].mxu1 %v11183_v40  ;;  %5322 = vmatprep.subr.bf16.mxu0 %v7565_v46  ;;  %v1383_v46 = vld [vmem:[#allocation6 + $0x650] sm:$0xff]  ;;  %v7591_v25 = vcombine.high %v1376_v12, %v1380_v1  ;;  %v1384_v40 = vld [vmem:[#allocation6 + $0x658] sm:$0xff] }
 0x287   : > { %5713 = vmatprep.mubr.bf16.mxu1 %v11184_v15  ;;  %5773 = vmatpush1.bf16.msra.mxu1 %v7558_v49  ;;  %v1387_v49 = vld [vmem:[#allocation6 + $0x670] sm:$0xff] }
 0x288   : > { %5774 = vmatprep.subr.bf16.mxu1 %v7567_v35  ;;  %v1388_v35 = vld [vmem:[#allocation6 + $0x678] sm:$0xff]  ;;  %v7597_v15 = vcombine.high %v1383_v46, %v1387_v49  ;;  %v7596_v22 = vcombine.low %v1383_v46, %v1387_v49 }
 0x289   : > { %5323 = vmatpush1.bf16.msra.mxu0 %v7564_v34  ;;  %v7590_v34 = vcombine.low %v1376_v12, %v1380_v1  ;;  %v7598_v27 = vcombine.low %v1384_v40, %v1388_v35  ;;  %v1407_v12 = vld [vmem:[#allocation6 + $0x710] sm:$0xff] }
 0x28a   : > { %5324 = vmatprep.subr.bf16.mxu0 %v7573_v8  ;;  %v11187_v8 = vld [vmem:[#allocation29_spill] sm:$0xff]  ;;  %v11190_v46 = vld [vmem:[#allocation38_spill] sm:$0xff] }
 0x28b   : > { %5775 = vmatpush1.bf16.msra.mxu1 %v7566_v41  ;;  %v7599_v41 = vcombine.high %v1384_v40, %v1388_v35  ;;  %v1411_v1 = vld [vmem:[#allocation6 + $0x730] sm:$0xff] }
 0x28c   : > { %5262 = vmatmul.mubr.bf16.gmra.mrb[108].mxu0 %v11185_v60  ;;  %5776 = vmatprep.subr.bf16.mxu1 %v7575_v26  ;;  %v1392_v26 = vld [vmem:[#allocation6 + $0x698] sm:$0xff]  ;;  %v7621_v40 = vcombine.high %v1407_v12, %v1411_v1  ;;  %v7620_v55 = vcombine.low %v1407_v12, %v1411_v1 }
 0x28d   : > { %5325 = vmatpush1.bf16.msra.mxu0 %v7572_v50  ;;  %5271 = vmatprep.mubr.bf16.mxu0 %v11186_v42  ;;  %v1396_v50 = vld [vmem:[#allocation6 + $0x6b8] sm:$0xff] }
 0x28e   : > { %5714 = vmatmul.mubr.bf16.gmra.mrb[108].mxu1 %v11185_v60  ;;  %5326 = vmatprep.subr.bf16.mxu0 %v7581_v31  ;;  %v1399_v31 = vld [vmem:[#allocation6 + $0x6d0] sm:$0xff]  ;;  %v7607_v51 = vcombine.high %v1392_v26, %v1396_v50  ;;  %v1400_v60 = vld [vmem:[#allocation6 + $0x6d8] sm:$0xff] }
 0x28f   : > { %5723 = vmatprep.mubr.bf16.mxu1 %v11186_v42  ;;  %5777 = vmatpush1.bf16.msra.mxu1 %v7574_v56  ;;  %v1403_v56 = vld [vmem:[#allocation6 + $0x6f0] sm:$0xff] }
 0x290   : > { %5778 = vmatprep.subr.bf16.mxu1 %v7583_v24  ;;  %v1404_v24 = vld [vmem:[#allocation6 + $0x6f8] sm:$0xff]  ;;  %v7613_v42 = vcombine.high %v1399_v31, %v1403_v56  ;;  %v7612_v49 = vcombine.low %v1399_v31, %v1403_v56 }
 0x291   : > { %5327 = vmatpush1.bf16.msra.mxu0 %v7580_v13  ;;  %v7606_v13 = vcombine.low %v1392_v26, %v1396_v50  ;;  %v7614_v35 = vcombine.low %v1400_v60, %v1404_v24  ;;  %v1423_v26 = vld [vmem:[#allocation6 + $0x790] sm:$0xff] }
 0x292   : > { %5328 = vmatprep.subr.bf16.mxu0 %v7589_v21  ;;  %v11189_v21 = vld [vmem:[#allocation33_spill] sm:$0xff]  ;;  %v11192_v31 = vld [vmem:[#allocation42_spill] sm:$0xff] }
 0x293   : > { %5779 = vmatpush1.bf16.msra.mxu1 %v7582_v43  ;;  %v7615_v43 = vcombine.high %v1400_v60, %v1404_v24  ;;  %v1427_v50 = vld [vmem:[#allocation6 + $0x7b0] sm:$0xff] }
 0x294   : > { %5272 = vmatmul.mubr.bf16.gmra.mrb[112].mxu0 %v11187_v8  ;;  %5780 = vmatprep.subr.bf16.mxu1 %v7591_v25  ;;  %v1408_v25 = vld [vmem:[#allocation6 + $0x718] sm:$0xff]  ;;  %v7637_v60 = vcombine.high %v1423_v26, %v1427_v50  ;;  %v7636_v1 = vcombine.low %v1423_v26, %v1427_v50 }
 0x295   : > { %5329 = vmatpush1.bf16.msra.mxu0 %v7588_v17  ;;  %5281 = vmatprep.mubr.bf16.mxu0 %v11188_v47  ;;  %v1412_v17 = vld [vmem:[#allocation6 + $0x738] sm:$0xff] }
 0x296   : > { %5724 = vmatmul.mubr.bf16.gmra.mrb[112].mxu1 %v11187_v8  ;;  %5330 = vmatprep.subr.bf16.mxu0 %v7597_v15  ;;  %v1415_v15 = vld [vmem:[#allocation6 + $0x750] sm:$0xff]  ;;  %v7623_v14 = vcombine.high %v1408_v25, %v1412_v17  ;;  %v1416_v8 = vld [vmem:[#allocation6 + $0x758] sm:$0xff] }
 0x297   : > { %5733 = vmatprep.mubr.bf16.mxu1 %v11188_v47  ;;  %5781 = vmatpush1.bf16.msra.mxu1 %v7590_v34  ;;  %v1419_v34 = vld [vmem:[#allocation6 + $0x770] sm:$0xff] }
 0x298   : > { %5782 = vmatprep.subr.bf16.mxu1 %v7599_v41  ;;  %v1420_v41 = vld [vmem:[#allocation6 + $0x778] sm:$0xff]  ;;  %v7629_v47 = vcombine.high %v1415_v15, %v1419_v34  ;;  %v7628_v56 = vcombine.low %v1415_v15, %v1419_v34  ;;  %v11194_v15 = vld [vmem:[#allocation16_spill] sm:$0xff] }
 0x299   : > { %5331 = vmatpush1.bf16.msra.mxu0 %v7596_v22  ;;  %v7622_v22 = vcombine.low %v1408_v25, %v1412_v17  ;;  %v7630_v24 = vcombine.low %v1416_v8, %v1420_v41  ;;  %v1439_v25 = vld [vmem:[#allocation6 + $0x810] sm:$0xff] }
 0x29a   : > { %5332 = vmatprep.subr.bf16.mxu0 %v7605_v11  ;;  %v11191_v11 = vld [vmem:[#allocation37_spill] sm:$0xff] }
 0x29b   : > { %5783 = vmatpush1.bf16.msra.mxu1 %v7598_v27  ;;  %v7631_v27 = vcombine.high %v1416_v8, %v1420_v41  ;;  %v1443_v17 = vld [vmem:[#allocation6 + $0x830] sm:$0xff] }
 0x29c   : > { %5282 = vmatmul.mubr.bf16.gmra.mrb[116].mxu0 %v11189_v21  ;;  %5784 = vmatprep.subr.bf16.mxu1 %v7607_v51  ;;  %v1424_v51 = vld [vmem:[#allocation6 + $0x798] sm:$0xff]  ;;  %v7653_v8 = vcombine.high %v1439_v25, %v1443_v17  ;;  %v7652_v50 = vcombine.low %v1439_v25, %v1443_v17 }
 0x29d   : > { %5333 = vmatpush1.bf16.msra.mxu0 %v7604_v9  ;;  %5291 = vmatprep.mubr.bf16.mxu0 %v11190_v46  ;;  %v1428_v9 = vld [vmem:[#allocation6 + $0x7b8] sm:$0xff] }
 0x29e   : > { %5734 = vmatmul.mubr.bf16.gmra.mrb[116].mxu1 %v11189_v21  ;;  %5334 = vmatprep.subr.bf16.mxu0 %v7613_v42  ;;  %v1431_v42 = vld [vmem:[#allocation6 + $0x7d0] sm:$0xff]  ;;  %v7639_v12 = vcombine.high %v1424_v51, %v1428_v9  ;;  %v1432_v21 = vld [vmem:[#allocation6 + $0x7d8] sm:$0xff] }
 0x29f   : > { %5743 = vmatprep.mubr.bf16.mxu1 %v11190_v46  ;;  %5785 = vmatpush1.bf16.msra.mxu1 %v7606_v13  ;;  %v1435_v13 = vld [vmem:[#allocation6 + $0x7f0] sm:$0xff] }
 0x2a0   : > { %5786 = vmatprep.subr.bf16.mxu1 %v7615_v43  ;;  %v1436_v43 = vld [vmem:[#allocation6 + $0x7f8] sm:$0xff]  ;;  %v7645_v46 = vcombine.high %v1431_v42, %v1435_v13  ;;  %v7644_v34 = vcombine.low %v1431_v42, %v1435_v13  ;;  %v11196_v42 = vld [vmem:[#allocation20_spill] sm:$0xff] }
 0x2a1   : > { %5335 = vmatpush1.bf16.msra.mxu0 %v7612_v49  ;;  %v7638_v49 = vcombine.low %v1424_v51, %v1428_v9  ;;  %v7646_v41 = vcombine.low %v1432_v21, %v1436_v43  ;;  %v1455_v51 = vld [vmem:[#allocation6 + $0x890] sm:$0xff] }
 0x2a2   : > { %5336 = vmatprep.subr.bf16.mxu0 %v7621_v40  ;;  %v11193_v40 = vld [vmem:[#allocation41_spill] sm:$0xff] }
 0x2a3   : > { %5787 = vmatpush1.bf16.msra.mxu1 %v7614_v35  ;;  %v7647_v35 = vcombine.high %v1432_v21, %v1436_v43  ;;  %v1459_v9 = vld [vmem:[#allocation6 + $0x8b0] sm:$0xff] }
 0x2a4   : > { %5292 = vmatmul.mubr.bf16.gmra.mrb[120].mxu0 %v11191_v11  ;;  %5788 = vmatprep.subr.bf16.mxu1 %v7623_v14  ;;  %v1440_v14 = vld [vmem:[#allocation6 + $0x818] sm:$0xff]  ;;  %v7669_v21 = vcombine.high %v1455_v51, %v1459_v9  ;;  %v7668_v17 = vcombine.low %v1455_v51, %v1459_v9 }
 0x2a5   : > { %5337 = vmatpush1.bf16.msra.mxu0 %v7620_v55  ;;  %5301 = vmatprep.mubr.bf16.mxu0 %v11192_v31  ;;  %v1444_v55 = vld [vmem:[#allocation6 + $0x838] sm:$0xff] }
 0x2a6   : > { %5744 = vmatmul.mubr.bf16.gmra.mrb[120].mxu1 %v11191_v11  ;;  %5338 = vmatprep.subr.bf16.mxu0 %v7629_v47  ;;  %v1447_v47 = vld [vmem:[#allocation6 + $0x850] sm:$0xff]  ;;  %v7655_v26 = vcombine.high %v1440_v14, %v1444_v55  ;;  %v1448_v11 = vld [vmem:[#allocation6 + $0x858] sm:$0xff] }
 0x2a7   : > { %5753 = vmatprep.mubr.bf16.mxu1 %v11192_v31  ;;  %5789 = vmatpush1.bf16.msra.mxu1 %v7622_v22  ;;  %v1451_v22 = vld [vmem:[#allocation6 + $0x870] sm:$0xff] }
 0x2a8   : > { %5790 = vmatprep.subr.bf16.mxu1 %v7631_v27  ;;  %v1452_v27 = vld [vmem:[#allocation6 + $0x878] sm:$0xff]  ;;  %v7661_v31 = vcombine.high %v1447_v47, %v1451_v22  ;;  %v7660_v13 = vcombine.low %v1447_v47, %v1451_v22  ;;  %v11198_v47 = vld [vmem:[#allocation24_spill] sm:$0xff] }
 0x2a9   : > { %5339 = vmatpush1.bf16.msra.mxu0 %v7628_v56  ;;  %v7654_v56 = vcombine.low %v1440_v14, %v1444_v55  ;;  %v7662_v43 = vcombine.low %v1448_v11, %v1452_v27  ;;  %v1471_v14 = vld [vmem:[#allocation6 + $0x910] sm:$0xff] }
 0x2aa   : > { %5340 = vmatprep.subr.bf16.mxu0 %v7637_v60  ;;  %v11195_v60 = vld [vmem:[#allocation15_spill] sm:$0xff]  ;;  %v1475_v55 = vld [vmem:[#allocation6 + $0x930] sm:$0xff] }
 0x2ab   : > { %5791 = vmatpush1.bf16.msra.mxu1 %v7630_v24  ;;  %v7663_v24 = vcombine.high %v1448_v11, %v1452_v27  ;;  %v7685_v11 = vcombine.high %v1471_v14, %v1475_v55  ;;  %v7684_v9 = vcombine.low %v1471_v14, %v1475_v55 }
 0x2ac   : > { %5302 = vmatmul.mubr.bf16.gmra.mrb[124].mxu0 %v11193_v40  ;;  %5792 = vmatprep.subr.bf16.mxu1 %v7639_v12  ;;  %v1456_v12 = vld [vmem:[#allocation6 + $0x898] sm:$0xff] }
 0x2ad   : > { %5341 = vmatpush1.bf16.msra.mxu0 %v7636_v1  ;;  %5344 = vmatprep.mubr.bf16.mxu0 %v11194_v15  ;;  %v1460_v1 = vld [vmem:[#allocation6 + $0x8b8] sm:$0xff] }
 0x2ae   : > { %5754 = vmatmul.mubr.bf16.gmra.mrb[124].mxu1 %v11193_v40  ;;  %5342 = vmatprep.subr.bf16.mxu0 %v7645_v46  ;;  %v1463_v46 = vld [vmem:[#allocation6 + $0x8d0] sm:$0xff]  ;;  %v7671_v25 = vcombine.high %v1456_v12, %v1460_v1  ;;  %v1464_v40 = vld [vmem:[#allocation6 + $0x8d8] sm:$0xff] }
 0x2af   : > { %5793 = vmatpush1.bf16.msra.mxu1 %v7638_v49  ;;  %5796 = vmatprep.mubr.bf16.mxu1 %v11194_v15  ;;  %v1467_v49 = vld [vmem:[#allocation6 + $0x8f0] sm:$0xff] }
 0x2b0   : > { %5794 = vmatprep.subr.bf16.mxu1 %v7647_v35  ;;  %v1468_v35 = vld [vmem:[#allocation6 + $0x8f8] sm:$0xff]  ;;  %v7677_v15 = vcombine.high %v1463_v46, %v1467_v49  ;;  %v7676_v22 = vcombine.low %v1463_v46, %v1467_v49  ;;  %v11200_v46 = vld [vmem:[#allocation28_spill] sm:$0xff] }
 0x2b1   : > { %5343 = vmatpush1.bf16.msra.mxu0 %v7644_v34  ;;  %v7670_v34 = vcombine.low %v1456_v12, %v1460_v1  ;;  %v7678_v27 = vcombine.low %v1464_v40, %v1468_v35  ;;  %v1487_v12 = vld [vmem:[#allocation6 + $0x990] sm:$0xff] }
 0x2b2   : > { %5425 = vmatprep.subr.bf16.mxu0 %v7653_v8  ;;  %v11197_v8 = vld [vmem:[#allocation19_spill] sm:$0xff]  ;;  %v1491_v1 = vld [vmem:[#allocation6 + $0x9b0] sm:$0xff] }
 0x2b3   : > { %5795 = vmatpush1.bf16.msra.mxu1 %v7646_v41  ;;  %v7679_v41 = vcombine.high %v1464_v40, %v1468_v35  ;;  %v7701_v40 = vcombine.high %v1487_v12, %v1491_v1  ;;  %v7700_v55 = vcombine.low %v1487_v12, %v1491_v1 }
 0x2b4   : > { %5345 = vmatmul.mubr.bf16.vlgmr.msra.gmra.mrb[96].mxu0 %v11195_v60  ;;  %5877 = vmatprep.subr.bf16.mxu1 %v7655_v26  ;;  %v1472_v26 = vld [vmem:[#allocation6 + $0x918] sm:$0xff] }
 0x2b5   : > { %5426 = vmatpush1.bf16.msra.mxu0 %v7652_v50  ;;  %5354 = vmatprep.mubr.bf16.mxu0 %v11196_v42  ;;  %v1476_v50 = vld [vmem:[#allocation6 + $0x938] sm:$0xff] }
 0x2b6   : > { %5797 = vmatmul.mubr.bf16.vlgmr.msra.gmra.mrb[96].mxu1 %v11195_v60  ;;  %5427 = vmatprep.subr.bf16.mxu0 %v7661_v31  ;;  %v1479_v31 = vld [vmem:[#allocation6 + $0x950] sm:$0xff]  ;;  %v7687_v51 = vcombine.high %v1472_v26, %v1476_v50  ;;  %v1480_v60 = vld [vmem:[#allocation6 + $0x958] sm:$0xff] }
 0x2b7   : > { %5806 = vmatprep.mubr.bf16.mxu1 %v11196_v42  ;;  %5878 = vmatpush1.bf16.msra.mxu1 %v7654_v56  ;;  %v1483_v56 = vld [vmem:[#allocation6 + $0x970] sm:$0xff] }
 0x2b8   : > { %5879 = vmatprep.subr.bf16.mxu1 %v7663_v24  ;;  %v1484_v24 = vld [vmem:[#allocation6 + $0x978] sm:$0xff]  ;;  %v7693_v42 = vcombine.high %v1479_v31, %v1483_v56  ;;  %v7692_v49 = vcombine.low %v1479_v31, %v1483_v56  ;;  %v11202_v31 = vld [vmem:[#allocation32_spill] sm:$0xff] }
 0x2b9   : > { %5428 = vmatpush1.bf16.msra.mxu0 %v7660_v13  ;;  %v7686_v13 = vcombine.low %v1472_v26, %v1476_v50  ;;  %v7694_v35 = vcombine.low %v1480_v60, %v1484_v24  ;;  %v1503_v26 = vld [vmem:[#allocation6 + $0xa10] sm:$0xff] }
 0x2ba   : > { %5429 = vmatprep.subr.bf16.mxu0 %v7669_v21  ;;  %v11199_v21 = vld [vmem:[#allocation23_spill] sm:$0xff]  ;;  %v1507_v50 = vld [vmem:[#allocation6 + $0xa30] sm:$0xff] }
 0x2bb   : > { %5880 = vmatpush1.bf16.msra.mxu1 %v7662_v43  ;;  %v7695_v43 = vcombine.high %v1480_v60, %v1484_v24  ;;  %v7717_v60 = vcombine.high %v1503_v26, %v1507_v50  ;;  %v7716_v1 = vcombine.low %v1503_v26, %v1507_v50 }
 0x2bc   : > { %5355 = vmatmul.mubr.bf16.gmra.mrb[100].mxu0 %v11197_v8  ;;  %5881 = vmatprep.subr.bf16.mxu1 %v7671_v25  ;;  %v1488_v25 = vld [vmem:[#allocation6 + $0x998] sm:$0xff] }
 0x2bd   : > { %5430 = vmatpush1.bf16.msra.mxu0 %v7668_v17  ;;  %5364 = vmatprep.mubr.bf16.mxu0 %v11198_v47  ;;  %v1492_v17 = vld [vmem:[#allocation6 + $0x9b8] sm:$0xff] }
 0x2be   : > { %5807 = vmatmul.mubr.bf16.gmra.mrb[100].mxu1 %v11197_v8  ;;  %5431 = vmatprep.subr.bf16.mxu0 %v7677_v15  ;;  %v1495_v15 = vld [vmem:[#allocation6 + $0x9d0] sm:$0xff]  ;;  %v7703_v14 = vcombine.high %v1488_v25, %v1492_v17  ;;  %v1496_v8 = vld [vmem:[#allocation6 + $0x9d8] sm:$0xff] }
 0x2bf   : > { %5816 = vmatprep.mubr.bf16.mxu1 %v11198_v47  ;;  %5882 = vmatpush1.bf16.msra.mxu1 %v7670_v34  ;;  %v1499_v34 = vld [vmem:[#allocation6 + $0x9f0] sm:$0xff] }
 0x2c0   : > { %5883 = vmatprep.subr.bf16.mxu1 %v7679_v41  ;;  %v1500_v41 = vld [vmem:[#allocation6 + $0x9f8] sm:$0xff]  ;;  %v7709_v47 = vcombine.high %v1495_v15, %v1499_v34  ;;  %v7708_v56 = vcombine.low %v1495_v15, %v1499_v34  ;;  %v11204_v15 = vld [vmem:[#allocation36_spill] sm:$0xff] }
 0x2c1   : > { %5432 = vmatpush1.bf16.msra.mxu0 %v7676_v22  ;;  %v7702_v22 = vcombine.low %v1488_v25, %v1492_v17  ;;  %v7710_v24 = vcombine.low %v1496_v8, %v1500_v41  ;;  %v1519_v25 = vld [vmem:[#allocation6 + $0xa90] sm:$0xff] }
 0x2c2   : > { %5433 = vmatprep.subr.bf16.mxu0 %v7685_v11  ;;  %v11201_v11 = vld [vmem:[#allocation27_spill] sm:$0xff]  ;;  %v1523_v17 = vld [vmem:[#allocation6 + $0xab0] sm:$0xff] }
 0x2c3   : > { %5884 = vmatpush1.bf16.msra.mxu1 %v7678_v27  ;;  %v7711_v27 = vcombine.high %v1496_v8, %v1500_v41  ;;  %v7733_v8 = vcombine.high %v1519_v25, %v1523_v17  ;;  %v7732_v50 = vcombine.low %v1519_v25, %v1523_v17 }
 0x2c4   : > { %5365 = vmatmul.mubr.bf16.gmra.mrb[104].mxu0 %v11199_v21  ;;  %5885 = vmatprep.subr.bf16.mxu1 %v7687_v51  ;;  %v1504_v51 = vld [vmem:[#allocation6 + $0xa18] sm:$0xff] }
 0x2c5   : > { %5434 = vmatpush1.bf16.msra.mxu0 %v7684_v9  ;;  %5374 = vmatprep.mubr.bf16.mxu0 %v11200_v46  ;;  %v1508_v9 = vld [vmem:[#allocation6 + $0xa38] sm:$0xff] }
 0x2c6   : > { %5817 = vmatmul.mubr.bf16.gmra.mrb[104].mxu1 %v11199_v21  ;;  %5435 = vmatprep.subr.bf16.mxu0 %v7693_v42  ;;  %v1511_v42 = vld [vmem:[#allocation6 + $0xa50] sm:$0xff]  ;;  %v7719_v12 = vcombine.high %v1504_v51, %v1508_v9  ;;  %v1512_v21 = vld [vmem:[#allocation6 + $0xa58] sm:$0xff] }
 0x2c7   : > { %5826 = vmatprep.mubr.bf16.mxu1 %v11200_v46  ;;  %5886 = vmatpush1.bf16.msra.mxu1 %v7686_v13  ;;  %v1515_v13 = vld [vmem:[#allocation6 + $0xa70] sm:$0xff] }
 0x2c8   : > { %5887 = vmatprep.subr.bf16.mxu1 %v7695_v43  ;;  %v1516_v43 = vld [vmem:[#allocation6 + $0xa78] sm:$0xff]  ;;  %v7725_v46 = vcombine.high %v1511_v42, %v1515_v13  ;;  %v7724_v34 = vcombine.low %v1511_v42, %v1515_v13  ;;  %v11206_v42 = vld [vmem:[#allocation40_spill] sm:$0xff] }
 0x2c9   : > { %5436 = vmatpush1.bf16.msra.mxu0 %v7692_v49  ;;  %v7718_v49 = vcombine.low %v1504_v51, %v1508_v9  ;;  %v7726_v41 = vcombine.low %v1512_v21, %v1516_v43  ;;  %v1535_v51 = vld [vmem:[#allocation6 + $0xb10] sm:$0xff] }
 0x2ca   : > { %5437 = vmatprep.subr.bf16.mxu0 %v7701_v40  ;;  %v11203_v40 = vld [vmem:[#allocation31_spill] sm:$0xff]  ;;  %v1539_v9 = vld [vmem:[#allocation6 + $0xb30] sm:$0xff] }
 0x2cb   : > { %5888 = vmatpush1.bf16.msra.mxu1 %v7694_v35  ;;  %v7727_v35 = vcombine.high %v1512_v21, %v1516_v43  ;;  %v7749_v21 = vcombine.high %v1535_v51, %v1539_v9  ;;  %v7748_v17 = vcombine.low %v1535_v51, %v1539_v9  ;;  %v1560_v9 = vld [vmem:[#allocation6 + $0xbd8] sm:$0xff] }
 0x2cc   : > { %5375 = vmatmul.mubr.bf16.gmra.mrb[108].mxu0 %v11201_v11  ;;  %5889 = vmatprep.subr.bf16.mxu1 %v7703_v14  ;;  %v1520_v14 = vld [vmem:[#allocation6 + $0xa98] sm:$0xff] }
 0x2cd   : > { %5438 = vmatpush1.bf16.msra.mxu0 %v7700_v55  ;;  %5384 = vmatprep.mubr.bf16.mxu0 %v11202_v31  ;;  %v1524_v55 = vld [vmem:[#allocation6 + $0xab8] sm:$0xff] }
 0x2ce   : > { %5827 = vmatmul.mubr.bf16.gmra.mrb[108].mxu1 %v11201_v11  ;;  %5439 = vmatprep.subr.bf16.mxu0 %v7709_v47  ;;  %v1527_v47 = vld [vmem:[#allocation6 + $0xad0] sm:$0xff]  ;;  %v7735_v26 = vcombine.high %v1520_v14, %v1524_v55  ;;  %v1528_v11 = vld [vmem:[#allocation6 + $0xad8] sm:$0xff] }
 0x2cf   : > { %5836 = vmatprep.mubr.bf16.mxu1 %v11202_v31  ;;  %5890 = vmatpush1.bf16.msra.mxu1 %v7702_v22  ;;  %v1531_v22 = vld [vmem:[#allocation6 + $0xaf0] sm:$0xff] }
 0x2d0   : > { %5891 = vmatprep.subr.bf16.mxu1 %v7711_v27  ;;  %v1532_v27 = vld [vmem:[#allocation6 + $0xaf8] sm:$0xff]  ;;  %v7741_v31 = vcombine.high %v1527_v47, %v1531_v22  ;;  %v7740_v13 = vcombine.low %v1527_v47, %v1531_v22 }
 0x2d1   : > { %5440 = vmatpush1.bf16.msra.mxu0 %v7708_v56  ;;  %v7734_v56 = vcombine.low %v1520_v14, %v1524_v55  ;;  %v7742_v43 = vcombine.low %v1528_v11, %v1532_v27  ;;  %v1551_v14 = vld [vmem:[#allocation6 + $0xb90] sm:$0xff]  ;;  %v1552_v22 = vld [vmem:[#allocation6 + $0xb98] sm:$0xff] }
 0x2d2   : > { %5441 = vmatprep.subr.bf16.mxu0 %v7717_v60  ;;  %v11205_v60 = vld [vmem:[#allocation35_spill] sm:$0xff]  ;;  %v1555_v55 = vld [vmem:[#allocation6 + $0xbb0] sm:$0xff] }
 0x2d3   : > { %5892 = vmatpush1.bf16.msra.mxu1 %v7710_v24  ;;  %v7743_v24 = vcombine.high %v1528_v11, %v1532_v27  ;;  %v1559_v27 = vld [vmem:[#allocation6 + $0xbd0] sm:$0xff]  ;;  %v7764_v51 = vcombine.low %v1551_v14, %v1555_v55 }
 0x2d4   : > { %5385 = vmatmul.mubr.bf16.gmra.mrb[112].mxu0 %v11203_v40  ;;  %5893 = vmatprep.subr.bf16.mxu1 %v7719_v12  ;;  %v1536_v12 = vld [vmem:[#allocation6 + $0xb18] sm:$0xff] }
 0x2d5   : > { %5442 = vmatpush1.bf16.msra.mxu0 %v7716_v1  ;;  %5394 = vmatprep.mubr.bf16.mxu0 %v11204_v15  ;;  %v1540_v1 = vld [vmem:[#allocation6 + $0xb38] sm:$0xff] }
 0x2d6   : > { %5837 = vmatmul.mubr.bf16.gmra.mrb[112].mxu1 %v11203_v40  ;;  %5443 = vmatprep.subr.bf16.mxu0 %v7725_v46  ;;  %v1543_v46 = vld [vmem:[#allocation6 + $0xb50] sm:$0xff]  ;;  %v7751_v25 = vcombine.high %v1536_v12, %v1540_v1  ;;  %v1544_v40 = vld [vmem:[#allocation6 + $0xb58] sm:$0xff] }
 0x2d7   : > { %5846 = vmatprep.mubr.bf16.mxu1 %v11204_v15  ;;  %5894 = vmatpush1.bf16.msra.mxu1 %v7718_v49  ;;  %v1547_v49 = vld [vmem:[#allocation6 + $0xb70] sm:$0xff] }
 0x2d8   : > { %5895 = vmatprep.subr.bf16.mxu1 %v7727_v35  ;;  %v1548_v35 = vld [vmem:[#allocation6 + $0xb78] sm:$0xff]  ;;  %v7757_v15 = vcombine.high %v1543_v46, %v1547_v49  ;;  %v7756_v47 = vcombine.low %v1543_v46, %v1547_v49 }
 0x2d9   : > { %5444 = vmatpush1.bf16.msra.mxu0 %v7724_v34  ;;  %v7750_v34 = vcombine.low %v1536_v12, %v1540_v1  ;;  %v7758_v11 = vcombine.low %v1544_v40, %v1548_v35  ;;  %v1571_v12 = vld [vmem:[#allocation6 + $0xc30] sm:$0xff] }
 0x2da   : > { %5445 = vmatprep.subr.bf16.mxu0 %v7733_v8  ;;  %v11207_v8 = vld [vmem:[#allocation39_spill] sm:$0xff] }
 0x2db   : > { %5896 = vmatpush1.bf16.msra.mxu1 %v7726_v41  ;;  %v7759_v41 = vcombine.high %v1544_v40, %v1548_v35 }
 0x2dc   : > { %5395 = vmatmul.mubr.bf16.gmra.mrb[116].mxu0 %v11205_v60  ;;  %5897 = vmatprep.subr.bf16.mxu1 %v7735_v26  ;;  %v1556_v26 = vld [vmem:[#allocation6 + $0xbb8] sm:$0xff] }
 0x2dd   : > { %5446 = vmatpush1.bf16.msra.mxu0 %v7732_v50  ;;  %5404 = vmatprep.mubr.bf16.mxu0 %v11206_v42  ;;  %v7765_v50 = vcombine.high %v1551_v14, %v1555_v55 }
 0x2de   : > { %5847 = vmatmul.mubr.bf16.gmra.mrb[116].mxu1 %v11205_v60  ;;  %5447 = vmatprep.subr.bf16.mxu0 %v7741_v31  ;;  %v1563_v31 = vld [vmem:[#allocation6 + $0xbf0] sm:$0xff]  ;;  %v1564_v60 = vld [vmem:[#allocation6 + $0xbf8] sm:$0xff] }
 0x2df   : > { %5856 = vmatprep.mubr.bf16.mxu1 %v11206_v42  ;;  %5898 = vmatpush1.bf16.msra.mxu1 %v7734_v56  ;;  %v7767_v56 = vcombine.high %v1552_v22, %v1556_v26  ;;  %v7766_v42 = vcombine.low %v1552_v22, %v1556_v26  ;;  %v7772_v1 = vcombine.low %v1559_v27, %v1563_v31  ;;  %v1588_v22 = vld [vmem:[#allocation6 + $0xcb8] sm:$0xff] }
 0x2e0   : > { %5899 = vmatprep.subr.bf16.mxu1 %v7743_v24  ;;  %v7773_v24 = vcombine.high %v1559_v27, %v1563_v31  ;;  %v7774_v49 = vcombine.low %v1560_v9, %v1564_v60  ;;  %v1595_v27 = vld [vmem:[#allocation6 + $0xcf0] sm:$0xff] }
 0x2e1   : > { %5448 = vmatpush1.bf16.msra.mxu0 %v7740_v13  ;;  %v1567_v13 = vld [vmem:[#allocation6 + $0xc10] sm:$0xff] }
 0x2e2   : > { %5449 = vmatprep.subr.bf16.mxu0 %v7749_v21  ;;  %v1568_v21 = vld [vmem:[#allocation6 + $0xc18] sm:$0xff]  ;;  %v7781_v46 = vcombine.high %v1567_v13, %v1571_v12  ;;  %v7780_v35 = vcombine.low %v1567_v13, %v1571_v12 }
 0x2e3   : > { %5900 = vmatpush1.bf16.msra.mxu1 %v7742_v43  ;;  %v1572_v43 = vld [vmem:[#allocation6 + $0xc38] sm:$0xff] }
 0x2e4   : > { %5405 = vmatmul.mubr.bf16.gmra.mrb[120].mxu0 %v11207_v8  ;;  %5901 = vmatprep.subr.bf16.mxu1 %v7751_v25  ;;  %v1575_v25 = vld [vmem:[#allocation6 + $0xc50] sm:$0xff]  ;;  %v7783_v40 = vcombine.high %v1568_v21, %v1572_v43  ;;  %v7782_v55 = vcombine.low %v1568_v21, %v1572_v43  ;;  %v1600_v12 = vld [vmem:[#allocation6 + $0xd18] sm:$0xff] }
 0x2e5   : > { %5450 = vmatpush1.bf16.msra.mxu0 %v7748_v17  ;;  %5414 = vmatprep.mubr.bf16.mxu0 %v9881_v19  ;;  %v1579_v17 = vld [vmem:[#allocation6 + $0xc70] sm:$0xff] }
 0x2e6   : > { %5857 = vmatmul.mubr.bf16.gmra.mrb[120].mxu1 %v11207_v8  ;;  %5451 = vmatprep.subr.bf16.mxu0 %v7757_v15  ;;  %v1576_v15 = vld [vmem:[#allocation6 + $0xc58] sm:$0xff]  ;;  %v7789_v14 = vcombine.high %v1575_v25, %v1579_v17  ;;  %v1583_v8 = vld [vmem:[#allocation6 + $0xc90] sm:$0xff] }
 0x2e7   : > { %5866 = vmatprep.mubr.bf16.mxu1 %v9881_v19  ;;  %5902 = vmatpush1.bf16.msra.mxu1 %v7750_v34  ;;  %v7775_v19 = vcombine.high %v1560_v9, %v1564_v60  ;;  %v1580_v34 = vld [vmem:[#allocation6 + $0xc78] sm:$0xff]  ;;  %v1607_v43 = vld [vmem:[#allocation6 + $0xd50] sm:$0xff] }
 0x2e8   : > { %5903 = vmatprep.subr.bf16.mxu1 %v7759_v41  ;;  %v7791_v41 = vcombine.high %v1576_v15, %v1580_v34  ;;  %v1596_v9 = vld [vmem:[#allocation6 + $0xcf8] sm:$0xff] }
 0x2e9   : > { %5452 = vmatpush1.bf16.msra.mxu0 %v7756_v47  ;;  %v1584_v47 = vld [vmem:[#allocation6 + $0xc98] sm:$0xff] }
 0x2ea   : > { %5453 = vmatprep.subr.bf16.mxu0 %v7765_v50  ;;  %v7790_v50 = vcombine.low %v1576_v15, %v1580_v34  ;;  %v7799_v31 = vcombine.high %v1584_v47, %v1588_v22 }
 0x2eb   : > { %5904 = vmatpush1.bf16.msra.mxu1 %v7758_v11  ;;  %v1591_v11 = vld [vmem:[#allocation6 + $0xcd0] sm:$0xff] }
 0x2ec   : > { %5415 = vmatmul.mubr.bf16.gmra.mrb[124].mxu0 %v9874_v16  ;;  %5905 = vmatprep.subr.bf16.mxu1 %v7767_v56  ;;  %v7805_v60 = vcombine.high %v1591_v11, %v1595_v27  ;;  %v7804_v13 = vcombine.low %v1591_v11, %v1595_v27  ;;  %v1620_v11 = vld [vmem:[#allocation6 + $0xdb8] sm:$0xff] }
 0x2ed   : > { %5454 = vmatpush1.bf16.msra.mxu0 %v7764_v51  ;;  %5457 = vmatprep.mubr.bf16.mxu0 %v9890_v54  ;;  %v1592_v51 = vld [vmem:[#allocation6 + $0xcd8] sm:$0xff] }
 0x2ee   : > { %5867 = vmatmul.mubr.bf16.gmra.mrb[124].mxu1 %v9874_v16  ;;  %5455 = vmatprep.subr.bf16.mxu0 %v7773_v24  ;;  %v1587_v16 = vld [vmem:[#allocation6 + $0xcb0] sm:$0xff]  ;;  %v7798_v24 = vcombine.low %v1584_v47, %v1588_v22  ;;  %v7806_v21 = vcombine.low %v1592_v51, %v1596_v9 }
 0x2ef   : > { %5906 = vmatpush1.bf16.msra.mxu1 %v7766_v42  ;;  %5909 = vmatprep.mubr.bf16.mxu1 %v9890_v54  ;;  %v7788_v54 = vcombine.low %v1575_v25, %v1579_v17  ;;  %v7797_v26 = vcombine.high %v1583_v8, %v1587_v16  ;;  %v7796_v56 = vcombine.low %v1583_v8, %v1587_v16  ;;  %v1599_v42 = vld [vmem:[#allocation6 + $0xd10] sm:$0xff]  ;;  %v1693_v17 = vld [vmem:[#allocation7] sm:$0xff] }
 0x2f0   : > { %5907 = vmatprep.subr.bf16.mxu1 %v7775_v19  ;;  %v1604_v19 = vld [vmem:[#allocation6 + $0xd38] sm:$0xff] }
 0x2f1   : > { %5456 = vmatpush1.bf16.msra.mxu0 %v7772_v1  ;;  %v7814_v34 = vcombine.low %v1600_v12, %v1604_v19 }
 0x2f2   : > { %5538 = vmatprep.subr.bf16.mxu0 %v7781_v46  ;;  %v1611_v46 = vld [vmem:[#allocation6 + $0xd70] sm:$0xff] }
 0x2f3   : > { %5908 = vmatpush1.bf16.msra.mxu1 %v7774_v49  ;;  %v7815_v49 = vcombine.high %v1600_v12, %v1604_v19  ;;  %v7821_v15 = vcombine.high %v1607_v43, %v1611_v46  ;;  %v7820_v47 = vcombine.low %v1607_v43, %v1611_v46  ;;  %v10360_v43 = vld [vmem:[#allocation6 + $0xdf8] sm:$0xff] }
 0x2f4   : > { %5458 = vmatmul.mubr.bf16.vlgmr.msra.gmra.mrb[96].mxu0 %v9885_v63  ;;  %5990 = vmatprep.subr.bf16.mxu1 %v7783_v40  ;;  %v1608_v40 = vld [vmem:[#allocation6 + $0xd58] sm:$0xff] }
 0x2f5   : > { %5539 = vmatpush1.bf16.msra.mxu0 %v7780_v35  ;;  %5467 = vmatprep.mubr.bf16.mxu0 %v9934_v10  ;;  %v1612_v35 = vld [vmem:[#allocation6 + $0xd78] sm:$0xff] }
 0x2f6   : > { %5910 = vmatmul.mubr.bf16.vlgmr.msra.gmra.mrb[96].mxu1 %v9885_v63  ;;  %5540 = vmatprep.subr.bf16.mxu0 %v7789_v14  ;;  %v1603_v63 = vld [vmem:[#allocation6 + $0xd30] sm:$0xff]  ;;  %v7823_v16 = vcombine.high %v1608_v40, %v1612_v35 }
 0x2f7   : > { %5919 = vmatprep.mubr.bf16.mxu1 %v9934_v10  ;;  %5991 = vmatpush1.bf16.msra.mxu1 %v7782_v55  ;;  %v7807_v10 = vcombine.high %v1592_v51, %v1596_v9  ;;  %v7813_v1 = vcombine.high %v1599_v42, %v1603_v63  ;;  %v7812_v25 = vcombine.low %v1599_v42, %v1603_v63  ;;  %v1619_v14 = vld [vmem:[#allocation6 + $0xdb0] sm:$0xff] }
 0x2f8   : > { %5992 = vmatprep.subr.bf16.mxu1 %v7791_v41  ;;  %v7822_v9 = vcombine.low %v1608_v40, %v1612_v35 }
 0x2f9   : > { %5541 = vmatpush1.bf16.msra.mxu0 %v7788_v54 }
 0x2fa   : > { %5542 = vmatprep.subr.bf16.mxu0 %v7797_v26 }
 0x2fb   : > { %5993 = vmatpush1.bf16.msra.mxu1 %v7790_v50  ;;  %v1616_v50 = vld [vmem:[#allocation6 + $0xd98] sm:$0xff] }
 0x2fc   : > { %5468 = vmatmul.mubr.bf16.gmra.mrb[100].mxu0 %v9929_v52  ;;  %5994 = vmatprep.subr.bf16.mxu1 %v7799_v31 }
 0x2fd   : > { %5543 = vmatpush1.bf16.msra.mxu0 %v7796_v56  ;;  %5477 = vmatprep.mubr.bf16.mxu0 %v9978_v39 }
 0x2fe   : > { %5920 = vmatmul.mubr.bf16.gmra.mrb[100].mxu1 %v9929_v52  ;;  %5544 = vmatprep.subr.bf16.mxu0 %v7805_v60  ;;  %v1615_v52 = vld [vmem:[#allocation6 + $0xd90] sm:$0xff] }
 0x2ff   : > { %5929 = vmatprep.mubr.bf16.mxu1 %v9978_v39  ;;  %5995 = vmatpush1.bf16.msra.mxu1 %v7798_v24  ;;  %v11208_v39 = vld [vmem:[#allocation13_spill] sm:$0xff]  ;;  %v7829_v56 = vcombine.high %v1615_v52, %v1619_v14 }
 0x300   : > { %5996 = vmatprep.subr.bf16.mxu1 %v7807_v10  ;;  %v11209_v55 = vsub.s32 0, %v11208_v39  ;;  %v11210_v41 = vsub.s32 2, %v11208_v39  ;;  %v11211_v22 = vsub.s32 1, %v11208_v39  ;;  %v11212_v27 = vsub.s32 3, %v11208_v39  ;;  %v10351_v60 = vld [vmem:[#allocation6 + $0xdd0] sm:$0xff] }
 0x301   : > { %5545 = vmatpush1.bf16.msra.mxu0 %v7804_v13  ;;  %v10353_v24 = vld [vmem:[#allocation6 + $0xdf0] sm:$0xff] }
 0x302   : > { %5546 = vmatprep.subr.bf16.mxu0 %v7813_v1  ;;  %v10334_v8 = vrot.slane %v1693_v17, %v11209_v55  ;;  %v10339_v54 = vrot.slane %v1693_v17, %v11210_v41  ;;  %v10343_v26 = vrot.slane %v1693_v17, %v11211_v22  ;;  %v10348_v31 = vrot.slane %v1693_v17, %v11212_v27  ;;  %v10370_v55 = vld [vmem:[#allocation6 + $0xe10] sm:$0xff] }
 0x303   : > { %5997 = vmatpush1.bf16.msra.mxu1 %v7806_v21  ;;  %v7828_v1 = vcombine.low %v1615_v52, %v1619_v14  ;;  %v10358_v21 = vld [vmem:[#allocation6 + $0xdd8] sm:$0xff]  ;;  %v7837_v40 = vcombine.high %v10351_v60, %v10353_v24  ;;  %v7830_v52 = vcombine.low %v1616_v50, %v1620_v11  ;;  %v7836_v14 = vcombine.low %v10351_v60, %v10353_v24 }
 0x304   : > { %5478 = vmatmul.mubr.bf16.gmra.mrb[104].mxu0 %v9973_v29  ;;  %5998 = vmatprep.subr.bf16.mxu1 %v7815_v49  ;;  %v7839_v27 = vcombine.high %v10358_v21, %v10360_v43  ;;  %v10381_v60 = vld [vmem:[#allocation6 + $0xe38] sm:$0xff] }
 0x305   : > { %5547 = vmatpush1.bf16.msra.mxu0 %v7812_v25  ;;  %5487 = vmatprep.mubr.bf16.mxu0 %v10022_v20 }
 0x306   : > { %5930 = vmatmul.mubr.bf16.gmra.mrb[104].mxu1 %v9973_v29  ;;  %5548 = vmatprep.subr.bf16.mxu0 %v7821_v15  ;;  %v5120_v63 = vpop.f32.mrb[64].mxu1  ;;  %v7831_v29 = vcombine.high %v1616_v50, %v1620_v11 }
 0x307   : > { %5939 = vmatprep.mubr.bf16.mxu1 %v10022_v20  ;;  %5999 = vmatpush1.bf16.msra.mxu1 %v7814_v34  ;;  %v4668_v51 = vpop.f32.mrb[64].mxu0  ;;  %v8259_v13 = vadd.f32 %v5120_v63, %v10339_v54  ;;  %v5122_v19 = vpop.f32.mrb[65].mxu1 }
 0x308   : > { %v8227_v42 = vadd.f32 %v4668_v51, %v10334_v8  ;;  %v4670_v10 = vpop.f32.mrb[65].mxu0  ;;  %6000 = vmatprep.subr.bf16.mxu1 %v7823_v16  ;;  %v8260_v46 = vadd.f32 %v5122_v19, %v10348_v31  ;;  %v5124_v25 = vpop.f32.mrb[66].mxu1  ;;  %v10372_v16 = vld [vmem:[#allocation6 + $0xe30] sm:$0xff]  ;;  %v7838_v19 = vcombine.low %v10358_v21, %v10360_v43 }
 0x309   : > { %v8228_v12 = vadd.f32 %v4670_v10, %v10343_v26  ;;  %5549 = vmatpush1.bf16.msra.mxu0 %v7820_v47  ;;  %v4672_v20 = vpop.f32.mrb[66].mxu0  ;;  %v8261_v35 = vadd.f32 %v5124_v25, %v10339_v54  ;;  %v5126_v34 = vpop.f32.mrb[67].mxu1  ;;  %v7845_v10 = vcombine.high %v10370_v55, %v10372_v16  ;;  %v7844_v43 = vcombine.low %v10370_v55, %v10372_v16 }
 0x30a   : > { %v8229_v49 = vadd.f32 %v4672_v20, %v10334_v8  ;;  %v4674_v17 = vpop.f32.mrb[67].mxu0  ;;  %5550 = vmatprep.subr.bf16.mxu0 %v7829_v56  ;;  %v6103_v41 = vmax.f32 %v8227_v42, 0.0  ;;  %v8262_v22 = vadd.f32 %v5126_v34, %v10348_v31  ;;  %v6105_v56 = vmax.f32 %v8259_v13, 0.0  ;;  %v10395_v20 = vld [vmem:[#allocation6 + $0xe50] sm:$0xff]  ;;  %v10410_v34 = vld [vmem:[#allocation6 + $0xe78] sm:$0xff] }
 0x30b   : > { %6001 = vmatpush1.bf16.msra.mxu1 %v7822_v9  ;;  %v8230_v15 = vadd.f32 %v4674_v17, %v10343_v26  ;;  %v6104_v51 = vmax.f32 %v8228_v12, 0.0  ;;  %v6113_v50 = vmax.f32 %v8261_v35, 0.0  ;;  %v10379_v9 = vld [vmem:[#allocation6 + $0xe18] sm:$0xff]  ;;  %v6106_v24 = vmax.f32 %v8260_v46, 0.0 }
 0x30c   : > { %v6111_v47 = vmax.f32 %v8229_v49, 0.0  ;;  %5488 = vmatmul.mubr.bf16.gmra.mrb[108].mxu0 %v10017_v32  ;;  %6002 = vmatprep.subr.bf16.mxu1 %v7831_v29  ;;  %v6114_v63 = vmax.f32 %v8262_v22, 0.0  ;;  %v7847_v17 = vcombine.high %v10379_v9, %v10381_v60  ;;  %v7846_v16 = vcombine.low %v10379_v9, %v10381_v60 }
 0x30d   : > { %v6112_v11 = vmax.f32 %v8230_v15, 0.0  ;;  %5551 = vmatpush1.bf16.msra.mxu0 %v7828_v1  ;;  %5497 = vmatprep.mubr.bf16.mxu0 %v10066_v30  ;;  %v10388_v29 = vpack.c.bf16 %v6113_v50, %v6105_v56  ;;  %v10397_v1 = vld [vmem:[#allocation6 + $0xe70] sm:$0xff]  ;;  %v10408_v15 = vld [vmem:[#allocation6 + $0xe58] sm:$0xff] }
 0x30e   : > { %v10383_v42 = vpack.c.bf16 %v6111_v47, %v6103_v41  ;;  %5940 = vmatmul.mubr.bf16.gmra.mrb[108].mxu1 %v10017_v32  ;;  %5552 = vmatprep.subr.bf16.mxu0 %v7837_v40  ;;  %v10399_v32 = vpack.c.bf16 %v6114_v63, %v6106_v24  ;;  %v5130_v49 = vpop.f32.mrb[68].mxu1  ;;  %v10422_v50 = vld [vmem:[#allocation6 + $0xe90] sm:$0xff] }
 0x30f   : > { %v10390_v13 = vpack.c.bf16 %v6112_v11, %v6104_v51  ;;  %5949 = vmatprep.mubr.bf16.mxu1 %v10066_v30  ;;  %6003 = vmatpush1.bf16.msra.mxu1 %v7830_v52  ;;  %v4678_v12 = vpop.f32.mrb[68].mxu0  ;;  %v8263_v30 = vadd.f32 %v5130_v49, %v10339_v54  ;;  %v5132_v35 = vpop.f32.mrb[69].mxu1  ;;  %v7852_v51 = vcombine.low %v10395_v20, %v10397_v1  ;;  %v10424_v11 = vld [vmem:[#allocation6 + $0xeb0] sm:$0xff] }
 0x310   : > { %v8231_v46 = vadd.f32 %v4678_v12, %v10334_v8  ;;  %v4680_v25 = vpop.f32.mrb[69].mxu0  ;;  %6004 = vmatprep.subr.bf16.mxu1 %v7839_v27  ;;  %v8264_v52 = vadd.f32 %v5132_v35, %v10348_v31  ;;  %v5134_v47 = vpop.f32.mrb[70].mxu1  ;;  %v7853_v27 = vcombine.high %v10395_v20, %v10397_v1  ;;  %v7855_v12 = vcombine.high %v10408_v15, %v10410_v34  ;;  %v10431_v20 = vld [vmem:[#allocation6 + $0xe98] sm:$0xff] }
 0x311   : > { %v8232_v40 = vadd.f32 %v4680_v25, %v10343_v26  ;;  %5553 = vmatpush1.bf16.msra.mxu0 %v7836_v14  ;;  %v4682_v21 = vpop.f32.mrb[70].mxu0  ;;  %v8265_v14 = vadd.f32 %v5134_v47, %v10339_v54  ;;  %v5136_v55 = vpop.f32.mrb[71].mxu1  ;;  %v10433_v1 = vld [vmem:[#allocation6 + $0xeb8] sm:$0xff] }
 0x312   : > { %v8233_v41 = vadd.f32 %v4682_v21, %v10334_v8  ;;  %v4684_v22 = vpop.f32.mrb[71].mxu0  ;;  %5554 = vmatprep.subr.bf16.mxu0 %v7845_v10  ;;  %v6119_v24 = vmax.f32 %v8231_v46, 0.0  ;;  %v8266_v10 = vadd.f32 %v5136_v55, %v10348_v31  ;;  %v6122_v46 = vmax.f32 %v8264_v52, 0.0  ;;  %v10447_v52 = vld [vmem:[#allocation6 + $0xed0] sm:$0xff] }
 0x313   : > { %6005 = vmatpush1.bf16.msra.mxu1 %v7838_v19  ;;  %v8234_v56 = vadd.f32 %v4684_v22, %v10343_v26  ;;  %v6121_v19 = vmax.f32 %v8263_v30, 0.0  ;;  %v6120_v49 = vmax.f32 %v8232_v40, 0.0  ;;  %v6129_v9 = vmax.f32 %v8265_v14, 0.0 }
 0x314   : > { %v6127_v63 = vmax.f32 %v8233_v41, 0.0  ;;  %5498 = vmatmul.mubr.bf16.gmra.mrb[112].mxu0 %v10061_v2  ;;  %6006 = vmatprep.subr.bf16.mxu1 %v7847_v17  ;;  %v6130_v35 = vmax.f32 %v8266_v10, 0.0  ;;  %v7861_v17 = vcombine.high %v10422_v50, %v10424_v11  ;;  %v10449_v41 = vld [vmem:[#allocation6 + $0xef0] sm:$0xff]  ;;  %v7863_v14 = vcombine.high %v10431_v20, %v10433_v1 }
 0x315   : > { %v6128_v60 = vmax.f32 %v8234_v56, 0.0  ;;  %5555 = vmatpush1.bf16.msra.mxu0 %v7844_v43  ;;  %5507 = vmatprep.mubr.bf16.mxu0 %v10110_v53  ;;  %v10440_v30 = vpack.c.bf16 %v6129_v9, %v6121_v19  ;;  %v7854_v43 = vcombine.low %v10408_v15, %v10410_v34  ;;  %v7860_v34 = vcombine.low %v10422_v50, %v10424_v11 }
 0x316   : > { %v10435_v25 = vpack.c.bf16 %v6127_v63, %v6119_v24  ;;  %5950 = vmatmul.mubr.bf16.gmra.mrb[112].mxu1 %v10061_v2  ;;  %5556 = vmatprep.subr.bf16.mxu0 %v7853_v27  ;;  %v10451_v2 = vpack.c.bf16 %v6130_v35, %v6122_v46  ;;  %v5140_v22 = vpop.f32.mrb[72].mxu1  ;;  %v10462_v24 = vld [vmem:[#allocation6 + $0xef8] sm:$0xff]  ;;  %v7862_v11 = vcombine.low %v10431_v20, %v10433_v1  ;;  %v10474_v46 = vld [vmem:[#allocation6 + $0xf10] sm:$0xff] }
 0x317   : > { %v10442_v40 = vpack.c.bf16 %v6128_v60, %v6120_v49  ;;  %5959 = vmatprep.mubr.bf16.mxu1 %v10110_v53  ;;  %6007 = vmatpush1.bf16.msra.mxu1 %v7846_v16  ;;  %v4688_v21 = vpop.f32.mrb[72].mxu0  ;;  %v8267_v53 = vadd.f32 %v5140_v22, %v10339_v54  ;;  %v5142_v55 = vpop.f32.mrb[73].mxu1  ;;  %v10460_v16 = vld [vmem:[#allocation6 + $0xed8] sm:$0xff]  ;;  %v7869_v49 = vcombine.high %v10447_v52, %v10449_v41  ;;  %v10476_v35 = vld [vmem:[#allocation6 + $0xf30] sm:$0xff] }
 0x318   : > { %v8235_v47 = vadd.f32 %v4688_v21, %v10334_v8  ;;  %v4690_v27 = vpop.f32.mrb[73].mxu0  ;;  %6008 = vmatprep.subr.bf16.mxu1 %v7855_v12  ;;  %v8268_v63 = vadd.f32 %v5142_v55, %v10348_v31  ;;  %v5144_v12 = vpop.f32.mrb[74].mxu1  ;;  %v7868_v60 = vcombine.low %v10447_v52, %v10449_v41  ;;  %v10483_v52 = vld [vmem:[#allocation6 + $0xf18] sm:$0xff] }
 0x319   : > { %v8236_v56 = vadd.f32 %v4690_v27, %v10343_v26  ;;  %5557 = vmatpush1.bf16.msra.mxu0 %v7852_v51  ;;  %v4692_v15 = vpop.f32.mrb[74].mxu0  ;;  %v8269_v51 = vadd.f32 %v5144_v12, %v10339_v54  ;;  %v5146_v50 = vpop.f32.mrb[75].mxu1  ;;  %v6137_v27 = vmax.f32 %v8267_v53, 0.0  ;;  %v10485_v41 = vld [vmem:[#allocation6 + $0xf38] sm:$0xff]  ;;  %v10499_v12 = vld [vmem:[#allocation6 + $0xf50] sm:$0xff] }
 0x31a   : > { %v8237_v10 = vadd.f32 %v4692_v15, %v10334_v8  ;;  %v4694_v19 = vpop.f32.mrb[75].mxu0  ;;  %5558 = vmatprep.subr.bf16.mxu0 %v7861_v17  ;;  %v6135_v17 = vmax.f32 %v8235_v47, 0.0  ;;  %v8270_v22 = vadd.f32 %v5146_v50, %v10348_v31  ;;  %v6138_v47 = vmax.f32 %v8268_v63, 0.0 }
 0x31b   : > { %6009 = vmatpush1.bf16.msra.mxu1 %v7854_v43  ;;  %v8238_v9 = vadd.f32 %v4694_v19, %v10343_v26  ;;  %v7871_v43 = vcombine.high %v10460_v16, %v10462_v24  ;;  %v6136_v55 = vmax.f32 %v8236_v56, 0.0  ;;  %v6145_v20 = vmax.f32 %v8269_v51, 0.0  ;;  %v10501_v19 = vld [vmem:[#allocation6 + $0xf70] sm:$0xff] }
 0x31c   : > { %v6143_v21 = vmax.f32 %v8237_v10, 0.0  ;;  %5508 = vmatmul.mubr.bf16.gmra.mrb[116].mxu0 %v10105_v62  ;;  %6010 = vmatprep.subr.bf16.mxu1 %v7863_v14  ;;  %v6146_v10 = vmax.f32 %v8270_v22, 0.0  ;;  %v7877_v14 = vcombine.high %v10474_v46, %v10476_v35  ;;  %v7870_v63 = vcombine.low %v10460_v16, %v10462_v24  ;;  %v10514_v22 = vld [vmem:[#allocation6 + $0xf78] sm:$0xff] }
 0x31d   : > { %v6144_v1 = vmax.f32 %v8238_v9, 0.0  ;;  %5559 = vmatpush1.bf16.msra.mxu0 %v7860_v34  ;;  %5517 = vmatprep.mubr.bf16.mxu0 %v10154_v7  ;;  %v10492_v53 = vpack.c.bf16 %v6145_v20, %v6137_v27  ;;  %v7879_v50 = vcombine.high %v10483_v52, %v10485_v41  ;;  %v7876_v24 = vcombine.low %v10474_v46, %v10476_v35 }
 0x31e   : > { %v10487_v15 = vpack.c.bf16 %v6143_v21, %v6135_v17  ;;  %5960 = vmatmul.mubr.bf16.gmra.mrb[116].mxu1 %v10105_v62  ;;  %5560 = vmatprep.subr.bf16.mxu0 %v7869_v49  ;;  %v10503_v62 = vpack.c.bf16 %v6146_v10, %v6138_v47  ;;  %v5150_v51 = vpop.f32.mrb[76].mxu1  ;;  %v10512_v21 = vld [vmem:[#allocation6 + $0xf58] sm:$0xff]  ;;  %v7878_v35 = vcombine.low %v10483_v52, %v10485_v41 }
 0x31f   : > { %v10494_v56 = vpack.c.bf16 %v6144_v1, %v6136_v55  ;;  %5969 = vmatprep.mubr.bf16.mxu1 %v10154_v7  ;;  %6011 = vmatpush1.bf16.msra.mxu1 %v7862_v11  ;;  %v4698_v34 = vpop.f32.mrb[76].mxu0  ;;  %v8271_v7 = vadd.f32 %v5150_v51, %v10339_v54  ;;  %v5152_v17 = vpop.f32.mrb[77].mxu1  ;;  %v7885_v1 = vcombine.high %v10499_v12, %v10501_v19  ;;  %v10528_v51 = vld [vmem:[#allocation6 + $0xfb0] sm:$0xff] }
 0x320   : > { %v8239_v49 = vadd.f32 %v4698_v34, %v10334_v8  ;;  %v4700_v9 = vpop.f32.mrb[77].mxu0  ;;  %6012 = vmatprep.subr.bf16.mxu1 %v7871_v43  ;;  %v8272_v27 = vadd.f32 %v5152_v17, %v10348_v31  ;;  %v5154_v55 = vpop.f32.mrb[78].mxu1  ;;  %v7884_v10 = vcombine.low %v10499_v12, %v10501_v19  ;;  %v10526_v34 = vld [vmem:[#allocation6 + $0xf90] sm:$0xff]  ;;  %v1680_v12 = vld [vmem:[#allocation6 + $0xf98] sm:$0xff] }
 0x321   : > { %v8240_v11 = vadd.f32 %v4700_v9, %v10343_v26  ;;  %5561 = vmatpush1.bf16.msra.mxu0 %v7868_v60  ;;  %v4702_v16 = vpop.f32.mrb[78].mxu0  ;;  %v8273_v60 = vadd.f32 %v5154_v55, %v10339_v54  ;;  %v5156_v46 = vpop.f32.mrb[79].mxu1  ;;  %v1684_v19 = vld [vmem:[#allocation6 + $0xfb8] sm:$0xff] }
 0x322   : > { %v8241_v43 = vadd.f32 %v4702_v16, %v10334_v8  ;;  %v4704_v20 = vpop.f32.mrb[79].mxu0  ;;  %5562 = vmatprep.subr.bf16.mxu0 %v7877_v14  ;;  %v6151_v14 = vmax.f32 %v8239_v49, 0.0  ;;  %v8274_v17 = vadd.f32 %v5156_v46, %v10348_v31  ;;  %v6153_v16 = vmax.f32 %v8271_v7, 0.0 }
 0x323   : > { %6013 = vmatpush1.bf16.msra.mxu1 %v7870_v63  ;;  %v8242_v47 = vadd.f32 %v4704_v20, %v10343_v26  ;;  %v7887_v63 = vcombine.high %v10512_v21, %v10514_v22  ;;  %v6152_v55 = vmax.f32 %v8240_v11, 0.0  ;;  %v6161_v52 = vmax.f32 %v8273_v60, 0.0  ;;  %v1691_v60 = vld [vmem:[#allocation6 + $0xff0] sm:$0xff] }
 0x324   : > { %v6159_v9 = vmax.f32 %v8241_v43, 0.0  ;;  %5518 = vmatmul.mubr.bf16.gmra.mrb[120].mxu0 %v10149_v59  ;;  %6014 = vmatprep.subr.bf16.mxu1 %v7879_v50  ;;  %v6154_v20 = vmax.f32 %v8272_v27, 0.0  ;;  %v6162_v43 = vmax.f32 %v8274_v17, 0.0  ;;  %v7893_v50 = vcombine.high %v10526_v34, %v10528_v51  ;;  %v1687_v27 = vld [vmem:[#allocation6 + $0xfd0] sm:$0xff] }
 0x325   : > { %v6160_v41 = vmax.f32 %v8242_v47, 0.0  ;;  %5563 = vmatpush1.bf16.msra.mxu0 %v7876_v24  ;;  %5527 = vmatprep.mubr.bf16.mxu0 %v10182_v3  ;;  %v10540_v46 = vpack.c.bf16 %v6161_v52, %v6153_v16  ;;  %v7886_v24 = vcombine.low %v10512_v21, %v10514_v22  ;;  %v7892_v21 = vcombine.low %v10526_v34, %v10528_v51  ;;  %v1688_v22 = vld [vmem:[#allocation6 + $0xfd8] sm:$0xff] }
 0x326   : > { %v10535_v49 = vpack.c.bf16 %v6159_v9, %v6151_v14  ;;  %5970 = vmatmul.mubr.bf16.gmra.mrb[120].mxu1 %v10149_v59  ;;  %5564 = vmatprep.subr.bf16.mxu0 %v7885_v1  ;;  %v10547_v47 = vpack.c.bf16 %v6162_v43, %v6154_v20  ;;  %v5160_v1 = vpop.f32.mrb[80].mxu1  ;;  %v7895_v9 = vcombine.high %v1680_v12, %v1684_v19 }
 0x327   : > { %11214 = vst [vmem:[#allocation18_spill] sm:$0xff] %v10540_v46  ;;  %v10542_v7 = vpack.c.bf16 %v6160_v41, %v6152_v55  ;;  %5979 = vmatprep.mubr.bf16.mxu1 %v10182_v3  ;;  %6015 = vmatpush1.bf16.msra.mxu1 %v7878_v35  ;;  %v4708_v11 = vpop.f32.mrb[80].mxu0  ;;  %v8275_v17 = vadd.f32 %v5160_v1, %v10339_v54  ;;  %v5162_v3 = vpop.f32.mrb[81].mxu1  ;;  %v1692_v55 = vld [vmem:[#allocation6 + $0xff8] sm:$0xff] }
 0x328   : > { %11213 = vst [vmem:[#allocation14_spill] sm:$0xff] %v10535_v49  ;;  %11215 = vst [vmem:[#allocation17_spill] sm:$0xff] %v10547_v47  ;;  %v8243_v59 = vadd.f32 %v4708_v11, %v10334_v8  ;;  %v4710_v14 = vpop.f32.mrb[81].mxu0  ;;  %6016 = vmatprep.subr.bf16.mxu1 %v7887_v63  ;;  %v8276_v52 = vadd.f32 %v5162_v3, %v10348_v31  ;;  %v5164_v20 = vpop.f32.mrb[82].mxu1  ;;  %v7901_v63 = vcombine.high %v1687_v27, %v1691_v60 }
 0x329   : > { %v8244_v16 = vadd.f32 %v4710_v14, %v10343_v26  ;;  %5565 = vmatpush1.bf16.msra.mxu0 %v7884_v10  ;;  %v4712_v35 = vpop.f32.mrb[82].mxu0  ;;  %v8277_v11 = vadd.f32 %v5164_v20, %v10339_v54  ;;  %v5166_v10 = vpop.f32.mrb[83].mxu1  ;;  %v7894_v14 = vcombine.low %v1680_v12, %v1684_v19  ;;  %v7900_v39 = vcombine.low %v1687_v27, %v1691_v60  ;;  %v8801_v19 = vld [vmem:[%s11066_s5 + $0x40] sm:$0xff]  }
 0x32a   : > { %v8245_v41 = vadd.f32 %v4712_v35, %v10334_v8  ;;  %v4714_v43 = vpop.f32.mrb[83].mxu0  ;;  %5566 = vmatprep.subr.bf16.mxu0 %v7893_v50  ;;  %v6167_v46 = vmax.f32 %v8243_v59, 0.0  ;;  %v8278_v51 = vadd.f32 %v5166_v10, %v10348_v31  ;;  %v7903_v3 = vcombine.high %v1688_v22, %v1692_v55 }
 0x32b   : > { %6017 = vmatpush1.bf16.msra.mxu1 %v7886_v24  ;;  %v8246_v1 = vadd.f32 %v4714_v43, %v10343_v26  ;;  %v6169_v35 = vmax.f32 %v8275_v17, 0.0  ;;  %v6168_v49 = vmax.f32 %v8244_v16, 0.0  ;;  %v6177_v50 = vmax.f32 %v8277_v11, 0.0  ;;  %v8805_v11 = vld [vmem:[%s11066_s5 + $0x48] sm:$0xff]  }
 0x32c   : > { %v6175_v34 = vmax.f32 %v8245_v41, 0.0  ;;  %5528 = vmatmul.mubr.bf16.gmra.mrb[124].mxu0 %v10179_v4  ;;  %6018 = vmatprep.subr.bf16.mxu1 %v7895_v9  ;;  %v6170_v24 = vmax.f32 %v8276_v52, 0.0  ;;  %v6178_v12 = vmax.f32 %v8278_v51, 0.0  ;;  %v7902_v9 = vcombine.low %v1688_v22, %v1692_v55  ;;  %v8803_v22 = vld [vmem:[%s11066_s5] sm:$0xff]  }
 0x32d   : > { %v6176_v47 = vmax.f32 %v8246_v1, 0.0  ;;  %5567 = vmatpush1.bf16.msra.mxu0 %v7892_v21  ;;  %5570 = vmatprep.mubr.bf16.mxu0 %v9925_v61  ;;  %v10567_v27 = vpack.c.bf16 %v6177_v50, %v6169_v35  ;;  %v8802_v21 = vld [vmem:[%s11066_s5 + $0xc0] sm:$0xff]   ;;  %v8806_v35 = vld [vmem:[%s11066_s5 + $0xc8] sm:$0xff]  }
 0x32e   : > { %v10561_v20 = vpack.c.bf16 %v6175_v34, %v6167_v46  ;;  %5980 = vmatmul.mubr.bf16.gmra.mrb[124].mxu1 %v10179_v4  ;;  %5568 = vmatprep.subr.bf16.mxu0 %v7901_v63  ;;  %v10572_v17 = vpack.c.bf16 %v6178_v12, %v6170_v24  ;;  %v5170_v16 = vpop.f32.mrb[84].mxu1 }
 0x32f   : > { %v10569_v60 = vpack.c.bf16 %v6176_v47, %v6168_v49  ;;  %6019 = vmatpush1.bf16.msra.mxu1 %v7894_v14  ;;  %6022 = vmatprep.mubr.bf16.mxu1 %v9925_v61  ;;  %v4718_v59 = vpop.f32.mrb[84].mxu0  ;;  %v8279_v52 = vadd.f32 %v5170_v16, %v10339_v54  ;;  %v5172_v47 = vpop.f32.mrb[85].mxu1  ;;  %v8804_v14 = vld [vmem:[%s11066_s5 + $0x80] sm:$0xff]  }
 0x330   : > { %v8247_v46 = vadd.f32 %v4718_v59, %v10334_v8  ;;  %v4720_v4 = vpop.f32.mrb[85].mxu0  ;;  %6020 = vmatprep.subr.bf16.mxu1 %v7903_v3  ;;  %v8280_v55 = vadd.f32 %v5172_v47, %v10348_v31  ;;  %v5174_v43 = vpop.f32.mrb[86].mxu1  ;;  %v8807_v59 = vld [vmem:[%s11066_s5 + $0x8] sm:$0xff]  }
 0x331   : > { %v8248_v49 = vadd.f32 %v4720_v4, %v10343_v26  ;;  %5569 = vmatpush1.bf16.msra.mxu0 %v7900_v39  ;;  %v4722_v61 = vpop.f32.mrb[86].mxu0  ;;  %v8281_v1 = vadd.f32 %v5174_v43, %v10339_v54  ;;  %v5176_v10 = vpop.f32.mrb[87].mxu1  ;;  %v6185_v50 = vmax.f32 %v8279_v52, 0.0  ;;  %v8809_v4 = vld [vmem:[%s11066_s5 + $0x50] sm:$0xff]   ;;  %v8808_v47 = vld [vmem:[%s11066_s5 + $0x88] sm:$0xff]  }
 0x332   : > { %v8249_v41 = vadd.f32 %v4722_v61, %v10334_v8  ;;  %v4724_v63 = vpop.f32.mrb[87].mxu0  ;;  %7971 = vmatprep.subr.bf16.mxu0 %v8801_v19  ;;  %v6183_v34 = vmax.f32 %v8247_v46, 0.0  ;;  %v8282_v3 = vadd.f32 %v5176_v10, %v10348_v31 }
 0x333   : > { %6021 = vmatpush1.bf16.msra.mxu1 %v7902_v9  ;;  %v8250_v39 = vadd.f32 %v4724_v63, %v10343_v26  ;;  %v6184_v24 = vmax.f32 %v8248_v49, 0.0  ;;  %v6193_v12 = vmax.f32 %v8281_v1, 0.0  ;;  %v6186_v9 = vmax.f32 %v8280_v55, 0.0  ;;  %v8811_v1 = vld [vmem:[%s11066_s5 + $0x10] sm:$0xff]  }
 0x334   : > { %v6191_v51 = vmax.f32 %v8249_v41, 0.0  ;;  %5571 = vmatmul.mubr.bf16.vlgmr.msra.gmra.mrb[96].mxu0 %v9918_v5  ;;  %8035 = vmatprep.subr.bf16.mxu1 %v8802_v21  ;;  %v6194_v16 = vmax.f32 %v8282_v3, 0.0  ;;  %v8810_v41 = vld [vmem:[%s11066_s5 + $0xd0] sm:$0xff]  }
 0x335   : > { %v6192_v19 = vmax.f32 %v8250_v39, 0.0  ;;  %5580 = vmatprep.mubr.bf16.mxu0 %v9969_v38  ;;  %7972 = vmatpush3.bf16.msra.mxu0 %v8803_v22  ;;  %v10608_v21 = vpack.c.bf16 %v6193_v12, %v6185_v50 }
 0x336   : > { %v10602_v46 = vpack.c.bf16 %v6191_v51, %v6183_v34  ;;  %6023 = vmatmul.mubr.bf16.vlgmr.msra.gmra.mrb[96].mxu1 %v9918_v5  ;;  %7973 = vmatprep.subr.bf16.mxu0 %v8805_v11  ;;  %v10616_v61 = vpack.c.bf16 %v6194_v16, %v6186_v9  ;;  %v5180_v22 = vpop.f32.mrb[88].mxu1  ;;  %v8813_v51 = vld [vmem:[%s11066_s5 + $0x58] sm:$0xff]  }
 0x337   : > { %v10610_v52 = vpack.c.bf16 %v6192_v19, %v6184_v24  ;;  %6032 = vmatprep.mubr.bf16.mxu1 %v9969_v38  ;;  %v4728_v49 = vpop.f32.mrb[88].mxu0  ;;  %8036 = vmatpush3.bf16.msra.mxu1 %v8804_v14  ;;  %v8283_v43 = vadd.f32 %v5180_v22, %v10339_v54  ;;  %v5182_v63 = vpop.f32.mrb[89].mxu1  ;;  %v8812_v24 = vld [vmem:[%s11066_s5 + $0x90] sm:$0xff]   ;;  %v8814_v9 = vld [vmem:[%s11066_s5 + $0xd8] sm:$0xff]  }
 0x338   : > { %v8251_v5 = vadd.f32 %v4728_v49, %v10334_v8  ;;  %v4730_v55 = vpop.f32.mrb[89].mxu0  ;;  %8037 = vmatprep.subr.bf16.mxu1 %v8806_v35  ;;  %v8284_v39 = vadd.f32 %v5182_v63, %v10348_v31  ;;  %v5184_v14 = vpop.f32.mrb[90].mxu1 }
 0x339   : > { %v8252_v38 = vadd.f32 %v4730_v55, %v10343_v26  ;;  %v4732_v11 = vpop.f32.mrb[90].mxu0  ;;  %7974 = vmatpush3.bf16.msra.mxu0 %v8807_v59  ;;  %v8285_v3 = vadd.f32 %v5184_v14, %v10339_v54  ;;  %v5186_v50 = vpop.f32.mrb[91].mxu1  ;;  %v6201_v16 = vmax.f32 %v8283_v43, 0.0 }
 0x33a   : > { %v8253_v10 = vadd.f32 %v4732_v11, %v10334_v8  ;;  %v4734_v34 = vpop.f32.mrb[91].mxu0  ;;  %7975 = vmatprep.subr.bf16.mxu0 %v8809_v4  ;;  %v6199_v12 = vmax.f32 %v8251_v5, 0.0  ;;  %v8286_v59 = vadd.f32 %v5186_v50, %v10348_v31  ;;  %v6202_v5 = vmax.f32 %v8284_v39, 0.0  ;;  %v8819_v50 = vld [vmem:[%s11066_s5 + $0x20] sm:$0xff]  }
 0x33b   : > { %v8254_v35 = vadd.f32 %v4734_v34, %v10343_v26  ;;  %8038 = vmatpush3.bf16.msra.mxu1 %v8808_v47  ;;  %v6200_v4 = vmax.f32 %v8252_v38, 0.0  ;;  %v6209_v49 = vmax.f32 %v8285_v3, 0.0  ;;  %v8815_v47 = vld [vmem:[%s11066_s5 + $0x18] sm:$0xff]   ;;  %v8818_v34 = vld [vmem:[%s11066_s5 + $0xe0] sm:$0xff]  }
 0x33c   : > { %v6207_v19 = vmax.f32 %v8253_v10, 0.0  ;;  %5581 = vmatmul.mubr.bf16.gmra.mrb[100].mxu0 %v9962_v6  ;;  %8039 = vmatprep.subr.bf16.mxu1 %v8810_v41  ;;  %v6210_v63 = vmax.f32 %v8286_v59, 0.0  ;;  %v8817_v41 = vld [vmem:[%s11066_s5 + $0x60] sm:$0xff]  }
 0x33d   : > { %v6208_v22 = vmax.f32 %v8254_v35, 0.0  ;;  %5590 = vmatprep.mubr.bf16.mxu0 %v10013_v23  ;;  %7976 = vmatpush3.bf16.msra.mxu0 %v8811_v1  ;;  %v10652_v43 = vpack.c.bf16 %v6209_v49, %v6201_v16  ;;  %v8816_v1 = vld [vmem:[%s11066_s5 + $0x98] sm:$0xff]  }
 0x33e   : > { %v10646_v55 = vpack.c.bf16 %v6207_v19, %v6199_v12  ;;  %6033 = vmatmul.mubr.bf16.gmra.mrb[100].mxu1 %v9962_v6  ;;  %7977 = vmatprep.subr.bf16.mxu0 %v8813_v51  ;;  %v10660_v39 = vpack.c.bf16 %v6210_v63, %v6202_v5  ;;  %v5190_v10 = vpop.f32.mrb[92].mxu1  ;;  %v8822_v63 = vld [vmem:[%s11066_s5 + $0xe8] sm:$0xff]  }
 0x33f   : > { %v10654_v38 = vpack.c.bf16 %v6208_v22, %v6200_v4  ;;  %6042 = vmatprep.mubr.bf16.mxu1 %v10013_v23  ;;  %v4738_v11 = vpop.f32.mrb[92].mxu0  ;;  %8040 = vmatpush3.bf16.msra.mxu1 %v8812_v24  ;;  %v8287_v51 = vadd.f32 %v5190_v10, %v10339_v54  ;;  %v5192_v3 = vpop.f32.mrb[93].mxu1  ;;  %v8820_v22 = vld [vmem:[%s11066_s5 + $0xa0] sm:$0xff]  }
 0x340   : > { %v8255_v6 = vadd.f32 %v4738_v11, %v10334_v8  ;;  %v4740_v14 = vpop.f32.mrb[93].mxu0  ;;  %8041 = vmatprep.subr.bf16.mxu1 %v8814_v9  ;;  %v8288_v24 = vadd.f32 %v5192_v3, %v10348_v31  ;;  %v5194_v19 = vpop.f32.mrb[94].mxu1  ;;  %v8821_v9 = vld [vmem:[%s11066_s5 + $0x68] sm:$0xff]  }
 0x341   : > { %v8256_v23 = vadd.f32 %v4740_v14, %v10343_v26  ;;  %v4742_v35 = vpop.f32.mrb[94].mxu0  ;;  %7978 = vmatpush3.bf16.msra.mxu0 %v8815_v47  ;;  %v8289_v16 = vadd.f32 %v5194_v19, %v10339_v54  ;;  %v5196_v49 = vpop.f32.mrb[95].mxu1  ;;  %v6217_v54 = vmax.f32 %v8287_v51, 0.0  ;;  %v8825_v14 = vld [vmem:[%s11066_s5 + $0x70] sm:$0xff]   ;;  %v8833_v19 = vld [vmem:[%s11066_s5 + $0x140] sm:$0xff]  }
 0x342   : > { %v8257_v12 = vadd.f32 %v4742_v35, %v10334_v8  ;;  %v4744_v59 = vpop.f32.mrb[95].mxu0  ;;  %7979 = vmatprep.subr.bf16.mxu0 %v8817_v41  ;;  %v6215_v47 = vmax.f32 %v8255_v6, 0.0  ;;  %v8290_v8 = vadd.f32 %v5196_v49, %v10348_v31  ;;  %v6218_v6 = vmax.f32 %v8288_v24, 0.0  ;;  %v8827_v35 = vld [vmem:[%s11066_s5 + $0x30] sm:$0xff]   ;;  %v8830_v24 = vld [vmem:[%s11066_s5 + $0xf8] sm:$0xff]  }
 0x343   : > { %v8258_v4 = vadd.f32 %v4744_v59, %v10343_v26  ;;  %8042 = vmatpush3.bf16.msra.mxu1 %v8816_v1  ;;  %v6216_v41 = vmax.f32 %v8256_v23, 0.0  ;;  %v6225_v26 = vmax.f32 %v8289_v16, 0.0  ;;  %v8823_v1 = vld [vmem:[%s11066_s5 + $0x28] sm:$0xff]   ;;  %v8832_v59 = vld [vmem:[%s11066_s5 + $0xb8] sm:$0xff]   ;;  %v8857_v49 = vld [vmem:[%s11066_s5 + $0x170] sm:$0xff]  }
 0x344   : > { %v6223_v5 = vmax.f32 %v8257_v12, 0.0  ;;  %5591 = vmatmul.mubr.bf16.gmra.mrb[104].mxu0 %v10006_v58  ;;  %8043 = vmatprep.subr.bf16.mxu1 %v8818_v34  ;;  %v6226_v10 = vmax.f32 %v8290_v8, 0.0  ;;  %v8824_v23 = vld [vmem:[%s11066_s5 + $0xa8] sm:$0xff]   ;;  %v8831_v12 = vld [vmem:[%s11066_s5 + $0x38] sm:$0xff]  }
 0x345   : > { %v6224_v11 = vmax.f32 %v8258_v4, 0.0  ;;  %5600 = vmatprep.mubr.bf16.mxu0 %v10057_v48  ;;  %7980 = vmatpush3.bf16.msra.mxu0 %v8819_v50  ;;  %v10696_v34 = vpack.c.bf16 %v6225_v26, %v6217_v54  ;;  %v8828_v50 = vld [vmem:[%s11066_s5 + $0xb0] sm:$0xff]   ;;  %v8855_v16 = vld [vmem:[%s11066_s5 + $0x1e8] sm:$0xff]   ;;  %v11218_v8 = vld [vmem:[#allocation18_spill] sm:$0xff] }
 0x346   : > { %v10690_v31 = vpack.c.bf16 %v6223_v5, %v6215_v47  ;;  %6043 = vmatmul.mubr.bf16.gmra.mrb[104].mxu1 %v10006_v58  ;;  %7981 = vmatprep.subr.bf16.mxu0 %v8821_v9  ;;  %v10704_v3 = vpack.c.bf16 %v6226_v10, %v6218_v6  ;;  %v8826_v58 = vld [vmem:[%s11066_s5 + $0xf0] sm:$0xff]   ;;  %v8835_v9 = vld [vmem:[%s11066_s5 + $0x1c0] sm:$0xff]   ;;  %v8854_v4 = vld [vmem:[%s11066_s5 + $0x128] sm:$0xff]  }
 0x347   : > { %v10698_v51 = vpack.c.bf16 %v6224_v11, %v6216_v41  ;;  %6052 = vmatprep.mubr.bf16.mxu1 %v10057_v48  ;;  %8044 = vmatpush3.bf16.msra.mxu1 %v8820_v22  ;;  %v8829_v48 = vld [vmem:[%s11066_s5 + $0x78] sm:$0xff]   ;;  %v8856_v22 = vld [vmem:[%s11066_s5 + $0x1a8] sm:$0xff]   ;;  %v8860_v47 = vld [vmem:[%s11066_s5 + $0x1b0] sm:$0xff]  }
 0x348   : > { %8045 = vmatprep.subr.bf16.mxu1 %v8822_v63  ;;  %v11217_v5 = vld [vmem:[#allocation14_spill] sm:$0xff] }
 0x349   : > { %7982 = vmatpush3.bf16.msra.mxu0 %v8823_v1  ;;  %v8861_v63 = vld [vmem:[%s11066_s5 + $0x178] sm:$0xff]  }
 0x34a   : > { %7983 = vmatprep.subr.bf16.mxu0 %v8825_v14  ;;  %v8863_v54 = vld [vmem:[%s11066_s5 + $0x1f8] sm:$0xff]  }
 0x34b   : > { %8046 = vmatpush3.bf16.msra.mxu1 %v8824_v23  ;;  %v8862_v41 = vld [vmem:[%s11066_s5 + $0x138] sm:$0xff]  }
 0x34c   : > { %5601 = vmatmul.mubr.bf16.gmra.mrb[108].mxu0 %v10050_v57  ;;  %8047 = vmatprep.subr.bf16.mxu1 %v8826_v58 }
 0x34d   : > { %5610 = vmatprep.mubr.bf16.mxu0 %v10101_v28  ;;  %7984 = vmatpush3.bf16.msra.mxu0 %v8827_v35 }
 0x34e   : > { %6053 = vmatmul.mubr.bf16.gmra.mrb[108].mxu1 %v10050_v57  ;;  %7985 = vmatprep.subr.bf16.mxu0 %v8829_v48  ;;  %v8834_v57 = vld [vmem:[%s11066_s5 + $0x100] sm:$0xff]  }
 0x34f   : > { %6062 = vmatprep.mubr.bf16.mxu1 %v10101_v28  ;;  %8048 = vmatpush3.bf16.msra.mxu1 %v8828_v50  ;;  %v8836_v28 = vld [vmem:[%s11066_s5 + $0x180] sm:$0xff]  }
 0x350   : > { %8049 = vmatprep.subr.bf16.mxu1 %v8830_v24 }
 0x351   : > { %7986 = vmatpush3.bf16.msra.mxu0 %v8831_v12 }
 0x352   : > { %8099 = vmatprep.subr.bf16.mxu0 %v8833_v19 }
 0x353   : > { %8050 = vmatpush3.bf16.msra.mxu1 %v8832_v59 }
 0x354   : > { %5611 = vmatmul.mubr.bf16.gmra.mrb[112].mxu0 %v10094_v45  ;;  %8163 = vmatprep.subr.bf16.mxu1 %v8835_v9 }
 0x355   : > { %5620 = vmatprep.mubr.bf16.mxu0 %v10145_v44 }
 0x356   : > { %6063 = vmatmul.mubr.bf16.gmra.mrb[112].mxu1 %v10094_v45  ;;  %v8837_v45 = vld [vmem:[%s11066_s5 + $0x148] sm:$0xff]  }
 0x357   : > { %6072 = vmatprep.mubr.bf16.mxu1 %v10145_v44  ;;  %v8838_v44 = vld [vmem:[%s11066_s5 + $0x108] sm:$0xff]  }
 0x35c   : > { %5621 = vmatmul.mubr.bf16.gmra.mrb[116].mxu0 %v10138_v33 }
 0x35d   : > { %5630 = vmatprep.mubr.bf16.mxu0 %v10176_v18 }
 0x35e   : > { %6073 = vmatmul.mubr.bf16.gmra.mrb[116].mxu1 %v10138_v33  ;;  %v8839_v33 = vld [vmem:[%s11066_s5 + $0x1c8] sm:$0xff]  }
 0x35f   : > { %6082 = vmatprep.mubr.bf16.mxu1 %v10176_v18  ;;  %v8840_v18 = vld [vmem:[%s11066_s5 + $0x188] sm:$0xff]  }
 0x364   : > { %5631 = vmatmul.mubr.bf16.gmra.mrb[120].mxu0 %v10173_v37 }
 0x365   : > { %5640 = vmatprep.mubr.bf16.mxu0 %v10193_v36 }
 0x366   : > { %6083 = vmatmul.mubr.bf16.gmra.mrb[120].mxu1 %v10173_v37  ;;  %v8841_v37 = vld [vmem:[%s11066_s5 + $0x150] sm:$0xff]  }
 0x367   : > { %6092 = vmatprep.mubr.bf16.mxu1 %v10193_v36  ;;  %v8842_v36 = vld [vmem:[%s11066_s5 + $0x110] sm:$0xff]  }
 0x36c   : > { %5641 = vmatmul.mubr.bf16.gmra.mrb[124].mxu0 %v10190_v0 }
 0x36d   : > { %6846 = vmatprep.mubr.bf16.mxu0 %v10390_v13  ;;  %v8847_v13 = vld [vmem:[%s11066_s5 + $0x1d8] sm:$0xff]  }
 0x36e   : > { %6093 = vmatmul.mubr.bf16.gmra.mrb[124].mxu1 %v10190_v0  ;;  %v8843_v0 = vld [vmem:[%s11066_s5 + $0x1d0] sm:$0xff]  }
 0x36f   : > { %6943 = vmatprep.mubr.bf16.mxu1 %v10399_v32  ;;  %v8846_v32 = vld [vmem:[%s11066_s5 + $0x118] sm:$0xff]  }
 0x374   : > { %6847 = vmatmul.mubr.bf16.vlgmr.msra.gmra.mrb[128].mxu0 %v10383_v42  ;;  %v8845_v42 = vld [vmem:[%s11066_s5 + $0x158] sm:$0xff]  }
 0x375   : > { %6854 = vmatprep.mubr.bf16.mxu0 %v10442_v40  ;;  %8100 = vmatpush3.bf16.msra.mxu0 %v8834_v57  ;;  %v8849_v40 = vld [vmem:[%s11066_s5 + $0x160] sm:$0xff]  }
 0x376   : > { %6944 = vmatmul.mubr.bf16.vlgmr.msra.gmra.mrb[128].mxu1 %v10388_v29  ;;  %8101 = vmatprep.subr.bf16.mxu0 %v8837_v45  ;;  %v8844_v29 = vld [vmem:[%s11066_s5 + $0x190] sm:$0xff]  }
 0x377   : > { %6951 = vmatprep.mubr.bf16.mxu1 %v10451_v2  ;;  %8164 = vmatpush3.bf16.msra.mxu1 %v8836_v28  ;;  %v8851_v2 = vld [vmem:[%s11066_s5 + $0x1e0] sm:$0xff]  }
 0x378   : > { %8165 = vmatprep.subr.bf16.mxu1 %v8839_v33 }
 0x379   : > { %8102 = vmatpush3.bf16.msra.mxu0 %v8838_v44 }
 0x37a   : > { %8103 = vmatprep.subr.bf16.mxu0 %v8841_v37 }
 0x37b   : > { %8166 = vmatpush3.bf16.msra.mxu1 %v8840_v18 }
 0x37c   : > { %6855 = vmatmul.mubr.bf16.gmra.mrb[132].mxu0 %v10435_v25  ;;  %8167 = vmatprep.subr.bf16.mxu1 %v8843_v0  ;;  %v8848_v25 = vld [vmem:[%s11066_s5 + $0x198] sm:$0xff]  }
 0x37d   : > { %6862 = vmatprep.mubr.bf16.mxu0 %v10494_v56  ;;  %8104 = vmatpush3.bf16.msra.mxu0 %v8842_v36  ;;  %v8853_v56 = vld [vmem:[%s11066_s5 + $0x168] sm:$0xff]  }
 0x37e   : > { %6952 = vmatmul.mubr.bf16.gmra.mrb[132].mxu1 %v10440_v30  ;;  %8105 = vmatprep.subr.bf16.mxu0 %v8845_v42  ;;  %v8850_v30 = vld [vmem:[%s11066_s5 + $0x120] sm:$0xff]  }
 0x37f   : > { %6959 = vmatprep.mubr.bf16.mxu1 %v10503_v62  ;;  %8168 = vmatpush3.bf16.msra.mxu1 %v8844_v29  ;;  %v8852_v62 = vld [vmem:[%s11066_s5 + $0x1a0] sm:$0xff]  }
 0x380   : > { %8169 = vmatprep.subr.bf16.mxu1 %v8847_v13 }
 0x381   : > { %8106 = vmatpush3.bf16.msra.mxu0 %v8846_v32 }
 0x382   : > { %8107 = vmatprep.subr.bf16.mxu0 %v8849_v40 }
 0x383   : > { %8170 = vmatpush3.bf16.msra.mxu1 %v8848_v25 }
 0x384   : > { %6863 = vmatmul.mubr.bf16.gmra.mrb[136].mxu0 %v10487_v15  ;;  %8171 = vmatprep.subr.bf16.mxu1 %v8851_v2  ;;  %v11216_v15 = vld [vmem:[#allocation17_spill] sm:$0xff] }
 0x385   : > { %6870 = vmatprep.mubr.bf16.mxu0 %v10542_v7  ;;  %8108 = vmatpush3.bf16.msra.mxu0 %v8850_v30  ;;  %v8859_v7 = vld [vmem:[%s11066_s5 + $0x1f0] sm:$0xff]  }
 0x386   : > { %6960 = vmatmul.mubr.bf16.gmra.mrb[136].mxu1 %v10492_v53  ;;  %8109 = vmatprep.subr.bf16.mxu0 %v8853_v56  ;;  %v8858_v53 = vld [vmem:[%s11066_s5 + $0x130] sm:$0xff]  }
 0x387   : > { %6967 = vmatprep.mubr.bf16.mxu1 %v11216_v15  ;;  %8172 = vmatpush3.bf16.msra.mxu1 %v8852_v62 }
 0x388   : > { %8173 = vmatprep.subr.bf16.mxu1 %v8855_v16 }
 0x389   : > { %8110 = vmatpush3.bf16.msra.mxu0 %v8854_v4 }
 0x38a   : > { %8111 = vmatprep.subr.bf16.mxu0 %v8857_v49 }
 0x38b   : > { %8174 = vmatpush3.bf16.msra.mxu1 %v8856_v22 }
 0x38c   : > { %6871 = vmatmul.mubr.bf16.gmra.mrb[140].mxu0 %v11217_v5  ;;  %8175 = vmatprep.subr.bf16.mxu1 %v8859_v7 }
 0x38d   : > { %6878 = vmatprep.mubr.bf16.mxu0 %v10569_v60  ;;  %8112 = vmatpush3.bf16.msra.mxu0 %v8858_v53  ;;  %v8864_v60 = vld [vmem:[%s11066_s5 + $0x1b8] sm:$0xff]  }
 0x38e   : > { %6968 = vmatmul.mubr.bf16.gmra.mrb[140].mxu1 %v11218_v8  ;;  %8113 = vmatprep.subr.bf16.mxu0 %v8861_v63 }
 0x38f   : > { %6975 = vmatprep.mubr.bf16.mxu1 %v10572_v17  ;;  %8176 = vmatpush3.bf16.msra.mxu1 %v8860_v47 }
 0x390   : > { %8177 = vmatprep.subr.bf16.mxu1 %v8863_v54 }
 0x391   : > { %8114 = vmatpush3.bf16.msra.mxu0 %v8862_v41 }
 0x393   : > { %8178 = vmatpush3.bf16.msra.mxu1 %v8864_v60 }
 0x394   : > { %6879 = vmatmul.mubr.bf16.gmra.mrb[144].mxu0 %v10561_v20  ;;  %v8865_v20 = vld [vmem:[#allocation7] sm:$0xff] }
 0x395   : > { %6886 = vmatprep.mubr.bf16.mxu0 %v10610_v52 }
 0x396   : > { %6976 = vmatmul.mubr.bf16.gmra.mrb[144].mxu1 %v10567_v27  ;;  %v11219_v27 = vld [vmem:[#allocation13_spill] sm:$0xff] }
 0x397   : > { %6983 = vmatprep.mubr.bf16.mxu1 %v10616_v61  ;;  %v11220_v17 = vsub.s32 4, %v11219_v27  ;;  %v11222_v61 = vsub.s32 6, %v11219_v27 }
 0x39c   : > { %6887 = vmatmul.mubr.bf16.gmra.mrb[148].mxu0 %v10602_v46  ;;  %v10875_v46 = vrot.slane %v8865_v20, %v11220_v17 }
 0x39d   : > { %6894 = vmatprep.mubr.bf16.mxu0 %v10654_v38  ;;  %v11223_v38 = vsub.s32 7, %v11219_v27 }
 0x39e   : > { %6984 = vmatmul.mubr.bf16.gmra.mrb[148].mxu1 %v10608_v21  ;;  %v11221_v21 = vsub.s32 5, %v11219_v27 }
 0x39f   : > { %6991 = vmatprep.mubr.bf16.mxu1 %v10660_v39  ;;  %v10887_v39 = vrot.slane %v8865_v20, %v11223_v38 }
 0x3a0   : > { %v10879_v52 = vrot.slane %v8865_v20, %v11221_v21 }
 0x3a4   : > { %6895 = vmatmul.mubr.bf16.gmra.mrb[152].mxu0 %v10646_v55  ;;  %v10883_v55 = vrot.slane %v8865_v20, %v11222_v61 }
 0x3a5   : > { %6902 = vmatprep.mubr.bf16.mxu0 %v10698_v51 }
 0x3a6   : > { %6992 = vmatmul.mubr.bf16.gmra.mrb[152].mxu1 %v10652_v43 }
 0x3a7   : > { %6999 = vmatprep.mubr.bf16.mxu1 %v10704_v3 }
 0x3ac   : > { %6903 = vmatmul.mubr.bf16.gmra.mrb[156].mxu0 %v10690_v31 }
 0x3ae   : > { %7000 = vmatmul.mubr.bf16.gmra.mrb[156].mxu1 %v10696_v34 }
 0x407   : > { %v5572_v43 = vpop.f32.mrb[96].mxu0 }
 0x408   : > { %v8291_v26 = vadd.f32 %v5572_v43, %v10875_v46  ;;  %v5574_v11 = vpop.f32.mrb[97].mxu0 }
 0x409   : > { %v6024_v1 = vpop.f32.mrb[96].mxu1  ;;  %v8292_v6 = vadd.f32 %v5574_v11, %v10879_v52  ;;  %v5576_v31 = vpop.f32.mrb[98].mxu0 }
 0x40a   : > { %v8323_v10 = vadd.f32 %v6024_v1, %v10883_v55  ;;  %v6026_v14 = vpop.f32.mrb[97].mxu1  ;;  %v8293_v34 = vadd.f32 %v5576_v31, %v10875_v46  ;;  %v5578_v51 = vpop.f32.mrb[99].mxu0  ;;  %v6107_v35 = vmax.f32 %v8291_v26, 0.0 }
 0x40b   : > { %v8324_v23 = vadd.f32 %v6026_v14, %v10887_v39  ;;  %v6028_v3 = vpop.f32.mrb[98].mxu1  ;;  %v8294_v58 = vadd.f32 %v5578_v51, %v10879_v52  ;;  %v6108_v12 = vmax.f32 %v8292_v6, 0.0 }
 0x40c   : > { %v6115_v48 = vmax.f32 %v8293_v34, 0.0  ;;  %v8325_v50 = vadd.f32 %v6028_v3, %v10883_v55  ;;  %v6030_v24 = vpop.f32.mrb[99].mxu1  ;;  %v6109_v9 = vmax.f32 %v8323_v10, 0.0 }
 0x40d   : > { %v6116_v19 = vmax.f32 %v8294_v58, 0.0  ;;  %v8326_v59 = vadd.f32 %v6030_v24, %v10887_v39  ;;  %v6110_v28 = vmax.f32 %v8324_v23, 0.0 }
 0x40e   : > { %v6235_v57 = vpack.c.bf16 %v6115_v48, %v6107_v35  ;;  %v6117_v45 = vmax.f32 %v8325_v50, 0.0 }
 0x40f   : > { %v6236_v33 = vpack.c.bf16 %v6116_v19, %v6108_v12  ;;  %v6118_v44 = vmax.f32 %v8326_v59, 0.0  ;;  %v5582_v37 = vpop.f32.mrb[100].mxu0 }
 0x410   : > { %v6237_v18 = vpack.c.bf16 %v6117_v45, %v6109_v9  ;;  %v8295_v0 = vadd.f32 %v5582_v37, %v10875_v46  ;;  %v5584_v36 = vpop.f32.mrb[101].mxu0 }
 0x411   : > { %v6238_v42 = vpack.c.bf16 %v6118_v44, %v6110_v28  ;;  %v6034_v29 = vpop.f32.mrb[100].mxu1  ;;  %v8296_v13 = vadd.f32 %v5584_v36, %v10879_v52  ;;  %v5586_v32 = vpop.f32.mrb[102].mxu0  ;;  %7040 = vmatprep.mubr.bf16.mxu0 %v6236_v33 }
 0x412   : > { %v8327_v40 = vadd.f32 %v6034_v29, %v10883_v55  ;;  %v6036_v25 = vpop.f32.mrb[101].mxu1  ;;  %v8297_v2 = vadd.f32 %v5586_v32, %v10875_v46  ;;  %v5588_v30 = vpop.f32.mrb[103].mxu0  ;;  %7041 = vmatmul.mubr.bf16.vlgmr.msra.gmra.mrb[160].mxu0 %v6235_v57  ;;  %v6123_v4 = vmax.f32 %v8295_v0, 0.0 }
 0x413   : > { %v8328_v56 = vadd.f32 %v6036_v25, %v10887_v39  ;;  %v6038_v62 = vpop.f32.mrb[102].mxu1  ;;  %7137 = vmatprep.mubr.bf16.mxu1 %v6238_v42  ;;  %v8298_v16 = vadd.f32 %v5588_v30, %v10879_v52  ;;  %v6124_v7 = vmax.f32 %v8296_v13, 0.0 }
 0x414   : > { %v6131_v49 = vmax.f32 %v8297_v2, 0.0  ;;  %v8329_v15 = vadd.f32 %v6038_v62, %v10883_v55  ;;  %v6040_v22 = vpop.f32.mrb[103].mxu1  ;;  %7138 = vmatmul.mubr.bf16.vlgmr.msra.gmra.mrb[160].mxu1 %v6237_v18  ;;  %v6125_v5 = vmax.f32 %v8327_v40, 0.0 }
 0x415   : > { %v6132_v53 = vmax.f32 %v8298_v16, 0.0  ;;  %v8330_v47 = vadd.f32 %v6040_v22, %v10887_v39  ;;  %v6126_v54 = vmax.f32 %v8328_v56, 0.0 }
 0x416   : > { %v6243_v8 = vpack.c.bf16 %v6131_v49, %v6123_v4  ;;  %v6133_v63 = vmax.f32 %v8329_v15, 0.0 }
 0x417   : > { %v6244_v41 = vpack.c.bf16 %v6132_v53, %v6124_v7  ;;  %v6134_v60 = vmax.f32 %v8330_v47, 0.0  ;;  %v5592_v20 = vpop.f32.mrb[104].mxu0 }
 0x418   : > { %v6245_v27 = vpack.c.bf16 %v6133_v63, %v6125_v5  ;;  %v8299_v17 = vadd.f32 %v5592_v20, %v10875_v46  ;;  %v5594_v21 = vpop.f32.mrb[105].mxu0 }
 0x419   : > { %v6246_v61 = vpack.c.bf16 %v6134_v60, %v6126_v54  ;;  %v6044_v43 = vpop.f32.mrb[104].mxu1  ;;  %v8300_v38 = vadd.f32 %v5594_v21, %v10879_v52  ;;  %v5596_v26 = vpop.f32.mrb[106].mxu0  ;;  %7048 = vmatprep.mubr.bf16.mxu0 %v6244_v41 }
 0x41a   : > { %v8331_v11 = vadd.f32 %v6044_v43, %v10883_v55  ;;  %v6046_v1 = vpop.f32.mrb[105].mxu1  ;;  %v8301_v6 = vadd.f32 %v5596_v26, %v10875_v46  ;;  %v5598_v31 = vpop.f32.mrb[107].mxu0  ;;  %7049 = vmatmul.mubr.bf16.gmra.mrb[164].mxu0 %v6243_v8  ;;  %v6139_v51 = vmax.f32 %v8299_v17, 0.0 }
 0x41b   : > { %v8332_v10 = vadd.f32 %v6046_v1, %v10887_v39  ;;  %v6048_v14 = vpop.f32.mrb[106].mxu1  ;;  %7145 = vmatprep.mubr.bf16.mxu1 %v6246_v61  ;;  %v8302_v34 = vadd.f32 %v5598_v31, %v10879_v52  ;;  %v6140_v35 = vmax.f32 %v8300_v38, 0.0 }
 0x41c   : > { %v6147_v23 = vmax.f32 %v8301_v6, 0.0  ;;  %v8333_v3 = vadd.f32 %v6048_v14, %v10883_v55  ;;  %v6050_v58 = vpop.f32.mrb[107].mxu1  ;;  %7146 = vmatmul.mubr.bf16.gmra.mrb[164].mxu1 %v6245_v27  ;;  %v6141_v24 = vmax.f32 %v8331_v11, 0.0 }
 0x41d   : > { %v6148_v48 = vmax.f32 %v8302_v34, 0.0  ;;  %v8334_v50 = vadd.f32 %v6050_v58, %v10887_v39  ;;  %v6142_v59 = vmax.f32 %v8332_v10, 0.0 }
 0x41e   : > { %v6251_v12 = vpack.c.bf16 %v6147_v23, %v6139_v51  ;;  %v6149_v19 = vmax.f32 %v8333_v3, 0.0 }
 0x41f   : > { %v6252_v9 = vpack.c.bf16 %v6148_v48, %v6140_v35  ;;  %v6150_v57 = vmax.f32 %v8334_v50, 0.0  ;;  %v5602_v45 = vpop.f32.mrb[108].mxu0 }
 0x420   : > { %v6253_v28 = vpack.c.bf16 %v6149_v19, %v6141_v24  ;;  %v8303_v33 = vadd.f32 %v5602_v45, %v10875_v46  ;;  %v5604_v44 = vpop.f32.mrb[109].mxu0 }
 0x421   : > { %v6254_v37 = vpack.c.bf16 %v6150_v57, %v6142_v59  ;;  %v6054_v18 = vpop.f32.mrb[108].mxu1  ;;  %v8304_v0 = vadd.f32 %v5604_v44, %v10879_v52  ;;  %v5606_v36 = vpop.f32.mrb[110].mxu0  ;;  %7056 = vmatprep.mubr.bf16.mxu0 %v6252_v9 }
 0x422   : > { %v8335_v42 = vadd.f32 %v6054_v18, %v10883_v55  ;;  %v6056_v29 = vpop.f32.mrb[109].mxu1  ;;  %v8305_v13 = vadd.f32 %v5606_v36, %v10875_v46  ;;  %v5608_v32 = vpop.f32.mrb[111].mxu0  ;;  %7057 = vmatmul.mubr.bf16.gmra.mrb[168].mxu0 %v6251_v12  ;;  %v6155_v30 = vmax.f32 %v8303_v33, 0.0 }
 0x423   : > { %v8336_v40 = vadd.f32 %v6056_v29, %v10887_v39  ;;  %v6058_v25 = vpop.f32.mrb[110].mxu1  ;;  %7153 = vmatprep.mubr.bf16.mxu1 %v6254_v37  ;;  %v8306_v2 = vadd.f32 %v5608_v32, %v10879_v52  ;;  %v6156_v4 = vmax.f32 %v8304_v0, 0.0 }
 0x424   : > { %v6163_v56 = vmax.f32 %v8305_v13, 0.0  ;;  %v8337_v62 = vadd.f32 %v6058_v25, %v10883_v55  ;;  %v6060_v16 = vpop.f32.mrb[111].mxu1  ;;  %7154 = vmatmul.mubr.bf16.gmra.mrb[168].mxu1 %v6253_v28  ;;  %v6157_v22 = vmax.f32 %v8335_v42, 0.0 }
 0x425   : > { %v6164_v49 = vmax.f32 %v8306_v2, 0.0  ;;  %v8338_v15 = vadd.f32 %v6060_v16, %v10887_v39  ;;  %v6158_v47 = vmax.f32 %v8336_v40, 0.0 }
 0x426   : > { %v6259_v7 = vpack.c.bf16 %v6163_v56, %v6155_v30  ;;  %v6165_v53 = vmax.f32 %v8337_v62, 0.0 }
 0x427   : > { %v6260_v5 = vpack.c.bf16 %v6164_v49, %v6156_v4  ;;  %v6166_v8 = vmax.f32 %v8338_v15, 0.0  ;;  %v5612_v63 = vpop.f32.mrb[112].mxu0 }
 0x428   : > { %v6261_v54 = vpack.c.bf16 %v6165_v53, %v6157_v22  ;;  %v8307_v41 = vadd.f32 %v5612_v63, %v10875_v46  ;;  %v5614_v60 = vpop.f32.mrb[113].mxu0 }
 0x429   : > { %v6262_v20 = vpack.c.bf16 %v6166_v8, %v6158_v47  ;;  %v6064_v27 = vpop.f32.mrb[112].mxu1  ;;  %v8308_v17 = vadd.f32 %v5614_v60, %v10879_v52  ;;  %v5616_v21 = vpop.f32.mrb[114].mxu0  ;;  %7064 = vmatprep.mubr.bf16.mxu0 %v6260_v5 }
 0x42a   : > { %v8339_v61 = vadd.f32 %v6064_v27, %v10883_v55  ;;  %v6066_v43 = vpop.f32.mrb[113].mxu1  ;;  %v8309_v38 = vadd.f32 %v5616_v21, %v10875_v46  ;;  %v5618_v26 = vpop.f32.mrb[115].mxu0  ;;  %7065 = vmatmul.mubr.bf16.gmra.mrb[172].mxu0 %v6259_v7  ;;  %v6171_v31 = vmax.f32 %v8307_v41, 0.0 }
 0x42b   : > { %v8340_v11 = vadd.f32 %v6066_v43, %v10887_v39  ;;  %v6068_v1 = vpop.f32.mrb[114].mxu1  ;;  %7161 = vmatprep.mubr.bf16.mxu1 %v6262_v20  ;;  %v8310_v6 = vadd.f32 %v5618_v26, %v10879_v52  ;;  %v6172_v51 = vmax.f32 %v8308_v17, 0.0 }
 0x42c   : > { %v6179_v10 = vmax.f32 %v8309_v38, 0.0  ;;  %v8341_v14 = vadd.f32 %v6068_v1, %v10883_v55  ;;  %v6070_v34 = vpop.f32.mrb[115].mxu1  ;;  %7162 = vmatmul.mubr.bf16.gmra.mrb[172].mxu1 %v6261_v54  ;;  %v6173_v58 = vmax.f32 %v8339_v61, 0.0 }
 0x42d   : > { %v6180_v23 = vmax.f32 %v8310_v6, 0.0  ;;  %v8342_v3 = vadd.f32 %v6070_v34, %v10887_v39  ;;  %v6174_v50 = vmax.f32 %v8340_v11, 0.0 }
 0x42e   : > { %v6267_v35 = vpack.c.bf16 %v6179_v10, %v6171_v31  ;;  %v6181_v48 = vmax.f32 %v8341_v14, 0.0 }
 0x42f   : > { %v6268_v24 = vpack.c.bf16 %v6180_v23, %v6172_v51  ;;  %v6182_v12 = vmax.f32 %v8342_v3, 0.0  ;;  %v5622_v19 = vpop.f32.mrb[116].mxu0 }
 0x430   : > { %v6269_v59 = vpack.c.bf16 %v6181_v48, %v6173_v58  ;;  %v8311_v9 = vadd.f32 %v5622_v19, %v10875_v46  ;;  %v5624_v57 = vpop.f32.mrb[117].mxu0 }
 0x431   : > { %v6270_v45 = vpack.c.bf16 %v6182_v12, %v6174_v50  ;;  %v6074_v28 = vpop.f32.mrb[116].mxu1  ;;  %v8312_v33 = vadd.f32 %v5624_v57, %v10879_v52  ;;  %v5626_v44 = vpop.f32.mrb[118].mxu0  ;;  %7072 = vmatprep.mubr.bf16.mxu0 %v6268_v24 }
 0x432   : > { %v8343_v37 = vadd.f32 %v6074_v28, %v10883_v55  ;;  %v6076_v18 = vpop.f32.mrb[117].mxu1  ;;  %v8313_v0 = vadd.f32 %v5626_v44, %v10875_v46  ;;  %v5628_v36 = vpop.f32.mrb[119].mxu0  ;;  %7073 = vmatmul.mubr.bf16.gmra.mrb[176].mxu0 %v6267_v35  ;;  %v6187_v32 = vmax.f32 %v8311_v9, 0.0 }
 0x433   : > { %v8344_v42 = vadd.f32 %v6076_v18, %v10887_v39  ;;  %v6078_v29 = vpop.f32.mrb[118].mxu1  ;;  %7169 = vmatprep.mubr.bf16.mxu1 %v6270_v45  ;;  %v8314_v13 = vadd.f32 %v5628_v36, %v10879_v52  ;;  %v6188_v30 = vmax.f32 %v8312_v33, 0.0 }
 0x434   : > { %v6195_v40 = vmax.f32 %v8313_v0, 0.0  ;;  %v8345_v25 = vadd.f32 %v6078_v29, %v10883_v55  ;;  %v6080_v2 = vpop.f32.mrb[119].mxu1  ;;  %7170 = vmatmul.mubr.bf16.gmra.mrb[176].mxu1 %v6269_v59  ;;  %v6189_v16 = vmax.f32 %v8343_v37, 0.0 }
 0x435   : > { %v6196_v56 = vmax.f32 %v8314_v13, 0.0  ;;  %v8346_v62 = vadd.f32 %v6080_v2, %v10887_v39  ;;  %v6190_v15 = vmax.f32 %v8344_v42, 0.0 }
 0x436   : > { %v6275_v4 = vpack.c.bf16 %v6195_v40, %v6187_v32  ;;  %v6197_v49 = vmax.f32 %v8345_v25, 0.0 }
 0x437   : > { %v6276_v22 = vpack.c.bf16 %v6196_v56, %v6188_v30  ;;  %v6198_v7 = vmax.f32 %v8346_v62, 0.0  ;;  %v5632_v53 = vpop.f32.mrb[120].mxu0 }
 0x438   : > { %v6277_v47 = vpack.c.bf16 %v6197_v49, %v6189_v16  ;;  %v8315_v5 = vadd.f32 %v5632_v53, %v10875_v46  ;;  %v5634_v8 = vpop.f32.mrb[121].mxu0 }
 0x439   : > { %v6278_v63 = vpack.c.bf16 %v6198_v7, %v6190_v15  ;;  %v6084_v54 = vpop.f32.mrb[120].mxu1  ;;  %v8316_v41 = vadd.f32 %v5634_v8, %v10879_v52  ;;  %v5636_v60 = vpop.f32.mrb[122].mxu0  ;;  %7080 = vmatprep.mubr.bf16.mxu0 %v6276_v22  ;;  %v10953_v15 = vld [vmem:[#allocation9] ss:$0 sm:$0xff] }
 0x43a   : > { %v8347_v20 = vadd.f32 %v6084_v54, %v10883_v55  ;;  %v6086_v27 = vpop.f32.mrb[121].mxu1  ;;  %v8317_v17 = vadd.f32 %v5636_v60, %v10875_v46  ;;  %v5638_v21 = vpop.f32.mrb[123].mxu0  ;;  %7081 = vmatmul.mubr.bf16.gmra.mrb[180].mxu0 %v6275_v4  ;;  %v6203_v26 = vmax.f32 %v8315_v5, 0.0 }
 0x43b   : > { %v8348_v61 = vadd.f32 %v6086_v27, %v10887_v39  ;;  %v6088_v43 = vpop.f32.mrb[122].mxu1  ;;  %7177 = vmatprep.mubr.bf16.mxu1 %v6278_v63  ;;  %v8318_v38 = vadd.f32 %v5638_v21, %v10879_v52  ;;  %v6204_v31 = vmax.f32 %v8316_v41, 0.0 }
 0x43c   : > { %v6211_v11 = vmax.f32 %v8317_v17, 0.0  ;;  %v8349_v1 = vadd.f32 %v6088_v43, %v10883_v55  ;;  %v6090_v6 = vpop.f32.mrb[123].mxu1  ;;  %7178 = vmatmul.mubr.bf16.gmra.mrb[180].mxu1 %v6277_v47  ;;  %v6205_v34 = vmax.f32 %v8347_v20, 0.0 }
 0x43d   : > { %v6212_v10 = vmax.f32 %v8318_v38, 0.0  ;;  %v8350_v14 = vadd.f32 %v6090_v6, %v10887_v39  ;;  %v6206_v3 = vmax.f32 %v8348_v61, 0.0 }
 0x43e   : > { %v6283_v51 = vpack.c.bf16 %v6211_v11, %v6203_v26  ;;  %v6213_v23 = vmax.f32 %v8349_v1, 0.0 }
 0x43f   : > { %v6284_v58 = vpack.c.bf16 %v6212_v10, %v6204_v31  ;;  %v6214_v35 = vmax.f32 %v8350_v14, 0.0  ;;  %v5642_v48 = vpop.f32.mrb[124].mxu0 }
 0x440   : > { %v6285_v50 = vpack.c.bf16 %v6213_v23, %v6205_v34  ;;  %v8319_v24 = vadd.f32 %v5642_v48, %v10875_v46  ;;  %v5644_v12 = vpop.f32.mrb[125].mxu0 }
 0x441   : > { %v6286_v19 = vpack.c.bf16 %v6214_v35, %v6206_v3  ;;  %v6094_v59 = vpop.f32.mrb[124].mxu1  ;;  %v8320_v9 = vadd.f32 %v5644_v12, %v10879_v52  ;;  %v5646_v57 = vpop.f32.mrb[126].mxu0  ;;  %7088 = vmatprep.mubr.bf16.mxu0 %v6284_v58 }
 0x442   : > { %v8351_v45 = vadd.f32 %v6094_v59, %v10883_v55  ;;  %v6096_v28 = vpop.f32.mrb[125].mxu1  ;;  %v8321_v33 = vadd.f32 %v5646_v57, %v10875_v46  ;;  %v5648_v44 = vpop.f32.mrb[127].mxu0  ;;  %7089 = vmatmul.mubr.bf16.gmra.mrb[184].mxu0 %v6283_v51  ;;  %v6219_v36 = vmax.f32 %v8319_v24, 0.0 }
 0x443   : > { %v8352_v37 = vadd.f32 %v6096_v28, %v10887_v39  ;;  %v6098_v18 = vpop.f32.mrb[126].mxu1  ;;  %7185 = vmatprep.mubr.bf16.mxu1 %v6286_v19  ;;  %v8322_v0 = vadd.f32 %v5648_v44, %v10879_v52  ;;  %v6220_v32 = vmax.f32 %v8320_v9, 0.0 }
 0x444   : > { %v6227_v42 = vmax.f32 %v8321_v33, 0.0  ;;  %v8353_v29 = vadd.f32 %v6098_v18, %v10883_v55  ;;  %v6100_v13 = vpop.f32.mrb[127].mxu1  ;;  %7186 = vmatmul.mubr.bf16.gmra.mrb[184].mxu1 %v6285_v50  ;;  %v6221_v2 = vmax.f32 %v8351_v45, 0.0 }
 0x445   : > { %v6228_v40 = vmax.f32 %v8322_v0, 0.0  ;;  %v8354_v25 = vadd.f32 %v6100_v13, %v10887_v39  ;;  %v6222_v56 = vmax.f32 %v8352_v37, 0.0 }
 0x446   : > { %v6291_v46 = vpack.c.bf16 %v6227_v42, %v6219_v36  ;;  %v6229_v30 = vmax.f32 %v8353_v29, 0.0 }
 0x447   : > { %v6292_v62 = vpack.c.bf16 %v6228_v40, %v6220_v32  ;;  %v6230_v16 = vmax.f32 %v8354_v25, 0.0  ;;  %v7987_v4 = vpop.f32.mrb[128].mxu0 }
 0x448   : > { %v6293_v49 = vpack.c.bf16 %v6229_v30, %v6221_v2  ;;  %v7988_v52 = vpop.f32.mrb[129].mxu0 }
 0x449   : > { %v6294_v22 = vpack.c.bf16 %v6230_v16, %v6222_v56  ;;  %v8051_v7 = vpop.f32.mrb[128].mxu1  ;;  %v7989_v55 = vadd.f32 %v7988_v52, %v7987_v4  ;;  %v7990_v53 = vpop.f32.mrb[130].mxu0  ;;  %7096 = vmatprep.mubr.bf16.mxu0 %v6292_v62 }
 0x44a   : > { %v8052_v47 = vpop.f32.mrb[129].mxu1  ;;  %v7991_v5 = vpop.f32.mrb[131].mxu0  ;;  %7097 = vmatmul.mubr.bf16.gmra.mrb[188].mxu0 %v6291_v46 }
 0x44b   : > { %v6849_v39 = vadd.f32 %v7989_v55, %v10953_v15  ;;  %v8053_v8 = vadd.f32 %v8052_v47, %v8051_v7  ;;  %v8054_v63 = vpop.f32.mrb[130].mxu1  ;;  %7193 = vmatprep.mubr.bf16.mxu1 %v6294_v22  ;;  %v7992_v54 = vadd.f32 %v7991_v5, %v7990_v53 }
 0x44c   : > { %v8055_v41 = vpop.f32.mrb[131].mxu1  ;;  %7194 = vmatmul.mubr.bf16.gmra.mrb[188].mxu1 %v6293_v49 }
 0x44d   : > { %v10956_v60 = vadd.f32 %v8053_v8, %v6849_v39  ;;  %v6852_v20 = vadd.f32 %v7992_v54, %v10953_v15  ;;  %v8056_v27 = vadd.f32 %v8055_v41, %v8054_v63 }
 0x44f   : > { %v10959_v17 = vadd.f32 %v8056_v27, %v6852_v20  ;;  %v7993_v21 = vpop.f32.mrb[132].mxu0 }
 0x450   : > { %v7994_v61 = vpop.f32.mrb[133].mxu0 }
 0x451   : > { %v8057_v43 = vpop.f32.mrb[132].mxu1  ;;  %v7995_v38 = vadd.f32 %v7994_v61, %v7993_v21  ;;  %v7996_v26 = vpop.f32.mrb[134].mxu0 }
 0x452   : > { %v8058_v11 = vpop.f32.mrb[133].mxu1  ;;  %v7997_v1 = vpop.f32.mrb[135].mxu0 }
 0x453   : > { %v6857_v6 = vadd.f32 %v7995_v38, %v10953_v15  ;;  %v8059_v31 = vadd.f32 %v8058_v11, %v8057_v43  ;;  %v8060_v10 = vpop.f32.mrb[134].mxu1  ;;  %v7998_v14 = vadd.f32 %v7997_v1, %v7996_v26 }
 0x454   : > { %v8061_v34 = vpop.f32.mrb[135].mxu1 }
 0x455   : > { %v10962_v51 = vadd.f32 %v8059_v31, %v6857_v6  ;;  %v6860_v23 = vadd.f32 %v7998_v14, %v10953_v15  ;;  %v8062_v3 = vadd.f32 %v8061_v34, %v8060_v10 }
 0x457   : > { %v10965_v58 = vadd.f32 %v8062_v3, %v6860_v23  ;;  %v7999_v35 = vpop.f32.mrb[136].mxu0 }
 0x458   : > { %v8000_v48 = vpop.f32.mrb[137].mxu0 }
 0x459   : > { %v8063_v50 = vpop.f32.mrb[136].mxu1  ;;  %v8001_v24 = vadd.f32 %v8000_v48, %v7999_v35  ;;  %v8002_v12 = vpop.f32.mrb[138].mxu0 }
 0x45a   : > { %v8064_v19 = vpop.f32.mrb[137].mxu1  ;;  %v8003_v59 = vpop.f32.mrb[139].mxu0 }
 0x45b   : > { %v6865_v9 = vadd.f32 %v8001_v24, %v10953_v15  ;;  %v8065_v57 = vadd.f32 %v8064_v19, %v8063_v50  ;;  %v8066_v45 = vpop.f32.mrb[138].mxu1  ;;  %v8004_v28 = vadd.f32 %v8003_v59, %v8002_v12 }
 0x45c   : > { %v8067_v33 = vpop.f32.mrb[139].mxu1 }
 0x45d   : > { %v10968_v44 = vadd.f32 %v8065_v57, %v6865_v9  ;;  %v6868_v37 = vadd.f32 %v8004_v28, %v10953_v15  ;;  %v8068_v18 = vadd.f32 %v8067_v33, %v8066_v45 }
 0x45f   : > { %v10971_v0 = vadd.f32 %v8068_v18, %v6868_v37  ;;  %v8005_v36 = vpop.f32.mrb[140].mxu0 }
 0x460   : > { %v8006_v42 = vpop.f32.mrb[141].mxu0 }
 0x461   : > { %v8069_v29 = vpop.f32.mrb[140].mxu1  ;;  %v8007_v13 = vadd.f32 %v8006_v42, %v8005_v36  ;;  %v8008_v32 = vpop.f32.mrb[142].mxu0 }
 0x462   : > { %v8070_v40 = vpop.f32.mrb[141].mxu1  ;;  %v8009_v25 = vpop.f32.mrb[143].mxu0 }
 0x463   : > { %v6873_v2 = vadd.f32 %v8007_v13, %v10953_v15  ;;  %v8071_v46 = vadd.f32 %v8070_v40, %v8069_v29  ;;  %v8072_v30 = vpop.f32.mrb[142].mxu1  ;;  %v8010_v56 = vadd.f32 %v8009_v25, %v8008_v32 }
 0x464   : > { %v8073_v62 = vpop.f32.mrb[143].mxu1 }
 0x465   : > { %v10974_v16 = vadd.f32 %v8071_v46, %v6873_v2  ;;  %v6876_v4 = vadd.f32 %v8010_v56, %v10953_v15  ;;  %v8074_v49 = vadd.f32 %v8073_v62, %v8072_v30 }
 0x467   : > { %v10977_v52 = vadd.f32 %v8074_v49, %v6876_v4  ;;  %v8011_v22 = vpop.f32.mrb[144].mxu0 }
 0x468   : > { %v8012_v7 = vpop.f32.mrb[145].mxu0 }
 0x469   : > { %v8075_v55 = vpop.f32.mrb[144].mxu1  ;;  %v8013_v53 = vadd.f32 %v8012_v7, %v8011_v22  ;;  %v8014_v47 = vpop.f32.mrb[146].mxu0 }
 0x46a   : > { %v8076_v5 = vpop.f32.mrb[145].mxu1  ;;  %v8015_v39 = vpop.f32.mrb[147].mxu0 }
 0x46b   : > { %v6881_v8 = vadd.f32 %v8013_v53, %v10953_v15  ;;  %v8077_v63 = vadd.f32 %v8076_v5, %v8075_v55  ;;  %v8078_v54 = vpop.f32.mrb[146].mxu1  ;;  %v8016_v41 = vadd.f32 %v8015_v39, %v8014_v47 }
 0x46c   : > { %v8079_v20 = vpop.f32.mrb[147].mxu1 }
 0x46d   : > { %v10980_v27 = vadd.f32 %v8077_v63, %v6881_v8  ;;  %v6884_v21 = vadd.f32 %v8016_v41, %v10953_v15  ;;  %v8080_v61 = vadd.f32 %v8079_v20, %v8078_v54 }
 0x46f   : > { %v10983_v43 = vadd.f32 %v8080_v61, %v6884_v21  ;;  %v8017_v38 = vpop.f32.mrb[148].mxu0 }
 0x470   : > { %v8018_v26 = vpop.f32.mrb[149].mxu0 }
 0x471   : > { %v8081_v11 = vpop.f32.mrb[148].mxu1  ;;  %v8019_v1 = vadd.f32 %v8018_v26, %v8017_v38  ;;  %v8020_v6 = vpop.f32.mrb[150].mxu0 }
 0x472   : > { %v8082_v31 = vpop.f32.mrb[149].mxu1  ;;  %v8021_v10 = vpop.f32.mrb[151].mxu0 }
 0x473   : > { %v6889_v14 = vadd.f32 %v8019_v1, %v10953_v15  ;;  %v8083_v34 = vadd.f32 %v8082_v31, %v8081_v11  ;;  %v8084_v23 = vpop.f32.mrb[150].mxu1  ;;  %v8022_v3 = vadd.f32 %v8021_v10, %v8020_v6 }
 0x474   : > { %v8085_v35 = vpop.f32.mrb[151].mxu1 }
 0x475   : > { %v10986_v48 = vadd.f32 %v8083_v34, %v6889_v14  ;;  %v6892_v50 = vadd.f32 %v8022_v3, %v10953_v15  ;;  %v8086_v24 = vadd.f32 %v8085_v35, %v8084_v23 }
 0x477   : > { %v10989_v12 = vadd.f32 %v8086_v24, %v6892_v50  ;;  %v8023_v19 = vpop.f32.mrb[152].mxu0 }
 0x478   : > { %v8024_v59 = vpop.f32.mrb[153].mxu0 }
 0x479   : > { %v8087_v9 = vpop.f32.mrb[152].mxu1  ;;  %v8025_v57 = vadd.f32 %v8024_v59, %v8023_v19  ;;  %v8026_v45 = vpop.f32.mrb[154].mxu0 }
 0x47a   : > { %v8088_v28 = vpop.f32.mrb[153].mxu1  ;;  %v8027_v33 = vpop.f32.mrb[155].mxu0 }
 0x47b   : > { %v6897_v37 = vadd.f32 %v8025_v57, %v10953_v15  ;;  %v8089_v18 = vadd.f32 %v8088_v28, %v8087_v9  ;;  %v8090_v36 = vpop.f32.mrb[154].mxu1  ;;  %v8028_v42 = vadd.f32 %v8027_v33, %v8026_v45 }
 0x47c   : > { %v8091_v29 = vpop.f32.mrb[155].mxu1 }
 0x47d   : > { %v10992_v13 = vadd.f32 %v8089_v18, %v6897_v37  ;;  %v6900_v32 = vadd.f32 %v8028_v42, %v10953_v15  ;;  %v8092_v40 = vadd.f32 %v8091_v29, %v8090_v36 }
 0x47f   : > { %v10995_v25 = vadd.f32 %v8092_v40, %v6900_v32  ;;  %v8029_v2 = vpop.f32.mrb[156].mxu0 }
 0x480   : > { %v8030_v46 = vpop.f32.mrb[157].mxu0 }
 0x481   : > { %v8093_v30 = vpop.f32.mrb[156].mxu1  ;;  %v8031_v56 = vadd.f32 %v8030_v46, %v8029_v2  ;;  %v8032_v62 = vpop.f32.mrb[158].mxu0 }
 0x482   : > { %v8094_v4 = vpop.f32.mrb[157].mxu1  ;;  %v8033_v49 = vpop.f32.mrb[159].mxu0 }
 0x483   : > { %v6905_v22 = vadd.f32 %v8031_v56, %v10953_v15  ;;  %v8095_v7 = vadd.f32 %v8094_v4, %v8093_v30  ;;  %v8096_v55 = vpop.f32.mrb[158].mxu1  ;;  %v8034_v53 = vadd.f32 %v8033_v49, %v8032_v62 }
 0x484   : > { %v8097_v47 = vpop.f32.mrb[159].mxu1 }
 0x485   : > { %v10998_v5 = vadd.f32 %v8095_v7, %v6905_v22  ;;  %v6908_v39 = vadd.f32 %v8034_v53, %v10953_v15  ;;  %v8098_v8 = vadd.f32 %v8097_v47, %v8096_v55 }
 0x487   : > { %v11001_v63 = vadd.f32 %v8098_v8, %v6908_v39 }
 0x4e5   : > { %v8115_v54 = vpop.f32.mrb[160].mxu0 }
 0x4e6   : > { %v8116_v41 = vpop.f32.mrb[161].mxu0 }
 0x4e7   : > { %v8179_v20 = vpop.f32.mrb[160].mxu1  ;;  %v8117_v21 = vadd.f32 %v8116_v41, %v8115_v54  ;;  %v8118_v61 = vpop.f32.mrb[162].mxu0 }
 0x4e8   : > { %v8180_v38 = vpop.f32.mrb[161].mxu1  ;;  %v8119_v26 = vpop.f32.mrb[163].mxu0 }
 0x4e9   : > { %v7043_v11 = vadd.f32 %v8117_v21, %v10956_v60  ;;  %v8181_v1 = vadd.f32 %v8180_v38, %v8179_v20  ;;  %v8182_v6 = vpop.f32.mrb[162].mxu1  ;;  %v8120_v31 = vadd.f32 %v8119_v26, %v8118_v61 }
 0x4ea   : > { %v8183_v15 = vpop.f32.mrb[163].mxu1 }
 0x4eb   : > { %v7140_v10 = vadd.f32 %v8181_v1, %v7043_v11  ;;  %v7046_v14 = vadd.f32 %v8120_v31, %v10959_v17  ;;  %v8184_v34 = vadd.f32 %v8183_v15, %v8182_v6 }
 0x4ed   : > { %7203 = vst.msk [vmem:[%s11009_s20] sm:$0xff] %vm7202_vm1, %v7140_v10  ;;  %v7143_v60 = vadd.f32 %v8184_v34, %v7046_v14  ;;  %v8121_v23 = vpop.f32.mrb[164].mxu0 }
 0x4ee   : > { %v8122_v3 = vpop.f32.mrb[165].mxu0 }
 0x4ef   : > { %7204 = vst.msk [vmem:[%s11009_s20 + $0x8] sm:$0xff] %vm7202_vm1, %v7143_v60  ;;  %v8185_v35 = vpop.f32.mrb[164].mxu1  ;;  %v8123_v50 = vadd.f32 %v8122_v3, %v8121_v23  ;;  %v8124_v24 = vpop.f32.mrb[166].mxu0 }
 0x4f0   : > { %v8186_v19 = vpop.f32.mrb[165].mxu1  ;;  %v8125_v59 = vpop.f32.mrb[167].mxu0 }
 0x4f1   : > { %v7051_v9 = vadd.f32 %v8123_v50, %v10962_v51  ;;  %v8187_v57 = vadd.f32 %v8186_v19, %v8185_v35  ;;  %v8188_v45 = vpop.f32.mrb[166].mxu1  ;;  %v8126_v17 = vadd.f32 %v8125_v59, %v8124_v24 }
 0x4f2   : > { %v8189_v28 = vpop.f32.mrb[167].mxu1 }
 0x4f3   : > { %v7148_v33 = vadd.f32 %v8187_v57, %v7051_v9  ;;  %v7054_v37 = vadd.f32 %v8126_v17, %v10965_v58  ;;  %v8190_v18 = vadd.f32 %v8189_v28, %v8188_v45 }
 0x4f5   : > { %7205 = vst.msk [vmem:[%s11009_s20 + $0x10] sm:$0xff] %vm7202_vm1, %v7148_v33  ;;  %v7151_v36 = vadd.f32 %v8190_v18, %v7054_v37  ;;  %v8127_v42 = vpop.f32.mrb[168].mxu0 }
 0x4f6   : > { %v8128_v29 = vpop.f32.mrb[169].mxu0 }
 0x4f7   : > { %7206 = vst.msk [vmem:[%s11009_s20 + $0x18] sm:$0xff] %vm7202_vm1, %v7151_v36  ;;  %v8191_v32 = vpop.f32.mrb[168].mxu1  ;;  %v8129_v40 = vadd.f32 %v8128_v29, %v8127_v42  ;;  %v8130_v51 = vpop.f32.mrb[170].mxu0 }
 0x4f8   : > { %v8192_v2 = vpop.f32.mrb[169].mxu1  ;;  %v8131_v46 = vpop.f32.mrb[171].mxu0 }
 0x4f9   : > { %v7059_v30 = vadd.f32 %v8129_v40, %v10968_v44  ;;  %v8193_v56 = vadd.f32 %v8192_v2, %v8191_v32  ;;  %v8194_v62 = vpop.f32.mrb[170].mxu1  ;;  %v8132_v58 = vadd.f32 %v8131_v46, %v8130_v51 }
 0x4fa   : > { %v8195_v4 = vpop.f32.mrb[171].mxu1 }
 0x4fb   : > { %v7156_v49 = vadd.f32 %v8193_v56, %v7059_v30  ;;  %v7062_v22 = vadd.f32 %v8132_v58, %v10971_v0  ;;  %v8196_v7 = vadd.f32 %v8195_v4, %v8194_v62 }
 0x4fd   : > { %7207 = vst.msk [vmem:[%s11009_s20 + $0x20] sm:$0xff] %vm7202_vm1, %v7156_v49  ;;  %v7159_v55 = vadd.f32 %v8196_v7, %v7062_v22  ;;  %v8133_v53 = vpop.f32.mrb[172].mxu0 }
 0x4fe   : > { %v8134_v47 = vpop.f32.mrb[173].mxu0 }
 0x4ff   : > { %7208 = vst.msk [vmem:[%s11009_s20 + $0x28] sm:$0xff] %vm7202_vm1, %v7159_v55  ;;  %v8197_v39 = vpop.f32.mrb[172].mxu1  ;;  %v8135_v8 = vadd.f32 %v8134_v47, %v8133_v53  ;;  %v8136_v44 = vpop.f32.mrb[174].mxu0 }
 0x500   : > { %v8198_v54 = vpop.f32.mrb[173].mxu1  ;;  %v8137_v41 = vpop.f32.mrb[175].mxu0 }
 0x501   : > { %v7067_v20 = vadd.f32 %v8135_v8, %v10974_v16  ;;  %v8199_v21 = vadd.f32 %v8198_v54, %v8197_v39  ;;  %v8200_v61 = vpop.f32.mrb[174].mxu1  ;;  %v8138_v0 = vadd.f32 %v8137_v41, %v8136_v44 }
 0x502   : > { %v8201_v38 = vpop.f32.mrb[175].mxu1 }
 0x503   : > { %v7164_v26 = vadd.f32 %v8199_v21, %v7067_v20  ;;  %v7070_v11 = vadd.f32 %v8138_v0, %v10977_v52  ;;  %v8202_v1 = vadd.f32 %v8201_v38, %v8200_v61 }
 0x505   : > { %7209 = vst.msk [vmem:[%s11009_s20 + $0x30] sm:$0xff] %vm7202_vm1, %v7164_v26  ;;  %v7167_v6 = vadd.f32 %v8202_v1, %v7070_v11  ;;  %v8139_v31 = vpop.f32.mrb[176].mxu0 }
 0x506   : > { %v8140_v15 = vpop.f32.mrb[177].mxu0 }
 0x507   : > { %7210 = vst.msk [vmem:[%s11009_s20 + $0x38] sm:$0xff] %vm7202_vm1, %v7167_v6  ;;  %v8203_v10 = vpop.f32.mrb[176].mxu1  ;;  %v8141_v14 = vadd.f32 %v8140_v15, %v8139_v31  ;;  %v8142_v16 = vpop.f32.mrb[178].mxu0 }
 0x508   : > { %v8204_v34 = vpop.f32.mrb[177].mxu1  ;;  %v8143_v60 = vpop.f32.mrb[179].mxu0 }
 0x509   : > { %v7075_v23 = vadd.f32 %v8141_v14, %v10980_v27  ;;  %v8205_v3 = vadd.f32 %v8204_v34, %v8203_v10  ;;  %v8206_v35 = vpop.f32.mrb[178].mxu1  ;;  %v8144_v52 = vadd.f32 %v8143_v60, %v8142_v16 }
 0x50a   : > { %v8207_v50 = vpop.f32.mrb[179].mxu1 }
 0x50b   : > { %v7172_v24 = vadd.f32 %v8205_v3, %v7075_v23  ;;  %v7078_v19 = vadd.f32 %v8144_v52, %v10983_v43  ;;  %v8208_v59 = vadd.f32 %v8207_v50, %v8206_v35 }
 0x50d   : > { %7211 = vst.msk [vmem:[%s11009_s20 + $0x40] sm:$0xff] %vm7202_vm1, %v7172_v24  ;;  %v7175_v9 = vadd.f32 %v8208_v59, %v7078_v19  ;;  %v8145_v57 = vpop.f32.mrb[180].mxu0 }
 0x50e   : > { %v8146_v45 = vpop.f32.mrb[181].mxu0 }
 0x50f   : > { %7212 = vst.msk [vmem:[%s11009_s20 + $0x48] sm:$0xff] %vm7202_vm1, %v7175_v9  ;;  %v8209_v17 = vpop.f32.mrb[180].mxu1  ;;  %v8147_v28 = vadd.f32 %v8146_v45, %v8145_v57  ;;  %v8148_v27 = vpop.f32.mrb[182].mxu0 }
 0x510   : > { %v8210_v33 = vpop.f32.mrb[181].mxu1  ;;  %v8149_v37 = vpop.f32.mrb[183].mxu0 }
 0x511   : > { %v7083_v18 = vadd.f32 %v8147_v28, %v10986_v48  ;;  %v8211_v36 = vadd.f32 %v8210_v33, %v8209_v17  ;;  %v8212_v42 = vpop.f32.mrb[182].mxu1  ;;  %v8150_v43 = vadd.f32 %v8149_v37, %v8148_v27 }
 0x512   : > { %v8213_v29 = vpop.f32.mrb[183].mxu1 }
 0x513   : > { %v7180_v32 = vadd.f32 %v8211_v36, %v7083_v18  ;;  %v7086_v40 = vadd.f32 %v8150_v43, %v10989_v12  ;;  %v8214_v51 = vadd.f32 %v8213_v29, %v8212_v42 }
 0x515   : > { %7213 = vst.msk [vmem:[%s11009_s20 + $0x50] sm:$0xff] %vm7202_vm1, %v7180_v32  ;;  %v7183_v2 = vadd.f32 %v8214_v51, %v7086_v40  ;;  %v8151_v46 = vpop.f32.mrb[184].mxu0 }
 0x516   : > { %v8152_v30 = vpop.f32.mrb[185].mxu0 }
 0x517   : > { %7214 = vst.msk [vmem:[%s11009_s20 + $0x58] sm:$0xff] %vm7202_vm1, %v7183_v2  ;;  %v8215_v56 = vpop.f32.mrb[184].mxu1  ;;  %v8153_v62 = vadd.f32 %v8152_v30, %v8151_v46  ;;  %v8154_v48 = vpop.f32.mrb[186].mxu0 }
 0x518   : > { %v8216_v58 = vpop.f32.mrb[185].mxu1  ;;  %v8155_v4 = vpop.f32.mrb[187].mxu0 }
 0x519   : > { %v7091_v49 = vadd.f32 %v8153_v62, %v10992_v13  ;;  %v8217_v22 = vadd.f32 %v8216_v58, %v8215_v56  ;;  %v8218_v7 = vpop.f32.mrb[186].mxu1  ;;  %v8156_v12 = vadd.f32 %v8155_v4, %v8154_v48 }
 0x51a   : > { %v8219_v55 = vpop.f32.mrb[187].mxu1 }
 0x51b   : > { %v7188_v53 = vadd.f32 %v8217_v22, %v7091_v49  ;;  %v7094_v47 = vadd.f32 %v8156_v12, %v10995_v25  ;;  %v8220_v39 = vadd.f32 %v8219_v55, %v8218_v7 }
 0x51d   : > { %7215 = vst.msk [vmem:[%s11009_s20 + $0x60] sm:$0xff] %vm7202_vm1, %v7188_v53  ;;  %v7191_v8 = vadd.f32 %v8220_v39, %v7094_v47  ;;  %v8157_v44 = vpop.f32.mrb[188].mxu0 }
 0x51e   : > { %v8158_v54 = vpop.f32.mrb[189].mxu0 }
 0x51f   : > { %7216 = vst.msk [vmem:[%s11009_s20 + $0x68] sm:$0xff] %vm7202_vm1, %v7191_v8  ;;  %v8221_v41 = vpop.f32.mrb[188].mxu1  ;;  %v8159_v20 = vadd.f32 %v8158_v54, %v8157_v44  ;;  %v8160_v13 = vpop.f32.mrb[190].mxu0 }
 0x520   : > { %v8222_v21 = vpop.f32.mrb[189].mxu1  ;;  %v8161_v61 = vpop.f32.mrb[191].mxu0 }
 0x521   : > { %v7099_v0 = vadd.f32 %v8159_v20, %v10998_v5  ;;  %v8223_v38 = vadd.f32 %v8222_v21, %v8221_v41  ;;  %v8224_v26 = vpop.f32.mrb[190].mxu1  ;;  %v8162_v25 = vadd.f32 %v8161_v61, %v8160_v13 }
 0x522   : > { %v8225_v11 = vpop.f32.mrb[191].mxu1 }
 0x523   : > { %v7196_v1 = vadd.f32 %v8223_v38, %v7099_v0  ;;  %v7102_v6 = vadd.f32 %v8162_v25, %v11001_v63  ;;  %v8226_v31 = vadd.f32 %v8225_v11, %v8224_v26 }
 0x525   : > { %7217 = vst.msk [vmem:[%s11009_s20 + $0x70] sm:$0xff] %vm7202_vm1, %v7196_v1  ;;  %v7199_v15 = vadd.f32 %v8226_v31, %v7102_v6 }
 0x527   : > { %7218 = vst.msk [vmem:[%s11009_s20 + $0x78] sm:$0xff] %vm7202_vm1, %v7199_v15 }
 0x528 PF: > { %s20_s24 = sadd.s32 1, %s9024_s24  }
 0x529   : > { %p17_p7 = scmp.ge.s32.totalorder %s20_s24, 4  }
 0x52b   :  { %19 = sbr.rel (!%p17_p7) target bundleno = 3 (0x3), region = 99 }
 0x532   :  { %7241 = vsyncpa [#allocation3], 1 }
 0x533   :  { %7243 = vsyncpa [#allocation3 + $0x1], 1 }
 0x534   :  { %7244 = vsyncpa [#allocation5], 1 }
 0x535   :  { %7245 = vsyncpa [#allocation8], 1 }

</bundles_post_ra>
